<compile_context>
chip_gen: v5e
topology: v5e:2x2
jax: 0.10.0
libtpu: 0.0.40
codegen_flags: <defaults>
</compile_context>

<pallas_src>
import functools

import jax
import jax.numpy as jnp
from jax import lax
from jax.experimental import pallas as pl
from jax.experimental.pallas import tpu as pltpu


def _lstm_classifier_kernel(
    x_ref,      # (t_blk*Bp, F)   time-major, batch-flattened input block
    wih0_ref,   # (F, 4*Hp)       layer-0 input weights     (compute dtype)
    whh0_ref,   # (Hp, 4*Hp)      layer-0 recurrent weights (compute dtype)
    b0_ref,     # (1, 4*Hp)       layer-0 bias (b_ih + b_hh), f32
    wih1_ref,   # (Hp, 4*Hp)      layer-1 input weights     (compute dtype)
    whh1_ref,   # (Hp, 4*Hp)      layer-1 recurrent weights (compute dtype)
    b1_ref,     # (1, 4*Hp)       layer-1 bias, f32
    wc_ref,     # (Hp, Cp)        classifier weights (compute dtype)
    bc_ref,     # (1, Cp)         classifier bias, f32
    out_ref,    # (Bp, Cp)        logits (written on the last grid step)
    h0_ref, c0_ref, h1_ref, c1_ref,   # (Bp, Hp) f32 state carried across grid
    pre0_ref,   # (t_blk*Bp, 4*Hp) f32 scratch for the hoisted input projection
    *, t_blk, seq_len, mask_tail, full_unroll, loop_unroll,
):
    Bp, Hp = h0_ref.shape
    cdt = wih0_ref.dtype    # matmul operand dtype (bf16 by default)
    tb = pl.program_id(0)

    @pl.when(tb == 0)
    def _():
        h0_ref[...] = jnp.zeros_like(h0_ref)
        c0_ref[...] = jnp.zeros_like(c0_ref)
        h1_ref[...] = jnp.zeros_like(h1_ref)
        c1_ref[...] = jnp.zeros_like(c1_ref)

    # Hoisted layer-0 input projection: one big MXU matmul for the whole block.
    pre0_ref[...] = (
        jnp.dot(x_ref[...], wih0_ref[...], preferred_element_type=jnp.float32)
        + b0_ref[...]
    )

    # Hoist the (1,4Hp)->(Bp,4Hp) bias broadcast out of the time loop
    # (JAX does not CSE broadcast_in_dim).
    b1_b = jnp.broadcast_to(b1_ref[...], (Bp, 4 * Hp))

    whh0 = whh0_ref[...]
    wih1 = wih1_ref[...]
    whh1 = whh1_ref[...]

    def gates_to_state(g, c_prev):
        # Hp is a multiple of 128 -> all four gate slices are lane-aligned.
        i_g = jax.nn.sigmoid(g[:, 0 * Hp:1 * Hp])
        f_g = jax.nn.sigmoid(g[:, 1 * Hp:2 * Hp])
        g_g = jnp.tanh(g[:, 2 * Hp:3 * Hp])
        o_g = jax.nn.sigmoid(g[:, 3 * Hp:4 * Hp])
        c_new = f_g * c_prev + i_g * g_g
        h_new = o_g * jnp.tanh(c_new)
        return h_new, c_new

    def step(t, carry):
        # h0c / h1c are the compute-dtype copies (cast once when produced).
        h0, c0, h1, c1, h0c, h1c = carry

        # Layer-1 recurrent matmul depends only on h1_{t-1}: emitted off the
        # h0_t -> h1_t critical path (overlaps the layer-0 whh0 dot).
        p1 = jnp.dot(h1c, whh1, preferred_element_type=jnp.float32) + b1_b

        if isinstance(t, int):   # fully-unrolled path: static slice
            pre0_t = pre0_ref[t * Bp:(t + 1) * Bp, :]
        else:                    # fori_loop path: dynamic, sublane-aligned
            row = pl.multiple_of(t * Bp, Bp)
            pre0_t = pre0_ref[pl.ds(row, Bp), :]

        g0 = pre0_t + jnp.dot(h0c, whh0, preferred_element_type=jnp.float32)
        h0n, c0n = gates_to_state(g0, c0)
        h0nc = h0n.astype(cdt)

        g1 = jnp.dot(h0nc, wih1, preferred_element_type=jnp.float32) + p1
        h1n, c1n = gates_to_state(g1, c1)
        h1nc = h1n.astype(cdt)

        if mask_tail:
            # Freeze the state on zero-padded tail steps (T % t_blk != 0).
            valid = (tb * t_blk + t) < seq_len
            h0n = jnp.where(valid, h0n, h0)
            c0n = jnp.where(valid, c0n, c0)
            h1n = jnp.where(valid, h1n, h1)
            c1n = jnp.where(valid, c1n, c1)
            h0nc = jnp.where(valid, h0nc, h0c)
            h1nc = jnp.where(valid, h1nc, h1c)

        return h0n, c0n, h1n, c1n, h0nc, h1nc

    h0, c0 = h0_ref[...], c0_ref[...]
    h1, c1 = h1_ref[...], c1_ref[...]
    carry = (h0, c0, h1, c1, h0.astype(cdt), h1.astype(cdt))

    if full_unroll:
        for t in range(t_blk):       # short static in-block loop
            carry = step(t, carry)
    else:
        carry = lax.fori_loop(0, t_blk, step, carry, unroll=loop_unroll)

    h0, c0, h1, c1, _, h1c = carry
    h0_ref[...], c0_ref[...] = h0, c0
    h1_ref[...], c1_ref[...] = h1, c1

    @pl.when(tb == pl.num_programs(0) - 1)
    def _():
        out_ref[...] = (
            jnp.dot(h1c, wc_ref[...], preferred_element_type=jnp.float32)
            + bc_ref[...]
        ).astype(out_ref.dtype)


# --------------------------- host-side wrapper ------------------------------

def _round_up(x, m):
    return (x + m - 1) // m * m


def _pad_gate_cols(w, H, Hp):
    """(in_dim, 4H) -> (in_dim, 4Hp), zero-padding each gate block separately."""
    in_dim = w.shape[0]
    w = w.reshape(in_dim, 4, H)
    w = jnp.pad(w, ((0, 0), (0, 0), (0, Hp - H)))
    return w.reshape(in_dim, 4 * Hp)


def _pad_rows(w, new_rows):
    return jnp.pad(w, ((0, new_rows - w.shape[0]),) + ((0, 0),) * (w.ndim - 1))


def sequence_model_forward(x_btf, params, *, compute_dtype=jnp.bfloat16,
                           t_block=64):
    """x_btf: (B, T, F) float32 — matches PyTorch batch_first=True input."""
    B, T, F = x_btf.shape
    H = params["w_hh0"].shape[0] // 4
    C = params["w_cls"].shape[0]

    LANE, SUBLANE = 128, 8
    Hp = _round_up(H, LANE)                   # lane-aligned hidden size
    Bp = _round_up(max(B, SUBLANE), SUBLANE)  # sublane-full batch
    Cp = _round_up(C, LANE)                   # lane-dense classifier output

    # Time-block: pad T up to a multiple of t_blk (state frozen on padded
    # steps in-kernel), so awkward/prime T never collapses to t_blk=1.
    t_blk = max(1, min(t_block, T))
    Tp = _round_up(T, t_blk)
    n_blocks = Tp // t_blk
    mask_tail = Tp != T

    # Unroll policy: full unroll for short blocks, partially-unrolled
    # fori_loop for long blocks.
    full_unroll = t_blk <= 32
    loop_unroll = 1
    if not full_unroll:
        for u in (8, 4, 2, 1):
            if t_blk % u == 0:
                loop_unroll = u
                break

    f32 = jnp.float32

    # ---- weights: PyTorch layout -> transposed, gate-padded ----
    wih0 = _pad_gate_cols(params["w_ih0"].T.astype(f32), H, Hp)                     # (F, 4Hp)
    whh0 = _pad_rows(_pad_gate_cols(params["w_hh0"].T.astype(f32), H, Hp), Hp)      # (Hp, 4Hp)
    b0 = _pad_gate_cols((params["b_ih0"] + params["b_hh0"])[None, :].astype(f32), H, Hp)
    wih1 = _pad_rows(_pad_gate_cols(params["w_ih1"].T.astype(f32), H, Hp), Hp)      # (Hp, 4Hp)
    whh1 = _pad_rows(_pad_gate_cols(params["w_hh1"].T.astype(f32), H, Hp), Hp)      # (Hp, 4Hp)
    b1 = _pad_gate_cols((params["b_ih1"] + params["b_hh1"])[None, :].astype(f32), H, Hp)
    wc = jnp.pad(params["w_cls"].T.astype(f32), ((0, Hp - H), (0, Cp - C)))         # (Hp, Cp)
    bc = jnp.pad(params["b_cls"][None, :].astype(f32), ((0, 0), (0, Cp - C)))

    # Matmul operands in compute dtype; biases stay f32 (added post-accumulate).
    wih0 = wih0.astype(compute_dtype)
    whh0 = whh0.astype(compute_dtype)
    wih1 = wih1.astype(compute_dtype)
    whh1 = whh1.astype(compute_dtype)
    wc = wc.astype(compute_dtype)

    # ---- input: (B,T,F) -> time-major, batch/time-padded, flat (Tp*Bp, F) ----
    x = jnp.transpose(x_btf, (1, 0, 2))                       # (T, B, F)
    x = jnp.pad(x, ((0, Tp - T), (0, Bp - B), (0, 0)))        # (Tp, Bp, F)
    x = x.reshape(Tp * Bp, F).astype(compute_dtype)

    kernel = functools.partial(
        _lstm_classifier_kernel,
        t_blk=t_blk, seq_len=T, mask_tail=mask_tail,
        full_unroll=full_unroll, loop_unroll=loop_unroll,
    )

    grid_spec = pltpu.PrefetchScalarGridSpec(
        num_scalar_prefetch=0,
        grid=(n_blocks,),
        in_specs=[
            pl.BlockSpec((t_blk * Bp, F), lambda t: (t, 0)),   # streamed x block
            pl.BlockSpec((F, 4 * Hp), lambda t: (0, 0)),       # wih0 (resident)
            pl.BlockSpec((Hp, 4 * Hp), lambda t: (0, 0)),      # whh0
            pl.BlockSpec((1, 4 * Hp), lambda t: (0, 0)),       # b0
            pl.BlockSpec((Hp, 4 * Hp), lambda t: (0, 0)),      # wih1
            pl.BlockSpec((Hp, 4 * Hp), lambda t: (0, 0)),      # whh1
            pl.BlockSpec((1, 4 * Hp), lambda t: (0, 0)),       # b1
            pl.BlockSpec((Hp, Cp), lambda t: (0, 0)),          # wc
            pl.BlockSpec((1, Cp), lambda t: (0, 0)),           # bc
        ],
        out_specs=pl.BlockSpec((Bp, Cp), lambda t: (0, 0)),
        scratch_shapes=[pltpu.VMEM((Bp, Hp), jnp.float32) for _ in range(4)]
                     + [pltpu.VMEM((t_blk * Bp, 4 * Hp), jnp.float32)],
    )

    out_padded = pl.pallas_call(
        kernel,
        out_shape=jax.ShapeDtypeStruct((Bp, Cp), jnp.float32),
        grid_spec=grid_spec,
        compiler_params=pltpu.CompilerParams(
            dimension_semantics=("arbitrary",),   # serial recurrence over T blocks
            vmem_limit_bytes=32 * 1024 * 1024,    # ~10x actual use; safe on v5e/v6e/v7x
        ),
    )(x, wih0, whh0, b0, wih1, whh1, b1, wc, bc)

    return out_padded[:B, :C]


# --------------------------- init + reference -------------------------------

def init_params(key, n_features, n_classes, n_hidden):
    """Deterministic init mimicking PyTorch's U(-1/sqrt(H), 1/sqrt(H))."""
    ks = jax.random.split(key, 10)
    s = 1.0 / jnp.sqrt(n_hidden)

    def u(k, shape):
        return jax.random.uniform(k, shape, jnp.float32, -s, s)

    return {
        # layer 0
        "w_ih0": u(ks[0], (4 * n_hidden, n_features)),
        "w_hh0": u(ks[1], (4 * n_hidden, n_hidden)),
        "b_ih0": u(ks[2], (4 * n_hidden,)),
        "b_hh0": u(ks[3], (4 * n_hidden,)),
        # layer 1
        "w_ih1": u(ks[4], (4 * n_hidden, n_hidden)),
        "w_hh1": u(ks[5], (4 * n_hidden, n_hidden)),
        "b_ih1": u(ks[6], (4 * n_hidden,)),
        "b_hh1": u(ks[7], (4 * n_hidden,)),
        # classifier
        "w_cls": u(ks[8], (n_classes, n_hidden)),
        "b_cls": u(ks[9], (n_classes,)),
    }


def _reference_forward(x_btf, p):
    """Pure-JAX reference (same math) for a sanity check."""
    B, T, F = x_btf.shape
    H = p["w_hh0"].shape[0] // 4

    def cell(x_t, h, c, w_ih, w_hh, b_ih, b_hh):
        g = x_t @ w_ih.T + h @ w_hh.T + b_ih + b_hh
        i = jax.nn.sigmoid(g[:, :H])
        f = jax.nn.sigmoid(g[:, H:2 * H])
        gg = jnp.tanh(g[:, 2 * H:3 * H])
        o = jax.nn.sigmoid(g[:, 3 * H:])
        c = f * c + i * gg
        h = o * jnp.tanh(c)
        return h, c

    h0 = c0 = h1 = c1 = jnp.zeros((B, H), jnp.float32)
    for t in range(T):
        x_t = x_btf[:, t, :]
        h0, c0 = cell(x_t, h0, c0, p["w_ih0"], p["w_hh0"], p["b_ih0"], p["b_hh0"])
        h1, c1 = cell(h0, h1, c1, p["w_ih1"], p["w_hh1"], p["b_ih1"], p["b_hh1"])
    return h1 @ p["w_cls"].T + p["b_cls"]


if __name__ == "__main__":
    n_features, n_hidden, n_classes = 16, 32, 5
    B = 4

    key = jax.random.PRNGKey(0)
    k_x, k_p = jax.random.split(key)
    params = init_params(k_p, n_features, n_classes, n_hidden)

    # --- Case 1+2: T=8, t_block=4 -> 2 exact blocks, fully-unrolled loop. ---
    T = 8
    x = jax.random.normal(k_x, (B, T, n_features), jnp.float32)
    ref = _reference_forward(x, params)

    out_f32 = jax.block_until_ready(
        sequence_model_forward(x, params, compute_dtype=jnp.float32, t_block=4))
    assert out_f32.shape == (B, n_classes), out_f32.shape
    assert jnp.all(jnp.isfinite(out_f32))
    assert jnp.allclose(out_f32, ref, atol=1e-3, rtol=1e-3), (out_f32, ref)

    out_bf16 = jax.block_until_ready(
        sequence_model_forward(x, params, compute_dtype=jnp.bfloat16, t_block=4))
    assert out_bf16.shape == (B, n_classes), out_bf16.shape
    assert jnp.all(jnp.isfinite(out_bf16))
    assert jnp.allclose(out_bf16, ref, atol=5e-2, rtol=5e-2), (out_bf16, ref)

    # --- Case 3: T=11, t_block=4 -> padded tail block (state frozen). ---
    T2 = 11
    x2 = jax.random.normal(jax.random.fold_in(k_x, 1), (B, T2, n_features),
                           jnp.float32)
    ref2 = _reference_forward(x2, params)
    out2 = jax.block_until_ready(
        sequence_model_forward(x2, params, compute_dtype=jnp.float32, t_block=4))
    assert jnp.allclose(out2, ref2, atol=5e-3, rtol=5e-3), (out2, ref2)

    # --- Case 4: T=40 in one block -> in-kernel lax.fori_loop(unroll=8). ---
    T3 = 40
    x3 = jax.random.normal(jax.random.fold_in(k_x, 2), (B, T3, n_features),
                           jnp.float32)
    ref3 = _reference_forward(x3, params)
    out3 = jax.block_until_ready(
        sequence_model_forward(x3, params, compute_dtype=jnp.float32, t_block=64))
    assert jnp.allclose(out3, ref3, atol=5e-3, rtol=5e-3), (out3, ref3)

    print("KERNEL_OK")
</pallas_src>

<mosaic_0001>
module attributes {stable_mosaic.version = 11 : i64} {
  func.func @_lstm_classifier_kernel(%arg0: i32, %arg1: memref<32x16xf32, #tpu.memory_space<vmem>>, %arg2: memref<16x512xf32, #tpu.memory_space<vmem>>, %arg3: memref<128x512xf32, #tpu.memory_space<vmem>>, %arg4: memref<1x512xf32, #tpu.memory_space<vmem>>, %arg5: memref<128x512xf32, #tpu.memory_space<vmem>>, %arg6: memref<128x512xf32, #tpu.memory_space<vmem>>, %arg7: memref<1x512xf32, #tpu.memory_space<vmem>>, %arg8: memref<128x128xf32, #tpu.memory_space<vmem>>, %arg9: memref<1x128xf32, #tpu.memory_space<vmem>>, %arg10: memref<8x128xf32, #tpu.memory_space<vmem>>, %arg11: memref<8x128xf32, #tpu.memory_space<vmem>>, %arg12: memref<8x128xf32, #tpu.memory_space<vmem>>, %arg13: memref<8x128xf32, #tpu.memory_space<vmem>>, %arg14: memref<8x128xf32, #tpu.memory_space<vmem>>, %arg15: memref<32x512xf32, #tpu.memory_space<vmem>>) attributes {dimension_semantics = [#tpu.dimension_semantics<arbitrary>], iteration_bounds = array<i64: 2>, scalar_prefetch = 0 : i64, scratch_operands = 5 : i64, tpu.core_type = #tpu.core_type<tc>, window_params = [{transform_indices = @transform_0, window_bounds = array<i64: 32, 16>}, {pipeline_mode = #tpu.pipeline_mode<synchronous>, transform_indices = @transform_1, window_bounds = array<i64: 16, 512>}, {pipeline_mode = #tpu.pipeline_mode<synchronous>, transform_indices = @transform_2, window_bounds = array<i64: 128, 512>}, {pipeline_mode = #tpu.pipeline_mode<synchronous>, transform_indices = @transform_3, window_bounds = array<i64: 1, 512>}, {pipeline_mode = #tpu.pipeline_mode<synchronous>, transform_indices = @transform_4, window_bounds = array<i64: 128, 512>}, {pipeline_mode = #tpu.pipeline_mode<synchronous>, transform_indices = @transform_5, window_bounds = array<i64: 128, 512>}, {pipeline_mode = #tpu.pipeline_mode<synchronous>, transform_indices = @transform_6, window_bounds = array<i64: 1, 512>}, {pipeline_mode = #tpu.pipeline_mode<synchronous>, transform_indices = @transform_7, window_bounds = array<i64: 128, 128>}, {pipeline_mode = #tpu.pipeline_mode<synchronous>, transform_indices = @transform_8, window_bounds = array<i64: 1, 128>}, {pipeline_mode = #tpu.pipeline_mode<synchronous>, transform_indices = @transform_9, window_bounds = array<i64: 8, 128>}]} {
    %c0_i32 = arith.constant 0 : i32
    %0 = arith.cmpi eq, %arg0, %c0_i32 : i32
    %1 = arith.extui %0 : i1 to i32
    %c0_i32_0 = arith.constant 0 : i32
    %2 = arith.cmpi ne, %1, %c0_i32_0 : i32
    scf.if %2 {
      %cst_74 = arith.constant 0.000000e+00 : f32
      %255 = vector.broadcast %cst_74 : f32 to vector<8x128xf32>
      %c0_75 = arith.constant 0 : index
      %c0_76 = arith.constant 0 : index
      %256 = vector.load %arg11[%c0_75, %c0_76] : memref<8x128xf32, #tpu.memory_space<vmem>>, vector<8x128xf32>
      tpu.vector_store %arg11[%c0_75, %c0_76], %255 {strides = array<i32>} : memref<8x128xf32, #tpu.memory_space<vmem>>, vector<8x128xf32>,
      %cst_77 = arith.constant 0.000000e+00 : f32
      %257 = vector.broadcast %cst_77 : f32 to vector<8x128xf32>
      %c0_78 = arith.constant 0 : index
      %c0_79 = arith.constant 0 : index
      %258 = vector.load %arg12[%c0_78, %c0_79] : memref<8x128xf32, #tpu.memory_space<vmem>>, vector<8x128xf32>
      tpu.vector_store %arg12[%c0_78, %c0_79], %257 {strides = array<i32>} : memref<8x128xf32, #tpu.memory_space<vmem>>, vector<8x128xf32>,
      %cst_80 = arith.constant 0.000000e+00 : f32
      %259 = vector.broadcast %cst_80 : f32 to vector<8x128xf32>
      %c0_81 = arith.constant 0 : index
      %c0_82 = arith.constant 0 : index
      %260 = vector.load %arg13[%c0_81, %c0_82] : memref<8x128xf32, #tpu.memory_space<vmem>>, vector<8x128xf32>
      tpu.vector_store %arg13[%c0_81, %c0_82], %259 {strides = array<i32>} : memref<8x128xf32, #tpu.memory_space<vmem>>, vector<8x128xf32>,
      %cst_83 = arith.constant 0.000000e+00 : f32
      %261 = vector.broadcast %cst_83 : f32 to vector<8x128xf32>
      %c0_84 = arith.constant 0 : index
      %c0_85 = arith.constant 0 : index
      %262 = vector.load %arg14[%c0_84, %c0_85] : memref<8x128xf32, #tpu.memory_space<vmem>>, vector<8x128xf32>
      tpu.vector_store %arg14[%c0_84, %c0_85], %261 {strides = array<i32>} : memref<8x128xf32, #tpu.memory_space<vmem>>, vector<8x128xf32>,
    } else {
    }
    %c0 = arith.constant 0 : index
    %c0_1 = arith.constant 0 : index
    %3 = vector.load %arg1[%c0, %c0_1] : memref<32x16xf32, #tpu.memory_space<vmem>>, vector<32x16xf32>
    %c0_2 = arith.constant 0 : index
    %c0_3 = arith.constant 0 : index
    %4 = vector.load %arg2[%c0_2, %c0_3] : memref<16x512xf32, #tpu.memory_space<vmem>>, vector<16x512xf32>
    %cst = arith.constant dense<0.000000e+00> : vector<32x512xf32>
    %5 = tpu.matmul %3, %4, %cst {dimension_numbers = #tpu.dot_dimension_numbers<[1], [0], [0], [1], [0, 0, 1, 1], [], []>} : vector<32x16xf32>, vector<16x512xf32>, vector<32x512xf32> -> vector<32x512xf32>
    %c0_4 = arith.constant 0 : index
    %c0_5 = arith.constant 0 : index
    %6 = vector.load %arg4[%c0_4, %c0_5] : memref<1x512xf32, #tpu.memory_space<vmem>>, vector<1x512xf32>
    %7 = vector.broadcast %6 : vector<1x512xf32> to vector<32x512xf32>
    %8 = arith.addf %5, %7 : vector<32x512xf32>
    %c0_6 = arith.constant 0 : index
    %c0_7 = arith.constant 0 : index
    %9 = vector.load %arg15[%c0_6, %c0_7] : memref<32x512xf32, #tpu.memory_space<vmem>>, vector<32x512xf32>
    tpu.vector_store %arg15[%c0_6, %c0_7], %8 {strides = array<i32>} : memref<32x512xf32, #tpu.memory_space<vmem>>, vector<32x512xf32>,
    %c0_8 = arith.constant 0 : index
    %c0_9 = arith.constant 0 : index
    %10 = vector.load %arg7[%c0_8, %c0_9] : memref<1x512xf32, #tpu.memory_space<vmem>>, vector<1x512xf32>
    %11 = vector.shape_cast %10 : vector<1x512xf32> to vector<1x512xf32>
    %12 = vector.broadcast %11 : vector<1x512xf32> to vector<8x512xf32>
    %c0_10 = arith.constant 0 : index
    %c0_11 = arith.constant 0 : index
    %13 = vector.load %arg3[%c0_10, %c0_11] : memref<128x512xf32, #tpu.memory_space<vmem>>, vector<128x512xf32>
    %c0_12 = arith.constant 0 : index
    %c0_13 = arith.constant 0 : index
    %14 = vector.load %arg5[%c0_12, %c0_13] : memref<128x512xf32, #tpu.memory_space<vmem>>, vector<128x512xf32>
    %c0_14 = arith.constant 0 : index
    %c0_15 = arith.constant 0 : index
    %15 = vector.load %arg6[%c0_14, %c0_15] : memref<128x512xf32, #tpu.memory_space<vmem>>, vector<128x512xf32>
    %c0_16 = arith.constant 0 : index
    %c0_17 = arith.constant 0 : index
    %16 = vector.load %arg11[%c0_16, %c0_17] : memref<8x128xf32, #tpu.memory_space<vmem>>, vector<8x128xf32>
    %c0_18 = arith.constant 0 : index
    %c0_19 = arith.constant 0 : index
    %17 = vector.load %arg12[%c0_18, %c0_19] : memref<8x128xf32, #tpu.memory_space<vmem>>, vector<8x128xf32>
    %c0_20 = arith.constant 0 : index
    %c0_21 = arith.constant 0 : index
    %18 = vector.load %arg13[%c0_20, %c0_21] : memref<8x128xf32, #tpu.memory_space<vmem>>, vector<8x128xf32>
    %c0_22 = arith.constant 0 : index
    %c0_23 = arith.constant 0 : index
    %19 = vector.load %arg14[%c0_22, %c0_23] : memref<8x128xf32, #tpu.memory_space<vmem>>, vector<8x128xf32>
    %cst_24 = arith.constant dense<0.000000e+00> : vector<8x512xf32>
    %20 = tpu.matmul %18, %15, %cst_24 {dimension_numbers = #tpu.dot_dimension_numbers<[1], [0], [0], [1], [0, 0, 1, 1], [], []>} : vector<8x128xf32>, vector<128x512xf32>, vector<8x512xf32> -> vector<8x512xf32>
    %21 = arith.addf %20, %12 : vector<8x512xf32>
    %c0_25 = arith.constant 0 : index
    %c0_26 = arith.constant 0 : index
    %22 = vector.load %arg15[%c0_25, %c0_26] : memref<32x512xf32, #tpu.memory_space<vmem>>, vector<8x512xf32>
    %cst_27 = arith.constant dense<0.000000e+00> : vector<8x512xf32>
    %23 = tpu.matmul %16, %13, %cst_27 {dimension_numbers = #tpu.dot_dimension_numbers<[1], [0], [0], [1], [0, 0, 1, 1], [], []>} : vector<8x128xf32>, vector<128x512xf32>, vector<8x512xf32> -> vector<8x512xf32>
    %24 = arith.addf %22, %23 : vector<8x512xf32>
    %25 = vector.extract_strided_slice %24 {offsets = [0, 0], sizes = [8, 128], strides = [1, 1]} : vector<8x512xf32> to vector<8x128xf32>
    %26 = arith.negf %25 : vector<8x128xf32>
    %27 = math.exp %26 : vector<8x128xf32>
    %cst_28 = arith.constant 1.000000e+00 : f32
    %28 = vector.broadcast %cst_28 : f32 to vector<8x128xf32>
    %29 = arith.addf %28, %27 : vector<8x128xf32>
    %30 = arith.divf %28, %29 : vector<8x128xf32>
    %31 = vector.extract_strided_slice %24 {offsets = [0, 128], sizes = [8, 128], strides = [1, 1]} : vector<8x512xf32> to vector<8x128xf32>
    %32 = arith.negf %31 : vector<8x128xf32>
    %33 = math.exp %32 : vector<8x128xf32>
    %cst_29 = arith.constant 1.000000e+00 : f32
    %34 = vector.broadcast %cst_29 : f32 to vector<8x128xf32>
    %35 = arith.addf %34, %33 : vector<8x128xf32>
    %36 = arith.divf %34, %35 : vector<8x128xf32>
    %37 = vector.extract_strided_slice %24 {offsets = [0, 256], sizes = [8, 128], strides = [1, 1]} : vector<8x512xf32> to vector<8x128xf32>
    %38 = math.tanh %37 : vector<8x128xf32>
    %39 = vector.extract_strided_slice %24 {offsets = [0, 384], sizes = [8, 128], strides = [1, 1]} : vector<8x512xf32> to vector<8x128xf32>
    %40 = arith.negf %39 : vector<8x128xf32>
    %41 = math.exp %40 : vector<8x128xf32>
    %cst_30 = arith.constant 1.000000e+00 : f32
    %42 = vector.broadcast %cst_30 : f32 to vector<8x128xf32>
    %43 = arith.addf %42, %41 : vector<8x128xf32>
    %44 = arith.divf %42, %43 : vector<8x128xf32>
    %45 = arith.mulf %36, %17 : vector<8x128xf32>
    %46 = arith.mulf %30, %38 : vector<8x128xf32>
    %47 = arith.addf %45, %46 : vector<8x128xf32>
    %48 = math.tanh %47 : vector<8x128xf32>
    %49 = arith.mulf %44, %48 : vector<8x128xf32>
    %cst_31 = arith.constant dense<0.000000e+00> : vector<8x512xf32>
    %50 = tpu.matmul %49, %14, %cst_31 {dimension_numbers = #tpu.dot_dimension_numbers<[1], [0], [0], [1], [0, 0, 1, 1], [], []>} : vector<8x128xf32>, vector<128x512xf32>, vector<8x512xf32> -> vector<8x512xf32>
    %51 = arith.addf %50, %21 : vector<8x512xf32>
    %52 = vector.extract_strided_slice %51 {offsets = [0, 0], sizes = [8, 128], strides = [1, 1]} : vector<8x512xf32> to vector<8x128xf32>
    %53 = arith.negf %52 : vector<8x128xf32>
    %54 = math.exp %53 : vector<8x128xf32>
    %cst_32 = arith.constant 1.000000e+00 : f32
    %55 = vector.broadcast %cst_32 : f32 to vector<8x128xf32>
    %56 = arith.addf %55, %54 : vector<8x128xf32>
    %57 = arith.divf %55, %56 : vector<8x128xf32>
    %58 = vector.extract_strided_slice %51 {offsets = [0, 128], sizes = [8, 128], strides = [1, 1]} : vector<8x512xf32> to vector<8x128xf32>
    %59 = arith.negf %58 : vector<8x128xf32>
    %60 = math.exp %59 : vector<8x128xf32>
    %cst_33 = arith.constant 1.000000e+00 : f32
    %61 = vector.broadcast %cst_33 : f32 to vector<8x128xf32>
    %62 = arith.addf %61, %60 : vector<8x128xf32>
    %63 = arith.divf %61, %62 : vector<8x128xf32>
    %64 = vector.extract_strided_slice %51 {offsets = [0, 256], sizes = [8, 128], strides = [1, 1]} : vector<8x512xf32> to vector<8x128xf32>
    %65 = math.tanh %64 : vector<8x128xf32>
    %66 = vector.extract_strided_slice %51 {offsets = [0, 384], sizes = [8, 128], strides = [1, 1]} : vector<8x512xf32> to vector<8x128xf32>
    %67 = arith.negf %66 : vector<8x128xf32>
    %68 = math.exp %67 : vector<8x128xf32>
    %cst_34 = arith.constant 1.000000e+00 : f32
    %69 = vector.broadcast %cst_34 : f32 to vector<8x128xf32>
    %70 = arith.addf %69, %68 : vector<8x128xf32>
    %71 = arith.divf %69, %70 : vector<8x128xf32>
    %72 = arith.mulf %63, %19 : vector<8x128xf32>
    %73 = arith.mulf %57, %65 : vector<8x128xf32>
    %74 = arith.addf %72, %73 : vector<8x128xf32>
    %75 = math.tanh %74 : vector<8x128xf32>
    %76 = arith.mulf %71, %75 : vector<8x128xf32>
    %cst_35 = arith.constant dense<0.000000e+00> : vector<8x512xf32>
    %77 = tpu.matmul %76, %15, %cst_35 {dimension_numbers = #tpu.dot_dimension_numbers<[1], [0], [0], [1], [0, 0, 1, 1], [], []>} : vector<8x128xf32>, vector<128x512xf32>, vector<8x512xf32> -> vector<8x512xf32>
    %78 = arith.addf %77, %12 : vector<8x512xf32>
    %c8 = arith.constant 8 : index
    %c0_36 = arith.constant 0 : index
    %79 = vector.load %arg15[%c8, %c0_36] : memref<32x512xf32, #tpu.memory_space<vmem>>, vector<8x512xf32>
    %cst_37 = arith.constant dense<0.000000e+00> : vector<8x512xf32>
    %80 = tpu.matmul %49, %13, %cst_37 {dimension_numbers = #tpu.dot_dimension_numbers<[1], [0], [0], [1], [0, 0, 1, 1], [], []>} : vector<8x128xf32>, vector<128x512xf32>, vector<8x512xf32> -> vector<8x512xf32>
    %81 = arith.addf %79, %80 : vector<8x512xf32>
    %82 = vector.extract_strided_slice %81 {offsets = [0, 0], sizes = [8, 128], strides = [1, 1]} : vector<8x512xf32> to vector<8x128xf32>
    %83 = arith.negf %82 : vector<8x128xf32>
    %84 = math.exp %83 : vector<8x128xf32>
    %cst_38 = arith.constant 1.000000e+00 : f32
    %85 = vector.broadcast %cst_38 : f32 to vector<8x128xf32>
    %86 = arith.addf %85, %84 : vector<8x128xf32>
    %87 = arith.divf %85, %86 : vector<8x128xf32>
    %88 = vector.extract_strided_slice %81 {offsets = [0, 128], sizes = [8, 128], strides = [1, 1]} : vector<8x512xf32> to vector<8x128xf32>
    %89 = arith.negf %88 : vector<8x128xf32>
    %90 = math.exp %89 : vector<8x128xf32>
    %cst_39 = arith.constant 1.000000e+00 : f32
    %91 = vector.broadcast %cst_39 : f32 to vector<8x128xf32>
    %92 = arith.addf %91, %90 : vector<8x128xf32>
    %93 = arith.divf %91, %92 : vector<8x128xf32>
    %94 = vector.extract_strided_slice %81 {offsets = [0, 256], sizes = [8, 128], strides = [1, 1]} : vector<8x512xf32> to vector<8x128xf32>
    %95 = math.tanh %94 : vector<8x128xf32>
    %96 = vector.extract_strided_slice %81 {offsets = [0, 384], sizes = [8, 128], strides = [1, 1]} : vector<8x512xf32> to vector<8x128xf32>
    %97 = arith.negf %96 : vector<8x128xf32>
    %98 = math.exp %97 : vector<8x128xf32>
    %cst_40 = arith.constant 1.000000e+00 : f32
    %99 = vector.broadcast %cst_40 : f32 to vector<8x128xf32>
    %100 = arith.addf %99, %98 : vector<8x128xf32>
    %101 = arith.divf %99, %100 : vector<8x128xf32>
    %102 = arith.mulf %93, %47 : vector<8x128xf32>
    %103 = arith.mulf %87, %95 : vector<8x128xf32>
    %104 = arith.addf %102, %103 : vector<8x128xf32>
    %105 = math.tanh %104 : vector<8x128xf32>
    %106 = arith.mulf %101, %105 : vector<8x128xf32>
    %cst_41 = arith.constant dense<0.000000e+00> : vector<8x512xf32>
    %107 = tpu.matmul %106, %14, %cst_41 {dimension_numbers = #tpu.dot_dimension_numbers<[1], [0], [0], [1], [0, 0, 1, 1], [], []>} : vector<8x128xf32>, vector<128x512xf32>, vector<8x512xf32> -> vector<8x512xf32>
    %108 = arith.addf %107, %78 : vector<8x512xf32>
    %109 = vector.extract_strided_slice %108 {offsets = [0, 0], sizes = [8, 128], strides = [1, 1]} : vector<8x512xf32> to vector<8x128xf32>
    %110 = arith.negf %109 : vector<8x128xf32>
    %111 = math.exp %110 : vector<8x128xf32>
    %cst_42 = arith.constant 1.000000e+00 : f32
    %112 = vector.broadcast %cst_42 : f32 to vector<8x128xf32>
    %113 = arith.addf %112, %111 : vector<8x128xf32>
    %114 = arith.divf %112, %113 : vector<8x128xf32>
    %115 = vector.extract_strided_slice %108 {offsets = [0, 128], sizes = [8, 128], strides = [1, 1]} : vector<8x512xf32> to vector<8x128xf32>
    %116 = arith.negf %115 : vector<8x128xf32>
    %117 = math.exp %116 : vector<8x128xf32>
    %cst_43 = arith.constant 1.000000e+00 : f32
    %118 = vector.broadcast %cst_43 : f32 to vector<8x128xf32>
    %119 = arith.addf %118, %117 : vector<8x128xf32>
    %120 = arith.divf %118, %119 : vector<8x128xf32>
    %121 = vector.extract_strided_slice %108 {offsets = [0, 256], sizes = [8, 128], strides = [1, 1]} : vector<8x512xf32> to vector<8x128xf32>
    %122 = math.tanh %121 : vector<8x128xf32>
    %123 = vector.extract_strided_slice %108 {offsets = [0, 384], sizes = [8, 128], strides = [1, 1]} : vector<8x512xf32> to vector<8x128xf32>
    %124 = arith.negf %123 : vector<8x128xf32>
    %125 = math.exp %124 : vector<8x128xf32>
    %cst_44 = arith.constant 1.000000e+00 : f32
    %126 = vector.broadcast %cst_44 : f32 to vector<8x128xf32>
    %127 = arith.addf %126, %125 : vector<8x128xf32>
    %128 = arith.divf %126, %127 : vector<8x128xf32>
    %129 = arith.mulf %120, %74 : vector<8x128xf32>
    %130 = arith.mulf %114, %122 : vector<8x128xf32>
    %131 = arith.addf %129, %130 : vector<8x128xf32>
    %132 = math.tanh %131 : vector<8x128xf32>
    %133 = arith.mulf %128, %132 : vector<8x128xf32>
    %cst_45 = arith.constant dense<0.000000e+00> : vector<8x512xf32>
    %134 = tpu.matmul %133, %15, %cst_45 {dimension_numbers = #tpu.dot_dimension_numbers<[1], [0], [0], [1], [0, 0, 1, 1], [], []>} : vector<8x128xf32>, vector<128x512xf32>, vector<8x512xf32> -> vector<8x512xf32>
    %135 = arith.addf %134, %12 : vector<8x512xf32>
    %c16 = arith.constant 16 : index
    %c0_46 = arith.constant 0 : index
    %136 = vector.load %arg15[%c16, %c0_46] : memref<32x512xf32, #tpu.memory_space<vmem>>, vector<8x512xf32>
    %cst_47 = arith.constant dense<0.000000e+00> : vector<8x512xf32>
    %137 = tpu.matmul %106, %13, %cst_47 {dimension_numbers = #tpu.dot_dimension_numbers<[1], [0], [0], [1], [0, 0, 1, 1], [], []>} : vector<8x128xf32>, vector<128x512xf32>, vector<8x512xf32> -> vector<8x512xf32>
    %138 = arith.addf %136, %137 : vector<8x512xf32>
    %139 = vector.extract_strided_slice %138 {offsets = [0, 0], sizes = [8, 128], strides = [1, 1]} : vector<8x512xf32> to vector<8x128xf32>
    %140 = arith.negf %139 : vector<8x128xf32>
    %141 = math.exp %140 : vector<8x128xf32>
    %cst_48 = arith.constant 1.000000e+00 : f32
    %142 = vector.broadcast %cst_48 : f32 to vector<8x128xf32>
    %143 = arith.addf %142, %141 : vector<8x128xf32>
    %144 = arith.divf %142, %143 : vector<8x128xf32>
    %145 = vector.extract_strided_slice %138 {offsets = [0, 128], sizes = [8, 128], strides = [1, 1]} : vector<8x512xf32> to vector<8x128xf32>
    %146 = arith.negf %145 : vector<8x128xf32>
    %147 = math.exp %146 : vector<8x128xf32>
    %cst_49 = arith.constant 1.000000e+00 : f32
    %148 = vector.broadcast %cst_49 : f32 to vector<8x128xf32>
    %149 = arith.addf %148, %147 : vector<8x128xf32>
    %150 = arith.divf %148, %149 : vector<8x128xf32>
    %151 = vector.extract_strided_slice %138 {offsets = [0, 256], sizes = [8, 128], strides = [1, 1]} : vector<8x512xf32> to vector<8x128xf32>
    %152 = math.tanh %151 : vector<8x128xf32>
    %153 = vector.extract_strided_slice %138 {offsets = [0, 384], sizes = [8, 128], strides = [1, 1]} : vector<8x512xf32> to vector<8x128xf32>
    %154 = arith.negf %153 : vector<8x128xf32>
    %155 = math.exp %154 : vector<8x128xf32>
    %cst_50 = arith.constant 1.000000e+00 : f32
    %156 = vector.broadcast %cst_50 : f32 to vector<8x128xf32>
    %157 = arith.addf %156, %155 : vector<8x128xf32>
    %158 = arith.divf %156, %157 : vector<8x128xf32>
    %159 = arith.mulf %150, %104 : vector<8x128xf32>
    %160 = arith.mulf %144, %152 : vector<8x128xf32>
    %161 = arith.addf %159, %160 : vector<8x128xf32>
    %162 = math.tanh %161 : vector<8x128xf32>
    %163 = arith.mulf %158, %162 : vector<8x128xf32>
    %cst_51 = arith.constant dense<0.000000e+00> : vector<8x512xf32>
    %164 = tpu.matmul %163, %14, %cst_51 {dimension_numbers = #tpu.dot_dimension_numbers<[1], [0], [0], [1], [0, 0, 1, 1], [], []>} : vector<8x128xf32>, vector<128x512xf32>, vector<8x512xf32> -> vector<8x512xf32>
    %165 = arith.addf %164, %135 : vector<8x512xf32>
    %166 = vector.extract_strided_slice %165 {offsets = [0, 0], sizes = [8, 128], strides = [1, 1]} : vector<8x512xf32> to vector<8x128xf32>
    %167 = arith.negf %166 : vector<8x128xf32>
    %168 = math.exp %167 : vector<8x128xf32>
    %cst_52 = arith.constant 1.000000e+00 : f32
    %169 = vector.broadcast %cst_52 : f32 to vector<8x128xf32>
    %170 = arith.addf %169, %168 : vector<8x128xf32>
    %171 = arith.divf %169, %170 : vector<8x128xf32>
    %172 = vector.extract_strided_slice %165 {offsets = [0, 128], sizes = [8, 128], strides = [1, 1]} : vector<8x512xf32> to vector<8x128xf32>
    %173 = arith.negf %172 : vector<8x128xf32>
    %174 = math.exp %173 : vector<8x128xf32>
    %cst_53 = arith.constant 1.000000e+00 : f32
    %175 = vector.broadcast %cst_53 : f32 to vector<8x128xf32>
    %176 = arith.addf %175, %174 : vector<8x128xf32>
    %177 = arith.divf %175, %176 : vector<8x128xf32>
    %178 = vector.extract_strided_slice %165 {offsets = [0, 256], sizes = [8, 128], strides = [1, 1]} : vector<8x512xf32> to vector<8x128xf32>
    %179 = math.tanh %178 : vector<8x128xf32>
    %180 = vector.extract_strided_slice %165 {offsets = [0, 384], sizes = [8, 128], strides = [1, 1]} : vector<8x512xf32> to vector<8x128xf32>
    %181 = arith.negf %180 : vector<8x128xf32>
    %182 = math.exp %181 : vector<8x128xf32>
    %cst_54 = arith.constant 1.000000e+00 : f32
    %183 = vector.broadcast %cst_54 : f32 to vector<8x128xf32>
    %184 = arith.addf %183, %182 : vector<8x128xf32>
    %185 = arith.divf %183, %184 : vector<8x128xf32>
    %186 = arith.mulf %177, %131 : vector<8x128xf32>
    %187 = arith.mulf %171, %179 : vector<8x128xf32>
    %188 = arith.addf %186, %187 : vector<8x128xf32>
    %189 = math.tanh %188 : vector<8x128xf32>
    %190 = arith.mulf %185, %189 : vector<8x128xf32>
    %cst_55 = arith.constant dense<0.000000e+00> : vector<8x512xf32>
    %191 = tpu.matmul %190, %15, %cst_55 {dimension_numbers = #tpu.dot_dimension_numbers<[1], [0], [0], [1], [0, 0, 1, 1], [], []>} : vector<8x128xf32>, vector<128x512xf32>, vector<8x512xf32> -> vector<8x512xf32>
    %192 = arith.addf %191, %12 : vector<8x512xf32>
    %c24 = arith.constant 24 : index
    %c0_56 = arith.constant 0 : index
    %193 = vector.load %arg15[%c24, %c0_56] : memref<32x512xf32, #tpu.memory_space<vmem>>, vector<8x512xf32>
    %cst_57 = arith.constant dense<0.000000e+00> : vector<8x512xf32>
    %194 = tpu.matmul %163, %13, %cst_57 {dimension_numbers = #tpu.dot_dimension_numbers<[1], [0], [0], [1], [0, 0, 1, 1], [], []>} : vector<8x128xf32>, vector<128x512xf32>, vector<8x512xf32> -> vector<8x512xf32>
    %195 = arith.addf %193, %194 : vector<8x512xf32>
    %196 = vector.extract_strided_slice %195 {offsets = [0, 0], sizes = [8, 128], strides = [1, 1]} : vector<8x512xf32> to vector<8x128xf32>
    %197 = arith.negf %196 : vector<8x128xf32>
    %198 = math.exp %197 : vector<8x128xf32>
    %cst_58 = arith.constant 1.000000e+00 : f32
    %199 = vector.broadcast %cst_58 : f32 to vector<8x128xf32>
    %200 = arith.addf %199, %198 : vector<8x128xf32>
    %201 = arith.divf %199, %200 : vector<8x128xf32>
    %202 = vector.extract_strided_slice %195 {offsets = [0, 128], sizes = [8, 128], strides = [1, 1]} : vector<8x512xf32> to vector<8x128xf32>
    %203 = arith.negf %202 : vector<8x128xf32>
    %204 = math.exp %203 : vector<8x128xf32>
    %cst_59 = arith.constant 1.000000e+00 : f32
    %205 = vector.broadcast %cst_59 : f32 to vector<8x128xf32>
    %206 = arith.addf %205, %204 : vector<8x128xf32>
    %207 = arith.divf %205, %206 : vector<8x128xf32>
    %208 = vector.extract_strided_slice %195 {offsets = [0, 256], sizes = [8, 128], strides = [1, 1]} : vector<8x512xf32> to vector<8x128xf32>
    %209 = math.tanh %208 : vector<8x128xf32>
    %210 = vector.extract_strided_slice %195 {offsets = [0, 384], sizes = [8, 128], strides = [1, 1]} : vector<8x512xf32> to vector<8x128xf32>
    %211 = arith.negf %210 : vector<8x128xf32>
    %212 = math.exp %211 : vector<8x128xf32>
    %cst_60 = arith.constant 1.000000e+00 : f32
    %213 = vector.broadcast %cst_60 : f32 to vector<8x128xf32>
    %214 = arith.addf %213, %212 : vector<8x128xf32>
    %215 = arith.divf %213, %214 : vector<8x128xf32>
    %216 = arith.mulf %207, %161 : vector<8x128xf32>
    %217 = arith.mulf %201, %209 : vector<8x128xf32>
    %218 = arith.addf %216, %217 : vector<8x128xf32>
    %219 = math.tanh %218 : vector<8x128xf32>
    %220 = arith.mulf %215, %219 : vector<8x128xf32>
    %cst_61 = arith.constant dense<0.000000e+00> : vector<8x512xf32>
    %221 = tpu.matmul %220, %14, %cst_61 {dimension_numbers = #tpu.dot_dimension_numbers<[1], [0], [0], [1], [0, 0, 1, 1], [], []>} : vector<8x128xf32>, vector<128x512xf32>, vector<8x512xf32> -> vector<8x512xf32>
    %222 = arith.addf %221, %192 : vector<8x512xf32>
    %223 = vector.extract_strided_slice %222 {offsets = [0, 0], sizes = [8, 128], strides = [1, 1]} : vector<8x512xf32> to vector<8x128xf32>
    %224 = arith.negf %223 : vector<8x128xf32>
    %225 = math.exp %224 : vector<8x128xf32>
    %cst_62 = arith.constant 1.000000e+00 : f32
    %226 = vector.broadcast %cst_62 : f32 to vector<8x128xf32>
    %227 = arith.addf %226, %225 : vector<8x128xf32>
    %228 = arith.divf %226, %227 : vector<8x128xf32>
    %229 = vector.extract_strided_slice %222 {offsets = [0, 128], sizes = [8, 128], strides = [1, 1]} : vector<8x512xf32> to vector<8x128xf32>
    %230 = arith.negf %229 : vector<8x128xf32>
    %231 = math.exp %230 : vector<8x128xf32>
    %cst_63 = arith.constant 1.000000e+00 : f32
    %232 = vector.broadcast %cst_63 : f32 to vector<8x128xf32>
    %233 = arith.addf %232, %231 : vector<8x128xf32>
    %234 = arith.divf %232, %233 : vector<8x128xf32>
    %235 = vector.extract_strided_slice %222 {offsets = [0, 256], sizes = [8, 128], strides = [1, 1]} : vector<8x512xf32> to vector<8x128xf32>
    %236 = math.tanh %235 : vector<8x128xf32>
    %237 = vector.extract_strided_slice %222 {offsets = [0, 384], sizes = [8, 128], strides = [1, 1]} : vector<8x512xf32> to vector<8x128xf32>
    %238 = arith.negf %237 : vector<8x128xf32>
    %239 = math.exp %238 : vector<8x128xf32>
    %cst_64 = arith.constant 1.000000e+00 : f32
    %240 = vector.broadcast %cst_64 : f32 to vector<8x128xf32>
    %241 = arith.addf %240, %239 : vector<8x128xf32>
    %242 = arith.divf %240, %241 : vector<8x128xf32>
    %243 = arith.mulf %234, %188 : vector<8x128xf32>
    %244 = arith.mulf %228, %236 : vector<8x128xf32>
    %245 = arith.addf %243, %244 : vector<8x128xf32>
    %246 = math.tanh %245 : vector<8x128xf32>
    %247 = arith.mulf %242, %246 : vector<8x128xf32>
    %c0_65 = arith.constant 0 : index
    %c0_66 = arith.constant 0 : index
    %248 = vector.load %arg11[%c0_65, %c0_66] : memref<8x128xf32, #tpu.memory_space<vmem>>, vector<8x128xf32>
    tpu.vector_store %arg11[%c0_65, %c0_66], %220 {strides = array<i32>} : memref<8x128xf32, #tpu.memory_space<vmem>>, vector<8x128xf32>,
    %c0_67 = arith.constant 0 : index
    %c0_68 = arith.constant 0 : index
    %249 = vector.load %arg12[%c0_67, %c0_68] : memref<8x128xf32, #tpu.memory_space<vmem>>, vector<8x128xf32>
    tpu.vector_store %arg12[%c0_67, %c0_68], %218 {strides = array<i32>} : memref<8x128xf32, #tpu.memory_space<vmem>>, vector<8x128xf32>,
    %c0_69 = arith.constant 0 : index
    %c0_70 = arith.constant 0 : index
    %250 = vector.load %arg13[%c0_69, %c0_70] : memref<8x128xf32, #tpu.memory_space<vmem>>, vector<8x128xf32>
    tpu.vector_store %arg13[%c0_69, %c0_70], %247 {strides = array<i32>} : memref<8x128xf32, #tpu.memory_space<vmem>>, vector<8x128xf32>,
    %c0_71 = arith.constant 0 : index
    %c0_72 = arith.constant 0 : index
    %251 = vector.load %arg14[%c0_71, %c0_72] : memref<8x128xf32, #tpu.memory_space<vmem>>, vector<8x128xf32>
    tpu.vector_store %arg14[%c0_71, %c0_72], %245 {strides = array<i32>} : memref<8x128xf32, #tpu.memory_space<vmem>>, vector<8x128xf32>,
    %c1_i32 = arith.constant 1 : i32
    %252 = arith.cmpi eq, %arg0, %c1_i32 : i32
    %253 = arith.extui %252 : i1 to i32
    %c0_i32_73 = arith.constant 0 : i32
    %254 = arith.cmpi ne, %253, %c0_i32_73 : i32
    scf.if %254 {
      %c0_74 = arith.constant 0 : index
      %c0_75 = arith.constant 0 : index
      %255 = vector.load %arg8[%c0_74, %c0_75] : memref<128x128xf32, #tpu.memory_space<vmem>>, vector<128x128xf32>
      %cst_76 = arith.constant dense<0.000000e+00> : vector<8x128xf32>
      %256 = tpu.matmul %247, %255, %cst_76 {dimension_numbers = #tpu.dot_dimension_numbers<[1], [0], [0], [1], [0, 0, 1, 1], [], []>} : vector<8x128xf32>, vector<128x128xf32>, vector<8x128xf32> -> vector<8x128xf32>
      %c0_77 = arith.constant 0 : index
      %c0_78 = arith.constant 0 : index
      %257 = vector.load %arg9[%c0_77, %c0_78] : memref<1x128xf32, #tpu.memory_space<vmem>>, vector<1x128xf32>
      %258 = vector.broadcast %257 : vector<1x128xf32> to vector<8x128xf32>
      %259 = arith.addf %256, %258 : vector<8x128xf32>
      %c0_79 = arith.constant 0 : index
      %c0_80 = arith.constant 0 : index
      %260 = vector.load %arg10[%c0_79, %c0_80] : memref<8x128xf32, #tpu.memory_space<vmem>>, vector<8x128xf32>
      tpu.vector_store %arg10[%c0_79, %c0_80], %259 {strides = array<i32>} : memref<8x128xf32, #tpu.memory_space<vmem>>, vector<8x128xf32>,
    } else {
    }
    return
  }
  func.func @transform_0(%arg0: i32) -> (i32, i32) {
    %c0_i32 = arith.constant 0 : i32
    %c0_i32_0 = arith.constant 0 : i32
    return %arg0, %c0_i32 : i32, i32
  }
  func.func @transform_1(%arg0: i32) -> (i32, i32) {
    %c0_i32 = arith.constant 0 : i32
    %c0_i32_0 = arith.constant 0 : i32
    %c0_i32_1 = arith.constant 0 : i32
    return %c0_i32, %c0_i32_0 : i32, i32
  }
  func.func @transform_2(%arg0: i32) -> (i32, i32) {
    %c0_i32 = arith.constant 0 : i32
    %c0_i32_0 = arith.constant 0 : i32
    %c0_i32_1 = arith.constant 0 : i32
    return %c0_i32, %c0_i32_0 : i32, i32
  }
  func.func @transform_3(%arg0: i32) -> (i32, i32) {
    %c0_i32 = arith.constant 0 : i32
    %c0_i32_0 = arith.constant 0 : i32
    %c0_i32_1 = arith.constant 0 : i32
    return %c0_i32, %c0_i32_0 : i32, i32
  }
  func.func @transform_4(%arg0: i32) -> (i32, i32) {
    %c0_i32 = arith.constant 0 : i32
    %c0_i32_0 = arith.constant 0 : i32
    %c0_i32_1 = arith.constant 0 : i32
    return %c0_i32, %c0_i32_0 : i32, i32
  }
  func.func @transform_5(%arg0: i32) -> (i32, i32) {
    %c0_i32 = arith.constant 0 : i32
    %c0_i32_0 = arith.constant 0 : i32
    %c0_i32_1 = arith.constant 0 : i32
    return %c0_i32, %c0_i32_0 : i32, i32
  }
  func.func @transform_6(%arg0: i32) -> (i32, i32) {
    %c0_i32 = arith.constant 0 : i32
    %c0_i32_0 = arith.constant 0 : i32
    %c0_i32_1 = arith.constant 0 : i32
    return %c0_i32, %c0_i32_0 : i32, i32
  }
  func.func @transform_7(%arg0: i32) -> (i32, i32) {
    %c0_i32 = arith.constant 0 : i32
    %c0_i32_0 = arith.constant 0 : i32
    %c0_i32_1 = arith.constant 0 : i32
    return %c0_i32, %c0_i32_0 : i32, i32
  }
  func.func @transform_8(%arg0: i32) -> (i32, i32) {
    %c0_i32 = arith.constant 0 : i32
    %c0_i32_0 = arith.constant 0 : i32
    %c0_i32_1 = arith.constant 0 : i32
    return %c0_i32, %c0_i32_0 : i32, i32
  }
  func.func @transform_9(%arg0: i32) -> (i32, i32) {
    %c0_i32 = arith.constant 0 : i32
    %c0_i32_0 = arith.constant 0 : i32
    %c0_i32_1 = arith.constant 0 : i32
    return %c0_i32, %c0_i32_0 : i32, i32
  }
}

</mosaic_0001>

<bundles_post_ra>
// kernel: tpu_custom_call.1
= control target key start
LH: loop header
LB: loop body
LE: loop exit
PB: predicated region body
PF: predicated region fallthrough
CT: control target
= control target key end

     0   :  { %14 = vsyncpa [#allocation8], 0  ;;  %s4968_s0 = inlined_call_operand.vmem [shape: f32[64,16], index: 0, kind: input, shape index: {}]   ;;  %s4969_s1 = inlined_call_operand.vmem [shape: f32[16,512], index: 1, kind: input, shape index: {}]   ;;  %s4970_s2 = inlined_call_operand.hbm [shape: f32[128,512], index: 2, kind: input, shape index: {}]   ;;  %s4971_s3 = inlined_call_operand.vmem [shape: f32[1,512], index: 3, kind: input, shape index: {}]   ;;  %s4972_s4 = inlined_call_operand.hbm [shape: f32[128,512], index: 4, kind: input, shape index: {}]   ;;  %s4973_s5 = inlined_call_operand.hbm [shape: f32[128,512], index: 5, kind: input, shape index: {}]   ;;  %s4974_s6 = inlined_call_operand.vmem [shape: f32[1,512], index: 6, kind: input, shape index: {}]   ;;  %s4975_s7 = inlined_call_operand.hbm [shape: f32[128,128], index: 7, kind: input, shape index: {}]   ;;  %s4976_s8 = inlined_call_operand.vmem [shape: f32[1,128], index: 8, kind: input, shape index: {}]   ;;  %s4977_s9 = inlined_call_operand.hbm [shape: f32[8,128], index: 9, kind: output, shape index: {}]  }
   0x1   :  { %15 = vsyncpa [#allocation11], 0 }
   0x2   :  { %16 = vsyncpa [#allocation14], 0 }
   0x3   :  { %17 = vsyncpa [#allocation9], 0  ;;  %s3077_s30 = smov 0  }
   0x4 LB: > { %s3083_s10 = sadd.s32 4294967295, %s3015_s30   ;;  %p2404_p0 = scmp.ge.s32.totalorder %s3015_s30, 1  ;;  %s3015_s30 = sphi %s3077_s30, %s23_s30  }
   0x5   : > { %p243_p1 = scmp.lt.s32.totalorder %s3015_s30, 3  ;;  %p2405_p2 = scmp.ne.s32.totalorder %s3083_s10, 0 }
   0x6   : > { %p2496_p3 = scmp.eq.s32.totalorder %s3083_s10, 0  ;;  %s274_s13 = sshll.u32 %s4972_s4, 4  ;;  %s275_s13 = int_to_ptr.hbm [resolvable:$true] %s274_s13 }
   0x7   : > { %p3092_p4 = pnand %p2404_p0, %p243_p1  ;;  %s257_s17 = sshll.u32 %s4970_s2, 4  ;;  %s258_s17 = int_to_ptr.hbm [resolvable:$true] %s257_s17 }
   0x8   : > { %s3017_s18 = smov [#allocation10]   ;;  %s3018_s21 = smov [#allocation7]  }
   0x9   : > { %p2483_p5 = pneg %p3092_p4  ;;  %s276_s19 = sshll.u32 %s3017_s18, 4  ;;  %s277_s19 = int_to_ptr.vmem [resolvable:$true] %s276_s19 }
   0xa   : > { %s259_s22 = sshll.u32 %s3018_s21, 4  ;;  %s288_s25 = sshll.u32 %s4973_s5, 4  ;;  %s260_s22 = int_to_ptr.vmem [resolvable:$true] %s259_s22  ;;  %s289_s25 = int_to_ptr.hbm [resolvable:$true] %s288_s25 }
   0xb   : > { %p3103_p6 = pnand %p2496_p3, %p2483_p5  ;;  %s3019_s26 = smov 512  }
   0xc   : > { %s3020_s27 = smov 32   ;;  %s3021_s28 = smov [#allocation12]  }
   0xd   : > { %2489 = dma.hbm_to_vmem [thread:$0]  (!%p3103_p6), %s275_s13, 8192, %s277_s19, [#allocation11], %s3019_s26, %s3019_s26, %s3020_s27  }
   0xe   : > { %2486 = dma.hbm_to_vmem [thread:$0]  (!%p3103_p6), %s258_s17, 8192, %s260_s22, [#allocation8], %s3019_s26, %s3019_s26, %s3020_s27  }
   0xf   : > { %s290_s29 = sshll.u32 %s3021_s28, 4  ;;  %s305_s15 = sshll.u32 %s4975_s7, 4  ;;  %s291_s29 = int_to_ptr.vmem [resolvable:$true] %s290_s29  ;;  %s306_s15 = int_to_ptr.hbm [resolvable:$true] %s305_s15 }
  0x10   : > { %2492 = dma.hbm_to_vmem [thread:$0]  (!%p3103_p6), %s289_s25, 8192, %s291_s29, [#allocation11], %s3019_s26, %s3019_s26, %s3020_s27  }
  0x11   : > { %s3022_s16 = smov [#allocation13]   ;;  %s3023_s21 = smov 128  }
  0x12   : > { %s307_s18 = sshll.u32 %s3022_s16, 4  ;;  %s3024_s23 = smov 8   ;;  %s308_s18 = int_to_ptr.vmem [resolvable:$true] %s307_s18 }
  0x13   : > { %2495 = dma.hbm_to_vmem [thread:$0]  (!%p3103_p6), %s306_s15, 2048, %s308_s18, [#allocation14], %s3023_s21, %s3023_s21, %s3024_s23  }
  0x14   : > { %335 = sbr.rel (%p3092_p4) target bundleno = 1692 (0x69c), region = 56 }
  0x19   : > { %2998 = dma.done.wait (%p2496_p3), [#allocation8], 8192  }
  0x1a   : > { %3000 = vsyncadd (%p2496_p3), [#allocation8], 4294959104 }
  0x1b   : > { %3002 = dma.done.wait (%p2496_p3), [#allocation11], 16384  }
  0x1c   : > { %3004 = vsyncadd (%p2496_p3), [#allocation11], 4294950912 }
  0x1d   : > { %3006 = dma.done.wait (%p2496_p3), [#allocation14], 2048  }
  0x1e   : > { %3008 = vsyncadd (%p2496_p3), [#allocation14], 4294965248  ;;  %s2415_s13 = sshll.u32 %s3083_s10, 2 }
  0x1f   : > { %p383_p7 = scmp.lt.s32.totalorder %s2415_s13, 7  ;;  %391 = sbr.rel (%p2405_p2) target bundleno = 41 (0x29), region = 76 }
  0x21   : > { %s5826_s13 = smov (!%p383_p7, %s2415_s13), 7 }
  0x22   : > { %s2416_s14 = sshll.u32 %s5826_s13, 3 }
  0x23   : > { %s3139_s20 = scalar_lea.vmem %s4968_s0, %s2416_s14 }
  0x24   : > { %v3025_v0 = vmov 0.0  }
  0x25   : > { %392 = vst [vmem:[#allocation2] sm:$0xff] %v3025_v0 }
  0x26   : > { %393 = vst [vmem:[#allocation3] sm:$0xff] %v3025_v0 }
  0x27   : > { %394 = vst [vmem:[#allocation4] sm:$0xff] %v3025_v0 }
  0x28   : > { %395 = vst [vmem:[#allocation5] sm:$0xff] %v3025_v0 }
  0x29 PF: > { %v404_v1 = vld [vmem:[%s4969_s1 + $0x20] sm:$0xff]  ;;  %v405_v2 = vld [vmem:[%s4969_s1 + $0x28] sm:$0xff]  ;;  %v406_v3 = vld [vmem:[%s4969_s1 + $0x30] sm:$0xff]  ;;  %vm418_vm0 = vcmask 130048   ;;  %p2458_p8 = scmp.ne.s32.totalorder %s3083_s10, 1 }
  0x2a   : > { %445 = vmatpush.msra.mxu0 %v404_v1  ;;  %474 = vmatpush.msra.mxu1 %v405_v2  ;;  %v407_v4 = vld [vmem:[%s4969_s1 + $0x38] sm:$0xff]  ;;  %v400_v5 = vld [vmem:[%s4969_s1] sm:$0xff]  ;;  %v401_v6 = vld [vmem:[%s4969_s1 + $0x8] sm:$0xff] }
  0x2b   : > { %503 = vmatpush.msra.mxu2 %v406_v3  ;;  %532 = vmatpush.msra.mxu3 %v407_v4  ;;  %v402_v7 = vld [vmem:[%s4969_s1 + $0x10] sm:$0xff]  ;;  %v403_v8 = vld [vmem:[%s4969_s1 + $0x18] sm:$0xff]  ;;  %v3167_v9 = vld [vmem:[#allocation12 + $0x1e0] sm:$0xff] }
  0x2c   : > { %446 = vmatpush.msra.mxu0 %v400_v5  ;;  %475 = vmatpush.msra.mxu1 %v401_v6  ;;  %v3169_v10 = vld [vmem:[#allocation12 + $0x1e8] sm:$0xff]  ;;  %v3171_v11 = vld [vmem:[#allocation12 + $0x1f0] sm:$0xff]  ;;  %v3173_v12 = vld [vmem:[#allocation12 + $0x1f8] sm:$0xff] }
  0x2d   : > { %504 = vmatpush.msra.mxu2 %v402_v7  ;;  %533 = vmatpush.msra.mxu3 %v403_v8  ;;  %v3175_v13 = vld [vmem:[#allocation12 + $0x1c0] sm:$0xff]  ;;  %v3177_v14 = vld [vmem:[#allocation12 + $0x1c8] sm:$0xff]  ;;  %v3181_v15 = vld [vmem:[#allocation12 + $0x1d0] sm:$0xff] }
  0x2e   : > { %769 = vmatpush.msrb.mxu0 %v3167_v9  ;;  %789 = vmatpush.msrb.mxu1 %v3169_v10  ;;  %v3183_v16 = vld [vmem:[#allocation12 + $0x1d8] sm:$0xff]  ;;  %v3187_v17 = vld [vmem:[#allocation12 + $0x1a0] sm:$0xff]  ;;  %v3189_v18 = vld [vmem:[#allocation12 + $0x1a8] sm:$0xff] }
  0x2f   : > { %809 = vmatpush.msrb.mxu2 %v3171_v11  ;;  %829 = vmatpush.msrb.mxu3 %v3173_v12  ;;  %v3193_v19 = vld [vmem:[#allocation12 + $0x1b0] sm:$0xff]  ;;  %v3195_v20 = vld [vmem:[#allocation12 + $0x1b8] sm:$0xff]  ;;  %v3199_v21 = vld [vmem:[#allocation12 + $0x180] sm:$0xff] }
  0x30   : > { %770 = vmatpush.msrb.mxu0 %v3175_v13  ;;  %790 = vmatpush.msrb.mxu1 %v3177_v14  ;;  %v3201_v22 = vld [vmem:[#allocation12 + $0x188] sm:$0xff]  ;;  %v3205_v23 = vld [vmem:[#allocation12 + $0x190] sm:$0xff]  ;;  %v3207_v24 = vld [vmem:[#allocation12 + $0x198] sm:$0xff] }
  0x31   : > { %810 = vmatpush.msrb.mxu2 %v3181_v15  ;;  %830 = vmatpush.msrb.mxu3 %v3183_v16  ;;  %v3211_v25 = vld [vmem:[#allocation12 + $0x160] sm:$0xff]  ;;  %v3213_v26 = vld [vmem:[#allocation12 + $0x168] sm:$0xff]  ;;  %v3217_v27 = vld [vmem:[#allocation12 + $0x170] sm:$0xff] }
  0x32   : > { %771 = vmatpush.msrb.mxu0 %v3187_v17  ;;  %791 = vmatpush.msrb.mxu1 %v3189_v18  ;;  %v3219_v28 = vld [vmem:[#allocation12 + $0x178] sm:$0xff]  ;;  %v3223_v29 = vld [vmem:[#allocation12 + $0x140] sm:$0xff]  ;;  %v3225_v30 = vld [vmem:[#allocation12 + $0x148] sm:$0xff] }
  0x33   : > { %811 = vmatpush.msrb.mxu2 %v3193_v19  ;;  %831 = vmatpush.msrb.mxu3 %v3195_v20  ;;  %v3229_v31 = vld [vmem:[#allocation12 + $0x150] sm:$0xff]  ;;  %v3231_v32 = vld [vmem:[#allocation12 + $0x158] sm:$0xff]  ;;  %v3235_v33 = vld [vmem:[#allocation12 + $0x120] sm:$0xff] }
  0x34   : > { %772 = vmatpush.msrb.mxu0 %v3199_v21  ;;  %792 = vmatpush.msrb.mxu1 %v3201_v22  ;;  %v3237_v34 = vld [vmem:[#allocation12 + $0x128] sm:$0xff]  ;;  %v3241_v35 = vld [vmem:[#allocation12 + $0x130] sm:$0xff]  ;;  %v3243_v36 = vld [vmem:[#allocation12 + $0x138] sm:$0xff] }
  0x35   : > { %812 = vmatpush.msrb.mxu2 %v3205_v23  ;;  %832 = vmatpush.msrb.mxu3 %v3207_v24  ;;  %v3247_v37 = vld [vmem:[#allocation12 + $0x100] sm:$0xff]  ;;  %v3249_v38 = vld [vmem:[#allocation12 + $0x108] sm:$0xff]  ;;  %v3253_v39 = vld [vmem:[#allocation12 + $0x110] sm:$0xff] }
  0x36   : > { %773 = vmatpush.msrb.mxu0 %v3211_v25  ;;  %793 = vmatpush.msrb.mxu1 %v3213_v26  ;;  %v3255_v40 = vld [vmem:[#allocation12 + $0x118] sm:$0xff]  ;;  %v3259_v41 = vld [vmem:[#allocation12 + $0xe0] sm:$0xff]  ;;  %v3261_v42 = vld [vmem:[#allocation12 + $0xe8] sm:$0xff] }
  0x37   : > { %813 = vmatpush.msrb.mxu2 %v3217_v27  ;;  %833 = vmatpush.msrb.mxu3 %v3219_v28  ;;  %v3265_v43 = vld [vmem:[#allocation12 + $0xf0] sm:$0xff]  ;;  %v3267_v44 = vld [vmem:[#allocation12 + $0xf8] sm:$0xff]  ;;  %v3271_v45 = vld [vmem:[#allocation12 + $0xc0] sm:$0xff] }
  0x38   : > { %774 = vmatpush.msrb.mxu0 %v3223_v29  ;;  %794 = vmatpush.msrb.mxu1 %v3225_v30  ;;  %v3273_v46 = vld [vmem:[#allocation12 + $0xc8] sm:$0xff]  ;;  %v3277_v47 = vld [vmem:[#allocation12 + $0xd0] sm:$0xff]  ;;  %v3279_v48 = vld [vmem:[#allocation12 + $0xd8] sm:$0xff] }
  0x39   : > { %814 = vmatpush.msrb.mxu2 %v3229_v31  ;;  %834 = vmatpush.msrb.mxu3 %v3231_v32  ;;  %v3283_v49 = vld [vmem:[#allocation12 + $0xa0] sm:$0xff]  ;;  %v3285_v50 = vld [vmem:[#allocation12 + $0xa8] sm:$0xff]  ;;  %v3289_v51 = vld [vmem:[#allocation12 + $0xb0] sm:$0xff] }
  0x3a   : > { %775 = vmatpush.msrb.mxu0 %v3235_v33  ;;  %795 = vmatpush.msrb.mxu1 %v3237_v34  ;;  %v3291_v52 = vld [vmem:[#allocation12 + $0xb8] sm:$0xff]  ;;  %v396_v53 = vld [vmem:[%s3139_s20] sm:$0xff]  ;;  %v3302_v55 = vld [vmem:[#allocation12 + $0x88] sm:$0xff] }
  0x3b   : > { %815 = vmatpush.msrb.mxu2 %v3241_v35  ;;  %835 = vmatpush.msrb.mxu3 %v3243_v36  ;;  %v3300_v54 = vld [vmem:[#allocation12 + $0x80] sm:$0xff]  ;;  %5256 = vst [vmem:[#allocation21_spill] sm:$0xff] %v3302_v55  ;;  %v3306_v56 = vld [vmem:[#allocation12 + $0x90] sm:$0xff]  ;;  %v3308_v57 = vld [vmem:[#allocation12 + $0x98] sm:$0xff] }
  0x3c   : > { %776 = vmatpush.msrb.mxu0 %v3247_v37  ;;  %796 = vmatpush.msrb.mxu1 %v3249_v38  ;;  %5255 = vst [vmem:[#allocation20_spill] sm:$0xff] %v3300_v54  ;;  %v3312_v58 = vld [vmem:[#allocation12 + $0x60] sm:$0xff]  ;;  %v3314_v59 = vld [vmem:[#allocation12 + $0x68] sm:$0xff]  ;;  %v3318_v60 = vld [vmem:[#allocation12 + $0x70] sm:$0xff] }
  0x3d   : > { %816 = vmatpush.msrb.mxu2 %v3253_v39  ;;  %836 = vmatpush.msrb.mxu3 %v3255_v40  ;;  %5257 = vst [vmem:[#allocation22_spill] sm:$0xff] %v3306_v56  ;;  %v3320_v61 = vld [vmem:[#allocation12 + $0x78] sm:$0xff]  ;;  %v3324_v62 = vld [vmem:[#allocation12 + $0x40] sm:$0xff]  ;;  %v3326_v63 = vld [vmem:[#allocation12 + $0x48] sm:$0xff] }
  0x3e   : > { %777 = vmatpush.msrb.mxu0 %v3259_v41  ;;  %797 = vmatpush.msrb.mxu1 %v3261_v42  ;;  %5258 = vst [vmem:[#allocation23_spill] sm:$0xff] %v3308_v57  ;;  %v3330_v0 = vld [vmem:[#allocation12 + $0x50] sm:$0xff]  ;;  %v3332_v1 = vld [vmem:[#allocation12 + $0x58] sm:$0xff]  ;;  %v3336_v2 = vld [vmem:[#allocation12 + $0x20] sm:$0xff] }
  0x3f   : > { %817 = vmatpush.msrb.mxu2 %v3265_v43  ;;  %837 = vmatpush.msrb.mxu3 %v3267_v44  ;;  %5259 = vst [vmem:[#allocation24_spill] sm:$0xff] %v3312_v58  ;;  %v3338_v3 = vld [vmem:[#allocation12 + $0x28] sm:$0xff]  ;;  %v3342_v4 = vld [vmem:[#allocation12 + $0x30] sm:$0xff]  ;;  %v3344_v5 = vld [vmem:[#allocation12 + $0x38] sm:$0xff] }
  0x40   : > { %778 = vmatpush.msrb.mxu0 %v3271_v45  ;;  %798 = vmatpush.msrb.mxu1 %v3273_v46  ;;  %5260 = vst [vmem:[#allocation25_spill] sm:$0xff] %v3314_v59  ;;  %v397_v6 = vld [vmem:[%s3139_s20 + $0x8] sm:$0xff]  ;;  %v3353_v7 = vld [vmem:[#allocation12] sm:$0xff] }
  0x41   : > { %818 = vmatpush.msrb.mxu2 %v3277_v47  ;;  %838 = vmatpush.msrb.mxu3 %v3279_v48  ;;  %5261 = vst [vmem:[#allocation26_spill] sm:$0xff] %v3318_v60  ;;  %v3355_v8 = vld [vmem:[#allocation12 + $0x8] sm:$0xff] }
  0x42   : > { %779 = vmatpush.msrb.mxu0 %v3283_v49  ;;  %799 = vmatpush.msrb.mxu1 %v3285_v50  ;;  %5262 = vst [vmem:[#allocation27_spill] sm:$0xff] %v3320_v61 }
  0x43   : > { %819 = vmatpush.msrb.mxu2 %v3289_v51  ;;  %839 = vmatpush.msrb.mxu3 %v3291_v52  ;;  %5263 = vst [vmem:[#allocation28_spill] sm:$0xff] %v3324_v62 }
  0x44   : > { %2418 = vmatmul.msk.f32.vlgmr.msra.gmra.mxu0 %vm418_vm0, %v396_v53  ;;  %2422 = vmatmul.msk.f32.vlgmr.msra.gmra.mxu1 %vm418_vm0, %v396_v53  ;;  %5264 = vst [vmem:[#allocation29_spill] sm:$0xff] %v3326_v63 }
  0x45   : > { %2426 = vmatmul.msk.f32.vlgmr.msra.gmra.mxu2 %vm418_vm0, %v396_v53  ;;  %2430 = vmatmul.msk.f32.vlgmr.msra.gmra.mxu3 %vm418_vm0, %v396_v53  ;;  %5265 = vst [vmem:[#allocation30_spill] sm:$0xff] %v3330_v0  ;;  %v3359_v53 = vld [vmem:[#allocation12 + $0x10] sm:$0xff] }
  0x46   : > { %780 = vmatpush.msrb.mxu0 %v3300_v54  ;;  %800 = vmatpush.msrb.mxu1 %v3302_v55  ;;  %5266 = vst [vmem:[#allocation31_spill] sm:$0xff] %v3332_v1 }
  0x47   : > { %820 = vmatpush.msrb.mxu2 %v3306_v56  ;;  %840 = vmatpush.msrb.mxu3 %v3308_v57  ;;  %5267 = vst [vmem:[#allocation32_spill] sm:$0xff] %v3336_v2 }
  0x48   : > { %781 = vmatpush.msrb.mxu0 %v3312_v58  ;;  %801 = vmatpush.msrb.mxu1 %v3314_v59  ;;  %5268 = vst [vmem:[#allocation33_spill] sm:$0xff] %v3338_v3 }
  0x49   : > { %821 = vmatpush.msrb.mxu2 %v3318_v60  ;;  %841 = vmatpush.msrb.mxu3 %v3320_v61  ;;  %5269 = vst [vmem:[#allocation34_spill] sm:$0xff] %v3342_v4 }
  0x4a   : > { %782 = vmatpush.msrb.mxu0 %v3324_v62  ;;  %802 = vmatpush.msrb.mxu1 %v3326_v63  ;;  %5270 = vst [vmem:[#allocation35_spill] sm:$0xff] %v3344_v5  ;;  %v3379_v63 = vld [vmem:[#allocation7 + $0x1c8] sm:$0xff] }
  0x4b   : > { %822 = vmatpush.msrb.mxu2 %v3330_v0  ;;  %842 = vmatpush.msrb.mxu3 %v3332_v1  ;;  %5271 = vst [vmem:[#allocation36_spill] sm:$0xff] %v3353_v7  ;;  %v3361_v1 = vld [vmem:[#allocation12 + $0x18] sm:$0xff]  ;;  %v3377_v0 = vld [vmem:[#allocation7 + $0x1c0] sm:$0xff] }
  0x4c   : > { %783 = vmatpush.msrb.mxu0 %v3336_v2  ;;  %803 = vmatpush.msrb.mxu1 %v3338_v3  ;;  %5272 = vst [vmem:[#allocation37_spill] sm:$0xff] %v3355_v8  ;;  %v3365_v3 = vld [vmem:[#allocation7 + $0x1e0] sm:$0xff]  ;;  %v3373_v2 = vld [vmem:[#allocation7 + $0x1f8] sm:$0xff] }
  0x4d   : > { %823 = vmatpush.msrb.mxu2 %v3342_v4  ;;  %843 = vmatpush.msrb.mxu3 %v3344_v5  ;;  %5273 = vst [vmem:[#allocation38_spill] sm:$0xff] %v3359_v53  ;;  %v3367_v4 = vld [vmem:[#allocation7 + $0x1e8] sm:$0xff]  ;;  %v3371_v5 = vld [vmem:[#allocation7 + $0x1f0] sm:$0xff] }
  0x4e   : > { %2419 = vmatmul.msk.f32.gmra.mxu0 %vm418_vm0, %v397_v6  ;;  %2423 = vmatmul.msk.f32.gmra.mxu1 %vm418_vm0, %v397_v6  ;;  %5274 = vst [vmem:[#allocation39_spill] sm:$0xff] %v3361_v1 }
  0x4f   : > { %2427 = vmatmul.msk.f32.gmra.mxu2 %vm418_vm0, %v397_v6  ;;  %2431 = vmatmul.msk.f32.gmra.mxu3 %vm418_vm0, %v397_v6  ;;  %5275 = vst [vmem:[#allocation40_spill] sm:$0xff] %v3365_v3  ;;  %v3383_v6 = vld [vmem:[#allocation7 + $0x1d0] sm:$0xff] }
  0x50   : > { %5276 = vst [vmem:[#allocation41_spill] sm:$0xff] %v3367_v4  ;;  %784 = vmatpush.msrb.mxu0 %v3353_v7  ;;  %804 = vmatpush.msrb.mxu1 %v3355_v8  ;;  %v3385_v7 = vld [vmem:[#allocation7 + $0x1d8] sm:$0xff]  ;;  %v3389_v8 = vld [vmem:[#allocation7 + $0x1a0] sm:$0xff] }
  0x51   : > { %5277 = vst [vmem:[#allocation42_spill] sm:$0xff] %v3371_v5  ;;  %824 = vmatpush.msrb.mxu2 %v3359_v53  ;;  %844 = vmatpush.msrb.mxu3 %v3361_v1  ;;  %v3391_v1 = vld [vmem:[#allocation7 + $0x1a8] sm:$0xff]  ;;  %v3407_v53 = vld [vmem:[#allocation7 + $0x190] sm:$0xff] }
  0x52   : > { %5278 = vst [vmem:[#allocation43_spill] sm:$0xff] %v3373_v2  ;;  %853 = vmatpush.msra.mxu0 %v3365_v3  ;;  %873 = vmatpush.msra.mxu1 %v3367_v4  ;;  %v3395_v3 = vld [vmem:[#allocation7 + $0x1b0] sm:$0xff]  ;;  %v3397_v4 = vld [vmem:[#allocation7 + $0x1b8] sm:$0xff] }
  0x53   : > { %5279 = vst [vmem:[#allocation44_spill] sm:$0xff] %v3377_v0  ;;  %893 = vmatpush.msra.mxu2 %v3371_v5  ;;  %913 = vmatpush.msra.mxu3 %v3373_v2  ;;  %v3401_v5 = vld [vmem:[#allocation7 + $0x180] sm:$0xff]  ;;  %v3403_v2 = vld [vmem:[#allocation7 + $0x188] sm:$0xff] }
  0x54   : > { %5280 = vst [vmem:[#allocation45_spill] sm:$0xff] %v3379_v63  ;;  %854 = vmatpush.msra.mxu0 %v3377_v0  ;;  %874 = vmatpush.msra.mxu1 %v3379_v63  ;;  %v3409_v0 = vld [vmem:[#allocation7 + $0x198] sm:$0xff]  ;;  %v398_v63 = vld [vmem:[%s3139_s20 + $0x10] sm:$0xff] }
  0x55   : > { %5281 = vst [vmem:[#allocation46_spill] sm:$0xff] %v3383_v6  ;;  %894 = vmatpush.msra.mxu2 %v3383_v6  ;;  %914 = vmatpush.msra.mxu3 %v3385_v7  ;;  %v3460_v6 = vld [vmem:[#allocation7 + $0x110] sm:$0xff] }
  0x56   : > { %5282 = vst [vmem:[#allocation47_spill] sm:$0xff] %v3385_v7  ;;  %855 = vmatpush.msra.mxu0 %v3389_v8  ;;  %875 = vmatpush.msra.mxu1 %v3391_v1  ;;  %v3442_v7 = vld [vmem:[#allocation7 + $0x120] sm:$0xff] }
  0x57   : > { %5283 = vst [vmem:[#allocation48_spill] sm:$0xff] %v3389_v8  ;;  %895 = vmatpush.msra.mxu2 %v3395_v3  ;;  %915 = vmatpush.msra.mxu3 %v3397_v4  ;;  %v3418_v8 = vld [vmem:[#allocation7 + $0x160] sm:$0xff] }
  0x58   : > { %5284 = vst [vmem:[#allocation49_spill] sm:$0xff] %v3391_v1  ;;  %856 = vmatpush.msra.mxu0 %v3401_v5  ;;  %876 = vmatpush.msra.mxu1 %v3403_v2  ;;  %v3420_v1 = vld [vmem:[#allocation7 + $0x168] sm:$0xff] }
  0x59   : > { %5285 = vst [vmem:[#allocation50_spill] sm:$0xff] %v3395_v3  ;;  %896 = vmatpush.msra.mxu2 %v3407_v53  ;;  %916 = vmatpush.msra.mxu3 %v3409_v0  ;;  %v3424_v3 = vld [vmem:[#allocation7 + $0x170] sm:$0xff] }
  0x5a   : > { %5286 = vst [vmem:[#allocation51_spill] sm:$0xff] %v3397_v4  ;;  %2420 = vmatmul.msk.f32.gmra.mxu0 %vm418_vm0, %v398_v63  ;;  %2424 = vmatmul.msk.f32.gmra.mxu1 %vm418_vm0, %v398_v63  ;;  %v3426_v4 = vld [vmem:[#allocation7 + $0x178] sm:$0xff] }
  0x5b   : > { %5287 = vst [vmem:[#allocation52_spill] sm:$0xff] %v3401_v5  ;;  %2428 = vmatmul.msk.f32.gmra.mxu2 %vm418_vm0, %v398_v63  ;;  %2432 = vmatmul.msk.f32.gmra.mxu3 %vm418_vm0, %v398_v63  ;;  %v3438_v5 = vld [vmem:[#allocation7 + $0x158] sm:$0xff]  ;;  %v3444_v63 = vld [vmem:[#allocation7 + $0x128] sm:$0xff] }
  0x5c   : > { %5288 = vst [vmem:[#allocation53_spill] sm:$0xff] %v3403_v2  ;;  %v3430_v2 = vld [vmem:[#allocation7 + $0x140] sm:$0xff]  ;;  %857 = vmatpush.msra.mxu0 %v3418_v8  ;;  %877 = vmatpush.msra.mxu1 %v3420_v1 }
  0x5d   : > { %5289 = vst [vmem:[#allocation54_spill] sm:$0xff] %v3407_v53  ;;  %v3432_v53 = vld [vmem:[#allocation7 + $0x148] sm:$0xff]  ;;  %897 = vmatpush.msra.mxu2 %v3424_v3  ;;  %917 = vmatpush.msra.mxu3 %v3426_v4 }
  0x5e   : > { %5290 = vst [vmem:[#allocation55_spill] sm:$0xff] %v3409_v0  ;;  %v3436_v0 = vld [vmem:[#allocation7 + $0x150] sm:$0xff]  ;;  %858 = vmatpush.msra.mxu0 %v3430_v2  ;;  %878 = vmatpush.msra.mxu1 %v3432_v53 }
  0x5f   : > { %5291 = vst [vmem:[#allocation56_spill] sm:$0xff] %v3418_v8  ;;  %v3448_v8 = vld [vmem:[#allocation7 + $0x130] sm:$0xff]  ;;  %898 = vmatpush.msra.mxu2 %v3436_v0  ;;  %918 = vmatpush.msra.mxu3 %v3438_v5 }
  0x60   : > { %5292 = vst [vmem:[#allocation57_spill] sm:$0xff] %v3420_v1  ;;  %v3450_v1 = vld [vmem:[#allocation7 + $0x138] sm:$0xff]  ;;  %859 = vmatpush.msra.mxu0 %v3442_v7  ;;  %879 = vmatpush.msra.mxu1 %v3444_v63 }
  0x61   : > { %5293 = vst [vmem:[#allocation58_spill] sm:$0xff] %v3424_v3  ;;  %v3454_v3 = vld [vmem:[#allocation7 + $0x100] sm:$0xff]  ;;  %899 = vmatpush.msra.mxu2 %v3448_v8  ;;  %919 = vmatpush.msra.mxu3 %v3450_v1 }
  0x62   : > { %5294 = vst [vmem:[#allocation59_spill] sm:$0xff] %v3426_v4  ;;  %v3456_v4 = vld [vmem:[#allocation7 + $0x108] sm:$0xff]  ;;  %860 = vmatpush.msra.mxu0 %v3454_v3 }
  0x63   : > { %5295 = vst [vmem:[#allocation60_spill] sm:$0xff] %v3430_v2  ;;  %v3462_v2 = vld [vmem:[#allocation7 + $0x118] sm:$0xff]  ;;  %880 = vmatpush.msra.mxu1 %v3456_v4  ;;  %900 = vmatpush.msra.mxu2 %v3460_v6 }
  0x64   : > { %5296 = vst [vmem:[#allocation61_spill] sm:$0xff] %v3432_v53  ;;  %v399_v53 = vld [vmem:[%s3139_s20 + $0x18] sm:$0xff]  ;;  %920 = vmatpush.msra.mxu3 %v3462_v2 }
  0x65   : > { %5297 = vst [vmem:[#allocation62_spill] sm:$0xff] %v3436_v0  ;;  %2421 = vmatmul.msk.f32.gmra.mxu0 %vm418_vm0, %v399_v53  ;;  %2425 = vmatmul.msk.f32.gmra.mxu1 %vm418_vm0, %v399_v53  ;;  %v3497_v0 = vld [vmem:[#allocation7 + $0xa8] sm:$0xff] }
  0x66   : > { %5298 = vst [vmem:[#allocation63_spill] sm:$0xff] %v3438_v5  ;;  %2429 = vmatmul.msk.f32.gmra.mxu2 %vm418_vm0, %v399_v53  ;;  %2433 = vmatmul.msk.f32.gmra.mxu3 %vm418_vm0, %v399_v53  ;;  %v3495_v5 = vld [vmem:[#allocation7 + $0xa0] sm:$0xff]  ;;  %v3501_v53 = vld [vmem:[#allocation7 + $0xb0] sm:$0xff] }
  0x67   : > { %5299 = vst [vmem:[#allocation64_spill] sm:$0xff] %v3442_v7  ;;  %v3471_v7 = vld [vmem:[#allocation7 + $0xe0] sm:$0xff] }
  0x68   : > { %5300 = vst [vmem:[#allocation65_spill] sm:$0xff] %v3444_v63  ;;  %v3473_v63 = vld [vmem:[#allocation7 + $0xe8] sm:$0xff]  ;;  %861 = vmatpush.msra.mxu0 %v3471_v7 }
  0x69   : > { %5301 = vst [vmem:[#allocation66_spill] sm:$0xff] %v3448_v8  ;;  %v3477_v8 = vld [vmem:[#allocation7 + $0xf0] sm:$0xff]  ;;  %881 = vmatpush.msra.mxu1 %v3473_v63 }
  0x6a   : > { %5302 = vst [vmem:[#allocation67_spill] sm:$0xff] %v3450_v1  ;;  %v3479_v1 = vld [vmem:[#allocation7 + $0xf8] sm:$0xff]  ;;  %901 = vmatpush.msra.mxu2 %v3477_v8 }
  0x6b   : > { %5303 = vst [vmem:[#allocation68_spill] sm:$0xff] %v3454_v3  ;;  %v3491_v3 = vld [vmem:[#allocation7 + $0xd8] sm:$0xff]  ;;  %921 = vmatpush.msra.mxu3 %v3479_v1 }
  0x6c   : > { %5304 = vst [vmem:[#allocation69_spill] sm:$0xff] %v3456_v4  ;;  %v3483_v4 = vld [vmem:[#allocation7 + $0xc0] sm:$0xff] }
  0x6d   : > { %5305 = vst [vmem:[#allocation70_spill] sm:$0xff] %v3460_v6  ;;  %v3485_v6 = vld [vmem:[#allocation7 + $0xc8] sm:$0xff]  ;;  %862 = vmatpush.msra.mxu0 %v3483_v4  ;;  %922 = vmatpush.msra.mxu3 %v3491_v3 }
  0x6e   : > { %5306 = vst [vmem:[#allocation71_spill] sm:$0xff] %v3462_v2  ;;  %v3489_v2 = vld [vmem:[#allocation7 + $0xd0] sm:$0xff]  ;;  %882 = vmatpush.msra.mxu1 %v3485_v6 }
  0x6f   : > { %5307 = vst [vmem:[#allocation72_spill] sm:$0xff] %v3471_v7  ;;  %v3503_v7 = vld [vmem:[#allocation7 + $0xb8] sm:$0xff]  ;;  %902 = vmatpush.msra.mxu2 %v3489_v2  ;;  %863 = vmatpush.msra.mxu0 %v3495_v5 }
  0x70   : > { %5308 = vst [vmem:[#allocation73_spill] sm:$0xff] %v3473_v63  ;;  %v3507_v63 = vld [vmem:[#allocation7 + $0x80] sm:$0xff]  ;;  %883 = vmatpush.msra.mxu1 %v3497_v0  ;;  %923 = vmatpush.msra.mxu3 %v3503_v7 }
  0x71   : > { %5309 = vst [vmem:[#allocation74_spill] sm:$0xff] %v3477_v8  ;;  %v3509_v8 = vld [vmem:[#allocation7 + $0x88] sm:$0xff]  ;;  %903 = vmatpush.msra.mxu2 %v3501_v53  ;;  %864 = vmatpush.msra.mxu0 %v3507_v63 }
  0x72   : > { %5310 = vst [vmem:[#allocation75_spill] sm:$0xff] %v3479_v1  ;;  %v3513_v1 = vld [vmem:[#allocation7 + $0x90] sm:$0xff]  ;;  %884 = vmatpush.msra.mxu1 %v3509_v8 }
  0x73   : > { %5311 = vst [vmem:[#allocation76_spill] sm:$0xff] %v3483_v4  ;;  %v3515_v4 = vld [vmem:[#allocation7 + $0x98] sm:$0xff]  ;;  %904 = vmatpush.msra.mxu2 %v3513_v1 }
  0x74   : > { %5312 = vst [vmem:[#allocation77_spill] sm:$0xff] %v3485_v6  ;;  %v767_v6 = vld [vmem:[#allocation4] sm:$0xff]  ;;  %924 = vmatpush.msra.mxu3 %v3515_v4 }
  0x75   : > { %5313 = vst [vmem:[#allocation78_spill] sm:$0xff] %v3489_v2  ;;  %785 = vmatmul.f32.vlgmr.msrb.gmra.mxu0 %v767_v6  ;;  %805 = vmatmul.f32.vlgmr.msrb.gmra.mxu1 %v767_v6  ;;  %v3545_v2 = vld [vmem:[#allocation7 + $0x28] sm:$0xff] }
  0x76   : > { %5314 = vst [vmem:[#allocation79_spill] sm:$0xff] %v3491_v3  ;;  %v3527_v3 = vld [vmem:[#allocation7 + $0x70] sm:$0xff]  ;;  %825 = vmatmul.f32.vlgmr.msrb.gmra.mxu2 %v767_v6  ;;  %845 = vmatmul.f32.vlgmr.msrb.gmra.mxu3 %v767_v6 }
  0x77   : > { %5315 = vst [vmem:[#allocation80_spill] sm:$0xff] %v3495_v5  ;;  %v3523_v5 = vld [vmem:[#allocation7 + $0x60] sm:$0xff]  ;;  %905 = vmatpush.msra.mxu2 %v3527_v3  ;;  %v3549_v6 = vld [vmem:[#allocation7 + $0x30] sm:$0xff] }
  0x78   : > { %5316 = vst [vmem:[#allocation81_spill] sm:$0xff] %v3497_v0  ;;  %v3525_v0 = vld [vmem:[#allocation7 + $0x68] sm:$0xff]  ;;  %865 = vmatpush.msra.mxu0 %v3523_v5 }
  0x79   : > { %5317 = vst [vmem:[#allocation82_spill] sm:$0xff] %v3501_v53  ;;  %v3529_v53 = vld [vmem:[#allocation7 + $0x78] sm:$0xff]  ;;  %885 = vmatpush.msra.mxu1 %v3525_v0 }
  0x7a   : > { %5318 = vst [vmem:[#allocation83_spill] sm:$0xff] %v3503_v7  ;;  %v3531_v7 = vld [vmem:[#allocation7 + $0x40] sm:$0xff]  ;;  %925 = vmatpush.msra.mxu3 %v3529_v53 }
  0x7b   : > { %5319 = vst [vmem:[#allocation84_spill] sm:$0xff] %v3507_v63  ;;  %v3533_v63 = vld [vmem:[#allocation7 + $0x48] sm:$0xff]  ;;  %866 = vmatpush.msra.mxu0 %v3531_v7 }
  0x7c   : > { %5320 = vst [vmem:[#allocation85_spill] sm:$0xff] %v3509_v8  ;;  %v3543_v8 = vld [vmem:[#allocation7 + $0x20] sm:$0xff]  ;;  %886 = vmatpush.msra.mxu1 %v3533_v63 }
  0x7d   : > { %5321 = vst [vmem:[#allocation86_spill] sm:$0xff] %v3513_v1  ;;  %v3539_v1 = vld [vmem:[#allocation7 + $0x58] sm:$0xff]  ;;  %867 = vmatpush.msra.mxu0 %v3543_v8 }
  0x7e   : > { %5322 = vst [vmem:[#allocation87_spill] sm:$0xff] %v3515_v4  ;;  %v3537_v4 = vld [vmem:[#allocation7 + $0x50] sm:$0xff]  ;;  %926 = vmatpush.msra.mxu3 %v3539_v1  ;;  %887 = vmatpush.msra.mxu1 %v3545_v2 }
  0x7f   : > { %5323 = vst [vmem:[#allocation88_spill] sm:$0xff] %v3523_v5  ;;  %v3551_v5 = vld [vmem:[#allocation7 + $0x38] sm:$0xff]  ;;  %906 = vmatpush.msra.mxu2 %v3537_v4 }
  0x80   : > { %5324 = vst [vmem:[#allocation89_spill] sm:$0xff] %v3525_v0  ;;  %v3555_v0 = vld [vmem:[#allocation7] sm:$0xff]  ;;  %927 = vmatpush.msra.mxu3 %v3551_v5 }
  0x81   : > { %5325 = vst [vmem:[#allocation90_spill] sm:$0xff] %v3527_v3  ;;  %v3557_v3 = vld [vmem:[#allocation7 + $0x8] sm:$0xff]  ;;  %907 = vmatpush.msra.mxu2 %v3549_v6  ;;  %868 = vmatpush.msra.mxu0 %v3555_v0 }
  0x82   : > { %5326 = vst [vmem:[#allocation91_spill] sm:$0xff] %v3529_v53  ;;  %v3561_v53 = vld [vmem:[#allocation7 + $0x10] sm:$0xff]  ;;  %888 = vmatpush.msra.mxu1 %v3557_v3 }
  0x83   : > { %5327 = vst [vmem:[#allocation92_spill] sm:$0xff] %v3531_v7  ;;  %v3563_v7 = vld [vmem:[#allocation7 + $0x18] sm:$0xff]  ;;  %908 = vmatpush.msra.mxu2 %v3561_v53 }
  0x84   : > { %5328 = vst [vmem:[#allocation93_spill] sm:$0xff] %v3533_v63  ;;  %v765_v63 = vld [vmem:[#allocation2] sm:$0xff]  ;;  %928 = vmatpush.msra.mxu3 %v3563_v7 }
  0x85   : > { %5329 = vst [vmem:[#allocation94_spill] sm:$0xff] %v3537_v4  ;;  %869 = vmatmul.f32.vlgmr.msra.gmra.mxu0 %v765_v63  ;;  %889 = vmatmul.f32.vlgmr.msra.gmra.mxu1 %v765_v63 }
  0x86   : > { %5330 = vst [vmem:[#allocation95_spill] sm:$0xff] %v3539_v1  ;;  %909 = vmatmul.f32.vlgmr.msra.gmra.mxu2 %v765_v63  ;;  %929 = vmatmul.f32.vlgmr.msra.gmra.mxu3 %v765_v63 }
  0x87   : > { %5331 = vst [vmem:[#allocation96_spill] sm:$0xff] %v3543_v8 }
  0x88   : > { %5332 = vst [vmem:[#allocation97_spill] sm:$0xff] %v3545_v2 }
  0x89   : > { %5333 = vst [vmem:[#allocation98_spill] sm:$0xff] %v3549_v6 }
  0x8a   : > { %5334 = vst [vmem:[#allocation99_spill] sm:$0xff] %v3551_v5  ;;  %v408_v5 = vld [vmem:[%s4971_s3] sm:$0xf] }
  0x8b   : > { %5335 = vst [vmem:[#allocation100_spill] sm:$0xff] %v3555_v0  ;;  %v3592_v62 = vperm.slane %v408_v5, 2  ;;  %v3594_v61 = vperm.slane %v408_v5, 3 }
  0x8c   : > { %5336 = vst [vmem:[#allocation101_spill] sm:$0xff] %v3557_v3  ;;  %v3582_v3 = vperm.slane %v408_v5, 0 }
  0x8d   : > { %5337 = vst [vmem:[#allocation102_spill] sm:$0xff] %v3561_v53  ;;  %v3584_v53 = vperm.slane %v408_v5, 1 }
  0x8e   : > { %5338 = vst [vmem:[#allocation103_spill] sm:$0xff] %v3563_v7 }
  0xc1   : > { %v3571_v2 = vpop.f32.mrf.mxu0  ;;  %v3573_v8 = vpop.f32.mrf.mxu1 }
  0xc8   : > { %v3578_v6 = vpop.f32.mrf.mxu2  ;;  %v3580_v0 = vpop.f32.mrf.mxu3 }
  0xcb   : > { %v451_v7 = vpop.f32.mrf.mxu0  ;;  %v480_v1 = vpop.f32.mrf.mxu1 }
  0xcc   : > { %v3587_v63 = vadd.f32 %v451_v7, %v3582_v3  ;;  %v3590_v4 = vadd.f32 %v480_v1, %v3584_v53 }
  0xce   : > { %5339 = vst [vmem:[#allocation104_spill] sm:$0xff] %v3587_v63 }
  0xcf   : > { %5340 = vst [vmem:[#allocation105_spill] sm:$0xff] %v3590_v4 }
  0xd2   : > { %v509_v60 = vpop.f32.mrf.mxu2  ;;  %v538_v59 = vpop.f32.mrf.mxu3 }
  0xd3   : > { %v3597_v58 = vadd.f32 %v509_v60, %v3592_v62  ;;  %v3600_v57 = vadd.f32 %v538_v59, %v3594_v61 }
  0xd5   : > { %5341 = vst [vmem:[#allocation106_spill] sm:$0xff] %v3597_v58 }
  0xd6   : > { %5342 = vst [vmem:[#allocation107_spill] sm:$0xff] %v3600_v57 }
  0xd7   : > { %v454_v56 = vpop.f32.mrf.mxu0  ;;  %v483_v55 = vpop.f32.mrf.mxu1 }
  0xd8   : > { %v3603_v7 = vadd.f32 %v454_v56, %v3582_v3  ;;  %v3606_v1 = vadd.f32 %v483_v55, %v3584_v53  ;;  %v3620_v56 = vld [vmem:[#allocation10 + $0x1e0] sm:$0xff]  ;;  %v3622_v55 = vld [vmem:[#allocation10 + $0x1e8] sm:$0xff] }
  0xd9   : > { %5349 = vst [vmem:[#allocation114_spill] sm:$0xff] %v3620_v56  ;;  %1000 = vmatpush.msrb.mxu0 %v3620_v56  ;;  %1020 = vmatpush.msrb.mxu1 %v3622_v55  ;;  %v3744_v56 = vld [vmem:[#allocation10 + $0xc0] sm:$0xff] }
  0xda   : > { %5343 = vst [vmem:[#allocation108_spill] sm:$0xff] %v3603_v7 }
  0xdb   : > { %5344 = vst [vmem:[#allocation109_spill] sm:$0xff] %v3606_v1  ;;  %v3624_v1 = vld [vmem:[#allocation10 + $0x1f0] sm:$0xff] }
  0xdc   : > { %5350 = vst [vmem:[#allocation115_spill] sm:$0xff] %v3622_v55  ;;  %1040 = vmatpush.msrb.mxu2 %v3624_v1  ;;  %v3666_v55 = vld [vmem:[#allocation10 + $0x190] sm:$0xff] }
  0xdd   : > { %5351 = vst [vmem:[#allocation116_spill] sm:$0xff] %v3624_v1  ;;  %v3664_v1 = vld [vmem:[#allocation10 + $0x188] sm:$0xff] }
  0xde   : > { %v512_v4 = vpop.f32.mrf.mxu2  ;;  %v541_v63 = vpop.f32.mrf.mxu3  ;;  %5364 = vst [vmem:[#allocation129_spill] sm:$0xff] %v3664_v1 }
  0xdf   : > { %v3609_v5 = vadd.f32 %v512_v4, %v3592_v62  ;;  %v3612_v54 = vadd.f32 %v541_v63, %v3594_v61  ;;  %v3628_v4 = vld [vmem:[#allocation10 + $0x1f8] sm:$0xff]  ;;  %v3632_v63 = vld [vmem:[#allocation10 + $0x1c0] sm:$0xff]  ;;  %5365 = vst [vmem:[#allocation130_spill] sm:$0xff] %v3666_v55 }
  0xe0   : > { %5352 = vst [vmem:[#allocation117_spill] sm:$0xff] %v3628_v4  ;;  %1060 = vmatpush.msrb.mxu3 %v3628_v4  ;;  %1001 = vmatpush.msrb.mxu0 %v3632_v63 }
  0xe1   : > { %5345 = vst [vmem:[#allocation110_spill] sm:$0xff] %v3609_v5  ;;  %v3646_v5 = vld [vmem:[#allocation10 + $0x1a8] sm:$0xff] }
  0xe2   : > { %5346 = vst [vmem:[#allocation111_spill] sm:$0xff] %v3612_v54  ;;  %v457_v60 = vpop.f32.mrf.mxu0  ;;  %v486_v58 = vpop.f32.mrf.mxu1  ;;  %v3648_v54 = vld [vmem:[#allocation10 + $0x1b0] sm:$0xff] }
  0xe3   : > { %v3615_v59 = vadd.f32 %v457_v60, %v3582_v3  ;;  %v3618_v57 = vadd.f32 %v486_v58, %v3584_v53  ;;  %5353 = vst [vmem:[#allocation118_spill] sm:$0xff] %v3632_v63  ;;  %v3634_v58 = vld [vmem:[#allocation10 + $0x1c8] sm:$0xff]  ;;  %v3636_v60 = vld [vmem:[#allocation10 + $0x1d0] sm:$0xff]  ;;  %v3652_v63 = vld [vmem:[#allocation10 + $0x1b8] sm:$0xff] }
  0xe4   : > { %5354 = vst [vmem:[#allocation119_spill] sm:$0xff] %v3634_v58  ;;  %1021 = vmatpush.msrb.mxu1 %v3634_v58  ;;  %1041 = vmatpush.msrb.mxu2 %v3636_v60 }
  0xe5   : > { %5347 = vst [vmem:[#allocation112_spill] sm:$0xff] %v3615_v59  ;;  %v3644_v59 = vld [vmem:[#allocation10 + $0x1a0] sm:$0xff] }
  0xe6   : > { %5348 = vst [vmem:[#allocation113_spill] sm:$0xff] %v3618_v57  ;;  %v3640_v57 = vld [vmem:[#allocation10 + $0x1d8] sm:$0xff]  ;;  %1002 = vmatpush.msrb.mxu0 %v3644_v59  ;;  %1022 = vmatpush.msrb.mxu1 %v3646_v5 }
  0xe7   : > { %5355 = vst [vmem:[#allocation120_spill] sm:$0xff] %v3636_v60  ;;  %1061 = vmatpush.msrb.mxu3 %v3640_v57  ;;  %1042 = vmatpush.msrb.mxu2 %v3648_v54 }
  0xe8   : > { %5356 = vst [vmem:[#allocation121_spill] sm:$0xff] %v3640_v57  ;;  %v3662_v57 = vld [vmem:[#allocation10 + $0x180] sm:$0xff]  ;;  %1023 = vmatpush.msrb.mxu1 %v3664_v1  ;;  %v3686_v1 = vld [vmem:[#allocation10 + $0x178] sm:$0xff] }
  0xe9   : > { %5357 = vst [vmem:[#allocation122_spill] sm:$0xff] %v3644_v59  ;;  %v515_v7 = vpop.f32.mrf.mxu2  ;;  %v544_v4 = vpop.f32.mrf.mxu3  ;;  %1062 = vmatpush.msrb.mxu3 %v3652_v63  ;;  %1003 = vmatpush.msrb.mxu0 %v3662_v57  ;;  %v449_v59 = vadd.f32 %v3571_v2, %v3582_v3  ;;  %v3748_v2 = vld [vmem:[#allocation10 + $0xd0] sm:$0xff] }
  0xea   : > { %5358 = vst [vmem:[#allocation123_spill] sm:$0xff] %v3646_v5  ;;  %v3655_v58 = vadd.f32 %v515_v7, %v3592_v62  ;;  %v3658_v60 = vadd.f32 %v544_v4, %v3594_v61  ;;  %v3670_v5 = vld [vmem:[#allocation10 + $0x198] sm:$0xff]  ;;  %1043 = vmatpush.msrb.mxu2 %v3666_v55  ;;  %v3692_v55 = vld [vmem:[#allocation10 + $0x148] sm:$0xff] }
  0xeb   : > { %5359 = vst [vmem:[#allocation124_spill] sm:$0xff] %v3648_v54  ;;  %1063 = vmatpush.msrb.mxu3 %v3670_v5  ;;  %v3698_v54 = vld [vmem:[#allocation10 + $0x158] sm:$0xff] }
  0xec   : > { %5360 = vst [vmem:[#allocation125_spill] sm:$0xff] %v3652_v63  ;;  %v3682_v63 = vld [vmem:[#allocation10 + $0x170] sm:$0xff] }
  0xed   : > { %5361 = vst [vmem:[#allocation126_spill] sm:$0xff] %v3655_v58  ;;  %v3678_v58 = vld [vmem:[#allocation10 + $0x160] sm:$0xff]  ;;  %1044 = vmatpush.msrb.mxu2 %v3682_v63  ;;  %1064 = vmatpush.msrb.mxu3 %v3686_v1 }
  0xee   : > { %5362 = vst [vmem:[#allocation127_spill] sm:$0xff] %v3658_v60  ;;  %v3680_v60 = vld [vmem:[#allocation10 + $0x168] sm:$0xff]  ;;  %1004 = vmatpush.msrb.mxu0 %v3678_v58 }
  0xef   : > { %5363 = vst [vmem:[#allocation128_spill] sm:$0xff] %v3662_v57  ;;  %1024 = vmatpush.msrb.mxu1 %v3680_v60  ;;  %v3690_v57 = vld [vmem:[#allocation10 + $0x140] sm:$0xff]  ;;  %1065 = vmatpush.msrb.mxu3 %v3698_v54 }
  0xf0   : > { %5366 = vst [vmem:[#allocation131_spill] sm:$0xff] %v3670_v5  ;;  %v3694_v5 = vld [vmem:[#allocation10 + $0x150] sm:$0xff]  ;;  %1005 = vmatpush.msrb.mxu0 %v3690_v57 }
  0xf1   : > { %5368 = vst [vmem:[#allocation133_spill] sm:$0xff] %v3678_v58  ;;  %1025 = vmatpush.msrb.mxu1 %v3692_v55  ;;  %1045 = vmatpush.msrb.mxu2 %v3694_v5  ;;  %v3710_v58 = vld [vmem:[#allocation10 + $0x138] sm:$0xff] }
  0xf2   : > { %v3672_v7 = vpop.f32.mrf.mxu0  ;;  %v3674_v4 = vpop.f32.mrf.mxu1  ;;  %5369 = vst [vmem:[#allocation134_spill] sm:$0xff] %v3680_v60  ;;  %v3702_v60 = vld [vmem:[#allocation10 + $0x120] sm:$0xff]  ;;  %1066 = vmatpush.msrb.mxu3 %v3710_v58 }
  0xf3   : > { %5367 = vst [vmem:[#allocation132_spill] sm:$0xff] %v3674_v4  ;;  %1006 = vmatpush.msrb.mxu0 %v3702_v60 }
  0xf4   : > { %5370 = vst [vmem:[#allocation135_spill] sm:$0xff] %v3682_v63  ;;  %v3704_v63 = vld [vmem:[#allocation10 + $0x128] sm:$0xff] }
  0xf5   : > { %5371 = vst [vmem:[#allocation136_spill] sm:$0xff] %v3686_v1  ;;  %1026 = vmatpush.msrb.mxu1 %v3704_v63  ;;  %v3708_v1 = vld [vmem:[#allocation10 + $0x130] sm:$0xff] }
  0xf6   : > { %5372 = vst [vmem:[#allocation137_spill] sm:$0xff] %v3690_v57  ;;  %1046 = vmatpush.msrb.mxu2 %v3708_v1 }
  0xf7   : > { %5373 = vst [vmem:[#allocation138_spill] sm:$0xff] %v3692_v55  ;;  %v3714_v55 = vld [vmem:[#allocation10 + $0x100] sm:$0xff] }
  0xf8   : > { %5374 = vst [vmem:[#allocation139_spill] sm:$0xff] %v3694_v5  ;;  %v3716_v5 = vld [vmem:[#allocation10 + $0x108] sm:$0xff]  ;;  %1007 = vmatpush.msrb.mxu0 %v3714_v55 }
  0xf9   : > { %5375 = vst [vmem:[#allocation140_spill] sm:$0xff] %v3698_v54  ;;  %v3718_v54 = vld [vmem:[#allocation10 + $0x110] sm:$0xff]  ;;  %v3720_v57 = vpop.f32.mrf.mxu3  ;;  %1027 = vmatpush.msrb.mxu1 %v3716_v5 }
  0xfa   : > { %5376 = vst [vmem:[#allocation141_spill] sm:$0xff] %v3702_v60  ;;  %1047 = vmatpush.msrb.mxu2 %v3718_v54  ;;  %v3732_v60 = vld [vmem:[#allocation10 + $0xf0] sm:$0xff] }
  0xfb   : > { %5377 = vst [vmem:[#allocation142_spill] sm:$0xff] %v3704_v63  ;;  %v3724_v63 = vld [vmem:[#allocation10 + $0x118] sm:$0xff] }
  0xfc   : > { %5378 = vst [vmem:[#allocation143_spill] sm:$0xff] %v3708_v1  ;;  %1067 = vmatpush.msrb.mxu3 %v3724_v63  ;;  %v3728_v1 = vld [vmem:[#allocation10 + $0xe0] sm:$0xff]  ;;  %1048 = vmatpush.msrb.mxu2 %v3732_v60 }
  0xfd   : > { %5379 = vst [vmem:[#allocation144_spill] sm:$0xff] %v3710_v58  ;;  %v3730_v58 = vld [vmem:[#allocation10 + $0xe8] sm:$0xff]  ;;  %1008 = vmatpush.msrb.mxu0 %v3728_v1 }
  0xfe   : > { %5380 = vst [vmem:[#allocation145_spill] sm:$0xff] %v3714_v55  ;;  %v478_v55 = vadd.f32 %v3573_v8, %v3584_v53  ;;  %1028 = vmatpush.msrb.mxu1 %v3730_v58  ;;  %v3752_v53 = vld [vmem:[#allocation10 + $0xd8] sm:$0xff]  ;;  %1049 = vmatpush.msrb.mxu2 %v3748_v2 }
  0xff   : > { %5381 = vst [vmem:[#allocation146_spill] sm:$0xff] %v3716_v5  ;;  %v3740_v5 = vld [vmem:[#allocation10 + $0xf8] sm:$0xff]  ;;  %1009 = vmatpush.msrb.mxu0 %v3744_v56 }
 0x100   : > { %5382 = vst [vmem:[#allocation147_spill] sm:$0xff] %v3718_v54  ;;  %1068 = vmatpush.msrb.mxu3 %v3740_v5 }
 0x101   : > { %5383 = vst [vmem:[#allocation148_spill] sm:$0xff] %v3720_v57  ;;  %v3746_v57 = vld [vmem:[#allocation10 + $0xc8] sm:$0xff] }
 0x102   : > { %5384 = vst [vmem:[#allocation149_spill] sm:$0xff] %v3724_v63  ;;  %v870_v54 = vpop.f32.mrf.mxu0  ;;  %v890_v63 = vpop.f32.mrf.mxu1  ;;  %1029 = vmatpush.msrb.mxu1 %v3746_v57  ;;  %1069 = vmatpush.msrb.mxu3 %v3752_v53 }
 0x103   : > { %5385 = vst [vmem:[#allocation150_spill] sm:$0xff] %v3728_v1  ;;  %v933_v3 = vadd.f32 %v870_v54, %v449_v59  ;;  %v934_v8 = vadd.f32 %v890_v63, %v478_v55  ;;  %v3764_v54 = vld [vmem:[#allocation10 + $0xb8] sm:$0xff]  ;;  %v3768_v59 = vld [vmem:[#allocation10 + $0x80] sm:$0xff]  ;;  %v3770_v55 = vld [vmem:[#allocation10 + $0x88] sm:$0xff] }
 0x104   : > { %5386 = vst [vmem:[#allocation151_spill] sm:$0xff] %v3730_v58  ;;  %v3760_v58 = vld [vmem:[#allocation10 + $0xb0] sm:$0xff]  ;;  %1070 = vmatpush.msrb.mxu3 %v3764_v54 }
 0x105   : > { %5387 = vst [vmem:[#allocation152_spill] sm:$0xff] %v3732_v60  ;;  %v3756_v60 = vld [vmem:[#allocation10 + $0xa0] sm:$0xff]  ;;  %v2434_v1 = vmul.f32 -1.442695, %v933_v3  ;;  %v2435_v4 = vmul.f32 -1.442695, %v934_v8  ;;  %1050 = vmatpush.msrb.mxu2 %v3760_v58  ;;  %v536_v8 = vadd.f32 %v3580_v0, %v3594_v61 }
 0x106   : > { %5388 = vst [vmem:[#allocation153_spill] sm:$0xff] %v3740_v5  ;;  %v3758_v5 = vld [vmem:[#allocation10 + $0xa8] sm:$0xff]  ;;  %1010 = vmatpush.msrb.mxu0 %v3756_v60  ;;  %v3772_v63 = vld [vmem:[#allocation10 + $0x90] sm:$0xff]  ;;  %v3776_v3 = vld [vmem:[#allocation10 + $0x98] sm:$0xff] }
 0x107   : > { %5389 = vst [vmem:[#allocation154_spill] sm:$0xff] %v3756_v60  ;;  %1030 = vmatpush.msrb.mxu1 %v3758_v5  ;;  %2524 = vpow2.f32 %v2434_v1  ;;  %1051 = vmatpush.msrb.mxu2 %v3772_v63  ;;  %v3788_v1 = vpop.f32.mrf.mxu2  ;;  %v3796_v0 = vld [vmem:[#allocation10 + $0x40] sm:$0xff]  ;;  %v3828_v60 = vld [vmem:[#allocation10 + $0x18] sm:$0xff] }
 0x108   : > { %5390 = vst [vmem:[#allocation155_spill] sm:$0xff] %v3758_v5  ;;  %1011 = vmatpush.msrb.mxu0 %v3768_v59  ;;  %2526 = vpow2.f32 %v2435_v4  ;;  %1071 = vmatpush.msrb.mxu3 %v3776_v3  ;;  %v3786_v5 = vld [vmem:[#allocation10 + $0x70] sm:$0xff]  ;;  %v3798_v4 = vld [vmem:[#allocation10 + $0x48] sm:$0xff] }
 0x109   : > { %5391 = vst [vmem:[#allocation156_spill] sm:$0xff] %v3760_v58  ;;  %1031 = vmatpush.msrb.mxu1 %v3770_v55  ;;  %v3784_v58 = vld [vmem:[#allocation10 + $0x68] sm:$0xff]  ;;  %1052 = vmatpush.msrb.mxu2 %v3786_v5 }
 0x10a   : > { %5392 = vst [vmem:[#allocation157_spill] sm:$0xff] %v3764_v54  ;;  %v3782_v54 = vld [vmem:[#allocation10 + $0x60] sm:$0xff] }
 0x10b   : > { %5393 = vst [vmem:[#allocation158_spill] sm:$0xff] %v3768_v59  ;;  %v930_v59 = vpop.f32.mrf.mxu3  ;;  %1012 = vmatpush.msrb.mxu0 %v3782_v54  ;;  %1032 = vmatpush.msrb.mxu1 %v3784_v58 }
 0x10c   : > { %5394 = vst [vmem:[#allocation159_spill] sm:$0xff] %v3770_v55  ;;  %v3792_v55 = vld [vmem:[#allocation10 + $0x78] sm:$0xff]  ;;  %v936_v61 = vadd.f32 %v930_v59, %v536_v8  ;;  %v3808_v59 = vld [vmem:[#allocation10 + $0x20] sm:$0xff]  ;;  %v3810_v8 = vld [vmem:[#allocation10 + $0x28] sm:$0xff] }
 0x10d   : > { %5395 = vst [vmem:[#allocation160_spill] sm:$0xff] %v3772_v63  ;;  %1072 = vmatpush.msrb.mxu3 %v3792_v55  ;;  %1013 = vmatpush.msrb.mxu0 %v3796_v0 }
 0x10e   : > { %5396 = vst [vmem:[#allocation161_spill] sm:$0xff] %v3776_v3  ;;  %v3800_v3 = vld [vmem:[#allocation10 + $0x50] sm:$0xff]  ;;  %1033 = vmatpush.msrb.mxu1 %v3798_v4 }
 0x10f   : > { %5397 = vst [vmem:[#allocation162_spill] sm:$0xff] %v3782_v54  ;;  %v3804_v54 = vld [vmem:[#allocation10 + $0x58] sm:$0xff]  ;;  %1053 = vmatpush.msrb.mxu2 %v3800_v3  ;;  %1014 = vmatpush.msrb.mxu0 %v3808_v59 }
 0x110   : > { %5398 = vst [vmem:[#allocation163_spill] sm:$0xff] %v3784_v58  ;;  %v2436_v58 = vmul.f32 -1.442695, %v936_v61  ;;  %1073 = vmatpush.msrb.mxu3 %v3804_v54  ;;  %1034 = vmatpush.msrb.mxu1 %v3810_v8  ;;  %v3820_v61 = vld [vmem:[#allocation10 + $0x8] sm:$0xff] }
 0x111   : > { %5399 = vst [vmem:[#allocation164_spill] sm:$0xff] %v3786_v5  ;;  %v2525_v5 = vpop.eup %2524 }
 0x112   : > { %5400 = vst [vmem:[#allocation165_spill] sm:$0xff] %v3792_v55  ;;  %v3812_v55 = vld [vmem:[#allocation10 + $0x30] sm:$0xff]  ;;  %v3822_v63 = vadd.f32 1.0, %v2525_v5  ;;  %2528 = vpow2.f32 %v2436_v58  ;;  %1035 = vmatpush.msrb.mxu1 %v3820_v61  ;;  %v910_v5 = vpop.f32.mrf.mxu2 }
 0x113   : > { %5401 = vst [vmem:[#allocation166_spill] sm:$0xff] %v3796_v0  ;;  %v3816_v0 = vld [vmem:[#allocation10 + $0x38] sm:$0xff]  ;;  %1054 = vmatpush.msrb.mxu2 %v3812_v55 }
 0x114   : > { %5402 = vst [vmem:[#allocation167_spill] sm:$0xff] %v3798_v4  ;;  %v3818_v4 = vld [vmem:[#allocation10] sm:$0xff]  ;;  %1074 = vmatpush.msrb.mxu3 %v3816_v0  ;;  %2530 = vrcp.f32 %v3822_v63  ;;  %1163 = vmatpush.msra.mxu1 %v3169_v10  ;;  %vm946_vm3 = vweird.f32 %v3822_v63 }
 0x115   : > { %5403 = vst [vmem:[#allocation168_spill] sm:$0xff] %v3800_v3  ;;  %v2527_v3 = vpop.eup %2526  ;;  %1015 = vmatpush.msrb.mxu0 %v3818_v4 }
 0x116   : > { %5404 = vst [vmem:[#allocation169_spill] sm:$0xff] %v3804_v54  ;;  %v3826_v54 = vld [vmem:[#allocation10 + $0x10] sm:$0xff]  ;;  %1075 = vmatpush.msrb.mxu3 %v3828_v60  ;;  %1164 = vmatpush.msra.mxu1 %v3177_v14 }
 0x117   : > { %5405 = vst [vmem:[#allocation170_spill] sm:$0xff] %v3808_v59  ;;  %v3830_v59 = vadd.f32 1.0, %v2527_v3  ;;  %1055 = vmatpush.msrb.mxu2 %v3826_v54  ;;  %1143 = vmatpush.msra.mxu0 %v3167_v9  ;;  %v507_v3 = vadd.f32 %v3578_v6, %v3592_v62  ;;  %v5415_v6 = vld [vmem:[#allocation29_spill] sm:$0xff] }
 0x118   : > { %1203 = vmatpush.msra.mxu3 %v3173_v12  ;;  %v2529_v58 = vpop.eup %2528  ;;  %1165 = vmatpush.msra.mxu1 %v3189_v18 }
 0x119   : > { %2532 = vrcp.f32 %v3830_v59  ;;  %1183 = vmatpush.msra.mxu2 %v3171_v11  ;;  %1144 = vmatpush.msra.mxu0 %v3175_v13  ;;  %v3848_v9 = vadd.f32 1.0, %v2529_v58  ;;  %v935_v11 = vadd.f32 %v910_v5, %v507_v3  ;;  %v971_v18 = vand.u32 2147483648, %v3830_v59  ;;  %v5416_v5 = vld [vmem:[#allocation30_spill] sm:$0xff]  ;;  %v5417_v58 = vld [vmem:[#allocation31_spill] sm:$0xff] }
 0x11a   : > { %1204 = vmatpush.msra.mxu3 %v3183_v16  ;;  %v2531_v10 = vpop.eup %2530  ;;  %1166 = vmatpush.msra.mxu1 %v3201_v22  ;;  %v969_v22 = vand.u32 2147483647, %v3830_v59  ;;  %vm965_vm4 = vweird.f32 %v3830_v59 }
 0x11b   : > { %1184 = vmatpush.msra.mxu2 %v3181_v15  ;;  %1145 = vmatpush.msra.mxu0 %v3187_v17  ;;  %v942_v13 = vmul.f32 %v2531_v10, %v3822_v63  ;;  %2534 = vrcp.f32 %v3848_v9  ;;  %v952_v17 = vand.u32 2147483648, %v3822_v63  ;;  %vm947_vm1 = vweird.f32 %v2531_v10 }
 0x11c   : > { %1205 = vmatpush.msra.mxu3 %v3195_v20  ;;  %1167 = vmatpush.msra.mxu1 %v3213_v26  ;;  %2536 = vtanh.f32 %v935_v11  ;;  %v950_v20 = vand.u32 2147483647, %v3822_v63  ;;  %vm948_vm5 = vmor %vm946_vm3, %vm947_vm1  ;;  %vm970_vm8 = vcmp.eq.f32.partialorder %v969_v22, 8.507059e+37  ;;  %vm985_vm10 = vweird.f32 %v3848_v9  ;;  %v5420_v11 = vld [vmem:[#allocation34_spill] sm:$0xff]  ;;  %v5431_v22 = vld [vmem:[#allocation45_spill] sm:$0xff] }
 0x11d   : > { %1185 = vmatpush.msra.mxu2 %v3193_v19  ;;  %1146 = vmatpush.msra.mxu0 %v3199_v21  ;;  %v943_v15 = vsub.f32 1.0, %v942_v13  ;;  %v5422_v13 = vld [vmem:[#allocation36_spill] sm:$0xff] }
 0x11e   : > { %1206 = vmatpush.msra.mxu3 %v3207_v24  ;;  %1168 = vmatpush.msra.mxu1 %v3225_v30  ;;  %vm951_vm7 = vcmp.eq.f32.partialorder %v950_v20, 8.507059e+37  ;;  %v5429_v20 = vld [vmem:[#allocation43_spill] sm:$0xff] }
 0x11f   : > { %v2533_v12 = vpop.eup %2532  ;;  %1186 = vmatpush.msra.mxu2 %v3205_v23  ;;  %1147 = vmatpush.msra.mxu0 %v3211_v25  ;;  %v944_v19 = vmul.f32 %v2531_v10, %v943_v15  ;;  %v953_v25 = vor.u32 1.1754944e-38, %v952_v17  ;;  %v5424_v15 = vld [vmem:[#allocation38_spill] sm:$0xff]  ;;  %v5426_v17 = vld [vmem:[#allocation40_spill] sm:$0xff] }
 0x120   : > { %v961_v14 = vmul.f32 %v2533_v12, %v3830_v59  ;;  %1207 = vmatpush.msra.mxu3 %v3219_v28  ;;  %vm966_vm2 = vweird.f32 %v2533_v12  ;;  %1169 = vmatpush.msra.mxu1 %v3237_v34  ;;  %v972_v28 = vor.u32 1.1754944e-38, %v971_v18  ;;  %v5427_v18 = vld [vmem:[#allocation41_spill] sm:$0xff] }
 0x121   : > { %1187 = vmatpush.msra.mxu2 %v3217_v27  ;;  %1148 = vmatpush.msra.mxu0 %v3223_v29  ;;  %v3873_v23 = vpop.eup %2534  ;;  %v945_v24 = vadd.f32 %v2531_v10, %v944_v19  ;;  %vm967_vm6 = vmor %vm965_vm4, %vm966_vm2  ;;  %v766_v29 = vld [vmem:[#allocation3] sm:$0xff]  ;;  %v5428_v19 = vld [vmem:[#allocation42_spill] sm:$0xff] }
 0x122   : > { %v962_v16 = vsub.f32 1.0, %v961_v14  ;;  %1208 = vmatpush.msra.mxu3 %v3231_v32  ;;  %v981_v27 = vmul.f32 %v3873_v23, %v3848_v9  ;;  %1170 = vmatpush.msra.mxu1 %v3249_v38  ;;  %vm986_vm9 = vweird.f32 %v3873_v23  ;;  %v5423_v14 = vld [vmem:[#allocation37_spill] sm:$0xff] }
 0x123   : > { %1188 = vmatpush.msra.mxu2 %v3229_v31  ;;  %1149 = vmatpush.msra.mxu0 %v3235_v33  ;;  %v949_v30 = vsel %vm948_vm5, %v2531_v10, %v945_v24  ;;  %v2537_v31 = vpop.eup %2536  ;;  %vm987_vm11 = vmor %vm985_vm10, %vm986_vm9  ;;  %v5419_v10 = vld [vmem:[#allocation33_spill] sm:$0xff]  ;;  %v5433_v24 = vld [vmem:[#allocation47_spill] sm:$0xff] }
 0x124   : > { %v963_v21 = vmul.f32 %v2533_v12, %v962_v16  ;;  %1209 = vmatpush.msra.mxu3 %v3243_v36  ;;  %v954_v32 = vsel %vm951_vm7, %v953_v25, %v949_v30  ;;  %v982_v34 = vsub.f32 1.0, %v981_v27  ;;  %1171 = vmatpush.msra.mxu1 %v3261_v42  ;;  %v5406_v42 = vld [vmem:[#allocation20_spill] sm:$0xff]  ;;  %v5425_v16 = vld [vmem:[#allocation39_spill] sm:$0xff]  ;;  %v5436_v27 = vld [vmem:[#allocation50_spill] sm:$0xff] }
 0x125   : > { %1189 = vmatpush.msra.mxu2 %v3241_v35  ;;  %1150 = vmatpush.msra.mxu0 %v3247_v37  ;;  %v996_v36 = vmul.f32 %v2537_v31, %v954_v32  ;;  %v5434_v25 = vld [vmem:[#allocation48_spill] sm:$0xff]  ;;  %v5439_v30 = vld [vmem:[#allocation53_spill] sm:$0xff]  ;;  %v5440_v31 = vld [vmem:[#allocation54_spill] sm:$0xff] }
 0x126   : > { %v964_v26 = vadd.f32 %v2533_v12, %v963_v21  ;;  %1210 = vmatpush.msra.mxu3 %v3255_v40  ;;  %v983_v37 = vmul.f32 %v3873_v23, %v982_v34  ;;  %1172 = vmatpush.msra.mxu1 %v3273_v46  ;;  %v991_v40 = vand.u32 2147483648, %v3848_v9  ;;  %v5430_v21 = vld [vmem:[#allocation44_spill] sm:$0xff]  ;;  %v5441_v32 = vld [vmem:[#allocation55_spill] sm:$0xff]  ;;  %v5443_v34 = vld [vmem:[#allocation57_spill] sm:$0xff] }
 0x127   : > { %1190 = vmatpush.msra.mxu2 %v3253_v39  ;;  %1151 = vmatpush.msra.mxu0 %v3259_v41  ;;  %v989_v41 = vand.u32 2147483647, %v3848_v9  ;;  %v5418_v9 = vld [vmem:[#allocation32_spill] sm:$0xff] }
 0x128   : > { %v968_v33 = vsel %vm967_vm6, %v2533_v12, %v964_v26  ;;  %1211 = vmatpush.msra.mxu3 %v3267_v44  ;;  %v984_v39 = vadd.f32 %v3873_v23, %v983_v37  ;;  %1173 = vmatpush.msra.mxu1 %v3285_v50  ;;  %v5408_v44 = vld [vmem:[#allocation22_spill] sm:$0xff]  ;;  %v5421_v12 = vld [vmem:[#allocation35_spill] sm:$0xff]  ;;  %v5435_v26 = vld [vmem:[#allocation49_spill] sm:$0xff] }
 0x129   : > { %v973_v35 = vsel %vm970_vm8, %v972_v28, %v968_v33  ;;  %1191 = vmatpush.msra.mxu2 %v3265_v43  ;;  %1152 = vmatpush.msra.mxu0 %v3271_v45  ;;  %v5407_v43 = vld [vmem:[#allocation21_spill] sm:$0xff]  ;;  %v5409_v45 = vld [vmem:[#allocation23_spill] sm:$0xff]  ;;  %v5412_v50 = vld [vmem:[#allocation26_spill] sm:$0xff]  ;;  %vm990_vm12 = vcmp.eq.f32.partialorder %v989_v41, 8.507059e+37 }
 0x12a   : > { %v995_v62 = vmul.f32 %v973_v35, %v766_v29  ;;  %1212 = vmatpush.msra.mxu3 %v3279_v48  ;;  %1174 = vmatpush.msra.mxu1 %v5407_v43  ;;  %v988_v46 = vsel %vm987_vm11, %v3873_v23, %v984_v39  ;;  %v5411_v48 = vld [vmem:[#allocation25_spill] sm:$0xff]  ;;  %v5432_v23 = vld [vmem:[#allocation46_spill] sm:$0xff]  ;;  %v5437_v28 = vld [vmem:[#allocation51_spill] sm:$0xff] }
 0x12b   : > { %1192 = vmatpush.msra.mxu2 %v3277_v47  ;;  %1153 = vmatpush.msra.mxu0 %v3283_v49  ;;  %v5410_v47 = vld [vmem:[#allocation24_spill] sm:$0xff]  ;;  %v992_v49 = vor.u32 1.1754944e-38, %v991_v40  ;;  %v5444_v35 = vld [vmem:[#allocation58_spill] sm:$0xff]  ;;  %v5447_v37 = vld [vmem:[#allocation61_spill] sm:$0xff] }
 0x12c   : > { %v3896_v38 = vadd.f32 %v996_v36, %v995_v62  ;;  %1213 = vmatpush.msra.mxu3 %v3291_v52  ;;  %1175 = vmatpush.msra.mxu1 %v5411_v48  ;;  %v5414_v52 = vld [vmem:[#allocation28_spill] sm:$0xff]  ;;  %v5445_v36 = vld [vmem:[#allocation59_spill] sm:$0xff]  ;;  %v5448_v39 = vld [vmem:[#allocation62_spill] sm:$0xff] }
 0x12d   : > { %1193 = vmatpush.msra.mxu2 %v3289_v51  ;;  %1154 = vmatpush.msra.mxu0 %v5406_v42  ;;  %v5413_v51 = vld [vmem:[#allocation27_spill] sm:$0xff]  ;;  %v993_v59 = vsel %vm990_vm12, %v992_v49, %v988_v46  ;;  %v5438_v29 = vld [vmem:[#allocation52_spill] sm:$0xff]  ;;  %v5451_v42 = vld [vmem:[#allocation65_spill] sm:$0xff] }
 0x12e   : > { %2538 = vtanh.f32 %v3896_v38  ;;  %1214 = vmatpush.msra.mxu3 %v5409_v45  ;;  %1176 = vmatpush.msra.mxu1 %v5415_v6  ;;  %v5442_v33 = vld [vmem:[#allocation56_spill] sm:$0xff]  ;;  %v5449_v40 = vld [vmem:[#allocation63_spill] sm:$0xff]  ;;  %v5452_v43 = vld [vmem:[#allocation66_spill] sm:$0xff] }
 0x12f   : > { %1194 = vmatpush.msra.mxu2 %v5408_v44  ;;  %1155 = vmatpush.msra.mxu0 %v5410_v47  ;;  %v5446_v62 = vld [vmem:[#allocation60_spill] sm:$0xff]  ;;  %v5453_v44 = vld [vmem:[#allocation67_spill] sm:$0xff]  ;;  %v5455_v46 = vld [vmem:[#allocation69_spill] sm:$0xff] }
 0x130   : > { %1215 = vmatpush.msra.mxu3 %v5413_v51  ;;  %1177 = vmatpush.msra.mxu1 %v5419_v10  ;;  %v5450_v41 = vld [vmem:[#allocation64_spill] sm:$0xff]  ;;  %v5456_v47 = vld [vmem:[#allocation70_spill] sm:$0xff]  ;;  %v5457_v48 = vld [vmem:[#allocation71_spill] sm:$0xff] }
 0x131   : > { %1195 = vmatpush.msra.mxu2 %v5412_v50  ;;  %1156 = vmatpush.msra.mxu0 %v5414_v52  ;;  %v5454_v45 = vld [vmem:[#allocation68_spill] sm:$0xff]  ;;  %v5459_v50 = vld [vmem:[#allocation73_spill] sm:$0xff]  ;;  %v5460_v51 = vld [vmem:[#allocation74_spill] sm:$0xff] }
 0x132   : > { %1216 = vmatpush.msra.mxu3 %v5417_v58  ;;  %1178 = vmatpush.msra.mxu1 %v5423_v14  ;;  %v5458_v49 = vld [vmem:[#allocation72_spill] sm:$0xff]  ;;  %v5461_v52 = vld [vmem:[#allocation75_spill] sm:$0xff]  ;;  %v5468_v10 = vld [vmem:[#allocation82_spill] sm:$0xff] }
 0x133   : > { %1196 = vmatpush.msra.mxu2 %v5416_v5  ;;  %1157 = vmatpush.msra.mxu0 %v5418_v9  ;;  %v5462_v6 = vld [vmem:[#allocation76_spill] sm:$0xff]  ;;  %v5465_v5 = vld [vmem:[#allocation79_spill] sm:$0xff]  ;;  %v5467_v9 = vld [vmem:[#allocation81_spill] sm:$0xff] }
 0x134   : > { %v2539_v63 = vpop.eup %2538  ;;  %1217 = vmatpush.msra.mxu3 %v5421_v12  ;;  %v5466_v58 = vld [vmem:[#allocation80_spill] sm:$0xff]  ;;  %v5472_v14 = vld [vmem:[#allocation86_spill] sm:$0xff] }
 0x135   : > { %v3923_v3 = vmul.f32 %v2539_v63, %v993_v59  ;;  %1197 = vmatpush.msra.mxu2 %v5420_v11  ;;  %1158 = vmatpush.msra.mxu0 %v5422_v13  ;;  %v5463_v63 = vld [vmem:[#allocation77_spill] sm:$0xff]  ;;  %v5464_v59 = vld [vmem:[#allocation78_spill] sm:$0xff]  ;;  %v5469_v11 = vld [vmem:[#allocation83_spill] sm:$0xff] }
 0x136   : > { %1218 = vmatpush.msra.mxu3 %v5425_v16  ;;  %v5470_v12 = vld [vmem:[#allocation84_spill] sm:$0xff]  ;;  %v5471_v13 = vld [vmem:[#allocation85_spill] sm:$0xff] }
 0x137   : > { %1016 = vmatmul.f32.vlgmr.msrb.gmra.mxu0 %v3923_v3  ;;  %1036 = vmatmul.f32.vlgmr.msrb.gmra.mxu1 %v3923_v3  ;;  %v5474_v16 = vld [vmem:[#allocation88_spill] sm:$0xff] }
 0x138   : > { %1056 = vmatmul.f32.vlgmr.msrb.gmra.mxu2 %v3923_v3  ;;  %1076 = vmatmul.f32.vlgmr.msrb.gmra.mxu3 %v3923_v3 }
 0x139   : > { %1198 = vmatpush.msra.mxu2 %v5424_v15  ;;  %1227 = vmatpush.msrb.mxu0 %v5426_v17  ;;  %v5473_v15 = vld [vmem:[#allocation87_spill] sm:$0xff]  ;;  %v5475_v17 = vld [vmem:[#allocation89_spill] sm:$0xff] }
 0x13a   : > { %1247 = vmatpush.msrb.mxu1 %v5427_v18  ;;  %1287 = vmatpush.msrb.mxu3 %v5429_v20  ;;  %v5476_v18 = vld [vmem:[#allocation90_spill] sm:$0xff]  ;;  %v5478_v20 = vld [vmem:[#allocation92_spill] sm:$0xff] }
 0x13b   : > { %1267 = vmatpush.msrb.mxu2 %v5428_v19  ;;  %1228 = vmatpush.msrb.mxu0 %v5430_v21  ;;  %v5477_v19 = vld [vmem:[#allocation91_spill] sm:$0xff]  ;;  %v5479_v21 = vld [vmem:[#allocation93_spill] sm:$0xff] }
 0x13c   : > { %1248 = vmatpush.msrb.mxu1 %v5431_v22  ;;  %1288 = vmatpush.msrb.mxu3 %v5433_v24  ;;  %v5480_v22 = vld [vmem:[#allocation94_spill] sm:$0xff]  ;;  %v5482_v24 = vld [vmem:[#allocation96_spill] sm:$0xff] }
 0x13d   : > { %1268 = vmatpush.msrb.mxu2 %v5432_v23  ;;  %1229 = vmatpush.msrb.mxu0 %v5434_v25  ;;  %v5481_v23 = vld [vmem:[#allocation95_spill] sm:$0xff]  ;;  %v5483_v25 = vld [vmem:[#allocation97_spill] sm:$0xff] }
 0x13e   : > { %1249 = vmatpush.msrb.mxu1 %v5435_v26  ;;  %1289 = vmatpush.msrb.mxu3 %v5437_v28  ;;  %v5484_v26 = vld [vmem:[#allocation98_spill] sm:$0xff]  ;;  %v5486_v28 = vld [vmem:[#allocation100_spill] sm:$0xff] }
 0x13f   : > { %1269 = vmatpush.msrb.mxu2 %v5436_v27  ;;  %1230 = vmatpush.msrb.mxu0 %v5438_v29  ;;  %v5485_v27 = vld [vmem:[#allocation99_spill] sm:$0xff]  ;;  %v5487_v29 = vld [vmem:[#allocation101_spill] sm:$0xff] }
 0x140   : > { %1250 = vmatpush.msrb.mxu1 %v5439_v30  ;;  %1290 = vmatpush.msrb.mxu3 %v5441_v32  ;;  %v5488_v30 = vld [vmem:[#allocation102_spill] sm:$0xff]  ;;  %v563_v32 = vld [vmem:[%s4974_s6] sm:$0xf] }
 0x141   : > { %1270 = vmatpush.msrb.mxu2 %v5440_v31  ;;  %1231 = vmatpush.msrb.mxu0 %v5442_v33  ;;  %v5489_v31 = vld [vmem:[#allocation103_spill] sm:$0xff]  ;;  %v4004_v33 = vperm.slane %v563_v32, 0 }
 0x142   : > { %1251 = vmatpush.msrb.mxu1 %v5443_v34  ;;  %1291 = vmatpush.msrb.mxu3 %v5445_v36  ;;  %v4006_v34 = vperm.slane %v563_v32, 1  ;;  %v5492_v36 = vld [vmem:[#allocation132_spill] sm:$0xff] }
 0x143   : > { %1271 = vmatpush.msrb.mxu2 %v5444_v35  ;;  %1232 = vmatpush.msrb.mxu0 %v5446_v62  ;;  %5490 = vst [vmem:[#allocation20_spill] sm:$0xff] %v4004_v33  ;;  %v787_v35 = vadd.f32 %v3672_v7, %v4004_v33 }
 0x144   : > { %1252 = vmatpush.msrb.mxu1 %v5447_v37  ;;  %1292 = vmatpush.msrb.mxu3 %v5449_v40  ;;  %5491 = vst [vmem:[#allocation21_spill] sm:$0xff] %v4006_v34  ;;  %v807_v62 = vadd.f32 %v5492_v36, %v4006_v34 }
 0x145   : > { %1272 = vmatpush.msrb.mxu2 %v5448_v39  ;;  %1233 = vmatpush.msrb.mxu0 %v5450_v41 }
 0x146   : > { %1253 = vmatpush.msrb.mxu1 %v5451_v42  ;;  %1293 = vmatpush.msrb.mxu3 %v5453_v44  ;;  %v4012_v42 = vperm.slane %v563_v32, 3 }
 0x147   : > { %1273 = vmatpush.msrb.mxu2 %v5452_v43  ;;  %1234 = vmatpush.msrb.mxu0 %v5454_v45  ;;  %v5494_v45 = vld [vmem:[#allocation148_spill] sm:$0xff] }
 0x148   : > { %1254 = vmatpush.msrb.mxu1 %v5455_v46  ;;  %1294 = vmatpush.msrb.mxu3 %v5457_v48  ;;  %5493 = vst [vmem:[#allocation22_spill] sm:$0xff] %v4012_v42  ;;  %v847_v46 = vadd.f32 %v5494_v45, %v4012_v42 }
 0x149   : > { %1274 = vmatpush.msrb.mxu2 %v5456_v47  ;;  %1235 = vmatpush.msrb.mxu0 %v5458_v49 }
 0x14a   : > { %1255 = vmatpush.msrb.mxu1 %v5459_v50  ;;  %1295 = vmatpush.msrb.mxu3 %v5461_v52 }
 0x14b   : > { %1275 = vmatpush.msrb.mxu2 %v5460_v51  ;;  %1236 = vmatpush.msrb.mxu0 %v5462_v6  ;;  %v4016_v6 = vperm.slane %v563_v32, 2 }
 0x14c   : > { %1256 = vmatpush.msrb.mxu1 %v5463_v63  ;;  %1296 = vmatpush.msrb.mxu3 %v5465_v5 }
 0x14d   : > { %1276 = vmatpush.msrb.mxu2 %v5464_v59  ;;  %1237 = vmatpush.msrb.mxu0 %v5466_v58  ;;  %5495 = vst [vmem:[#allocation23_spill] sm:$0xff] %v4016_v6  ;;  %v827_v5 = vadd.f32 %v3788_v1, %v4016_v6 }
 0x14e   : > { %1257 = vmatpush.msrb.mxu1 %v5467_v9  ;;  %1297 = vmatpush.msrb.mxu3 %v5469_v11 }
 0x14f   : > { %1277 = vmatpush.msrb.mxu2 %v5468_v10  ;;  %1238 = vmatpush.msrb.mxu0 %v5470_v12 }
 0x150   : > { %1258 = vmatpush.msrb.mxu1 %v5471_v13  ;;  %1298 = vmatpush.msrb.mxu3 %v5473_v15 }
 0x151   : > { %1278 = vmatpush.msrb.mxu2 %v5472_v14  ;;  %1239 = vmatpush.msrb.mxu0 %v5474_v16 }
 0x152   : > { %1259 = vmatpush.msrb.mxu1 %v5475_v17  ;;  %1299 = vmatpush.msrb.mxu3 %v5477_v19 }
 0x153   : > { %1279 = vmatpush.msrb.mxu2 %v5476_v18  ;;  %1240 = vmatpush.msrb.mxu0 %v5478_v20 }
 0x154   : > { %1260 = vmatpush.msrb.mxu1 %v5479_v21  ;;  %1300 = vmatpush.msrb.mxu3 %v5481_v23 }
 0x155   : > { %1280 = vmatpush.msrb.mxu2 %v5480_v22  ;;  %1241 = vmatpush.msrb.mxu0 %v5482_v24 }
 0x156   : > { %1261 = vmatpush.msrb.mxu1 %v5483_v25  ;;  %1301 = vmatpush.msrb.mxu3 %v5485_v27  ;;  %v768_v27 = vld [vmem:[#allocation5] sm:$0xff] }
 0x157   : > { %1281 = vmatpush.msrb.mxu2 %v5484_v26  ;;  %1242 = vmatpush.msrb.mxu0 %v5486_v28 }
 0x158   : > { %1262 = vmatpush.msrb.mxu1 %v5487_v29  ;;  %1302 = vmatpush.msrb.mxu3 %v5489_v31 }
 0x159   : > { %1282 = vmatpush.msrb.mxu2 %v5488_v30 }
 0x1b4   : > { %v1017_v37 = vpop.f32.mrf.mxu0  ;;  %v1037_v39 = vpop.f32.mrf.mxu1 }
 0x1b5   : > { %v1018_v40 = vadd.f32 %v1017_v37, %v787_v35  ;;  %v1038_v41 = vadd.f32 %v1037_v39, %v807_v62 }
 0x1b7   : > { %v2437_v43 = vmul.f32 -1.442695, %v1018_v40  ;;  %v2438_v44 = vmul.f32 -1.442695, %v1038_v41 }
 0x1b9   : > { %2540 = vpow2.f32 %v2437_v43 }
 0x1ba   : > { %2542 = vpow2.f32 %v2438_v44 }
 0x1bb   : > { %v1077_v47 = vpop.f32.mrf.mxu3  ;;  %v1057_v63 = vpop.f32.mrf.mxu2 }
 0x1bc   : > { %v1078_v48 = vadd.f32 %v1077_v47, %v847_v46  ;;  %v1058_v10 = vadd.f32 %v1057_v63, %v827_v5  ;;  %v5501_v63 = vld [vmem:[#allocation119_spill] sm:$0xff]  ;;  %v5503_v5 = vld [vmem:[#allocation121_spill] sm:$0xff] }
 0x1be   : > { %v2439_v49 = vmul.f32 -1.442695, %v1078_v48 }
 0x1bf   : > { %v2541_v7 = vpop.eup %2540 }
 0x1c0   : > { %v2543_v50 = vpop.eup %2542  ;;  %v1083_v51 = vadd.f32 1.0, %v2541_v7  ;;  %2544 = vpow2.f32 %v2439_v49  ;;  %v5496_v49 = vld [vmem:[#allocation114_spill] sm:$0xff]  ;;  %v5497_v7 = vld [vmem:[#allocation115_spill] sm:$0xff] }
 0x1c1   : > { %v1102_v52 = vadd.f32 1.0, %v2543_v50  ;;  %v5498_v50 = vld [vmem:[#allocation116_spill] sm:$0xff] }
 0x1c2   : > { %2546 = vrcp.f32 %v1083_v51  ;;  %v1095_v16 = vand.u32 2147483648, %v1083_v51  ;;  %v1093_v19 = vand.u32 2147483647, %v1083_v51  ;;  %vm1089_vm15 = vweird.f32 %v1083_v51 }
 0x1c3   : > { %2548 = vrcp.f32 %v1102_v52  ;;  %v1114_v17 = vand.u32 2147483648, %v1102_v52  ;;  %v1112_v21 = vand.u32 2147483647, %v1102_v52  ;;  %vm1108_vm0 = vweird.f32 %v1102_v52 }
 0x1c4   : > { %v1096_v23 = vor.u32 1.1754944e-38, %v1095_v16  ;;  %vm1094_vm3 = vcmp.eq.f32.partialorder %v1093_v19, 8.507059e+37  ;;  %v5512_v16 = vld [vmem:[#allocation133_spill] sm:$0xff]  ;;  %v5515_v19 = vld [vmem:[#allocation136_spill] sm:$0xff] }
 0x1c5   : > { %v1115_v26 = vor.u32 1.1754944e-38, %v1114_v17  ;;  %vm1113_vm4 = vcmp.eq.f32.partialorder %v1112_v21, 8.507059e+37  ;;  %v5513_v17 = vld [vmem:[#allocation134_spill] sm:$0xff] }
 0x1c6   : > { %v2545_v59 = vpop.eup %2544  ;;  %v5517_v21 = vld [vmem:[#allocation138_spill] sm:$0xff] }
 0x1c7   : > { %v1122_v58 = vadd.f32 1.0, %v2545_v59  ;;  %v5502_v59 = vld [vmem:[#allocation120_spill] sm:$0xff] }
 0x1c8   : > { %v2547_v9 = vpop.eup %2546 }
 0x1c9   : > { %v2549_v11 = vpop.eup %2548  ;;  %v1085_v12 = vmul.f32 %v2547_v9, %v1083_v51  ;;  %2550 = vrcp.f32 %v1122_v58  ;;  %vm1090_vm13 = vweird.f32 %v2547_v9  ;;  %v1134_v41 = vand.u32 2147483648, %v1122_v58  ;;  %v5499_v51 = vld [vmem:[#allocation117_spill] sm:$0xff] }
 0x1ca   : > { %v1104_v13 = vmul.f32 %v2549_v11, %v1102_v52  ;;  %2552 = vtanh.f32 %v1058_v10  ;;  %vm1109_vm14 = vweird.f32 %v2549_v11  ;;  %vm1091_vm1 = vmor %vm1089_vm15, %vm1090_vm13  ;;  %vm1128_vm6 = vweird.f32 %v1122_v58  ;;  %v5500_v52 = vld [vmem:[#allocation118_spill] sm:$0xff]  ;;  %v5506_v10 = vld [vmem:[#allocation124_spill] sm:$0xff] }
 0x1cb   : > { %v1086_v14 = vsub.f32 1.0, %v1085_v12  ;;  %vm1110_vm2 = vmor %vm1108_vm0, %vm1109_vm14  ;;  %v1132_v43 = vand.u32 2147483647, %v1122_v58  ;;  %v1135_v45 = vor.u32 1.1754944e-38, %v1134_v41  ;;  %v5508_v12 = vld [vmem:[#allocation128_spill] sm:$0xff]  ;;  %v5536_v41 = vld [vmem:[#allocation158_spill] sm:$0xff] }
 0x1cc   : > { %v1105_v15 = vsub.f32 1.0, %v1104_v13  ;;  %v5509_v13 = vld [vmem:[#allocation129_spill] sm:$0xff] }
 0x1cd   : > { %v1087_v18 = vmul.f32 %v2547_v9, %v1086_v14  ;;  %vm1133_vm8 = vcmp.eq.f32.partialorder %v1132_v43, 8.507059e+37  ;;  %v5510_v14 = vld [vmem:[#allocation130_spill] sm:$0xff]  ;;  %v5537_v43 = vld [vmem:[#allocation159_spill] sm:$0xff] }
 0x1ce   : > { %v1106_v20 = vmul.f32 %v2549_v11, %v1105_v15  ;;  %v5511_v15 = vld [vmem:[#allocation131_spill] sm:$0xff] }
 0x1cf   : > { %v2551_v22 = vpop.eup %2550  ;;  %v1088_v1 = vadd.f32 %v2547_v9, %v1087_v18  ;;  %v5514_v18 = vld [vmem:[#allocation135_spill] sm:$0xff] }
 0x1d0   : > { %v1107_v24 = vadd.f32 %v2549_v11, %v1106_v20  ;;  %v1124_v25 = vmul.f32 %v2551_v22, %v1122_v58  ;;  %v2553_v29 = vpop.eup %2552  ;;  %vm1129_vm5 = vweird.f32 %v2551_v22  ;;  %v5504_v58 = vld [vmem:[#allocation122_spill] sm:$0xff]  ;;  %v5516_v20 = vld [vmem:[#allocation137_spill] sm:$0xff] }
 0x1d1   : > { %v1092_v28 = vsel %vm1091_vm1, %v2547_v9, %v1088_v1  ;;  %vm1130_vm7 = vmor %vm1128_vm6, %vm1129_vm5  ;;  %v5505_v9 = vld [vmem:[#allocation123_spill] sm:$0xff]  ;;  %v5520_v1 = vld [vmem:[#allocation141_spill] sm:$0xff] }
 0x1d2   : > { %v1097_v30 = vsel %vm1094_vm3, %v1096_v23, %v1092_v28  ;;  %v1111_v31 = vsel %vm1110_vm2, %v2549_v11, %v1107_v24  ;;  %v1125_v32 = vsub.f32 1.0, %v1124_v25  ;;  %v5507_v11 = vld [vmem:[#allocation125_spill] sm:$0xff]  ;;  %v5521_v23 = vld [vmem:[#allocation142_spill] sm:$0xff]  ;;  %v5522_v24 = vld [vmem:[#allocation143_spill] sm:$0xff] }
 0x1d3   : > { %v1116_v35 = vsel %vm1113_vm4, %v1115_v26, %v1111_v31  ;;  %v1139_v36 = vmul.f32 %v2553_v29, %v1097_v30  ;;  %v5523_v25 = vld [vmem:[#allocation144_spill] sm:$0xff]  ;;  %v5524_v26 = vld [vmem:[#allocation145_spill] sm:$0xff]  ;;  %v5526_v28 = vld [vmem:[#allocation147_spill] sm:$0xff] }
 0x1d4   : > { %v1138_v62 = vmul.f32 %v1116_v35, %v768_v27  ;;  %v1126_v37 = vmul.f32 %v2551_v22, %v1125_v32  ;;  %v5525_v27 = vld [vmem:[#allocation146_spill] sm:$0xff]  ;;  %v5527_v29 = vld [vmem:[#allocation149_spill] sm:$0xff]  ;;  %v5529_v31 = vld [vmem:[#allocation151_spill] sm:$0xff] }
 0x1d5   : > { %v5528_v30 = vld [vmem:[#allocation150_spill] sm:$0xff]  ;;  %v5530_v32 = vld [vmem:[#allocation152_spill] sm:$0xff]  ;;  %v5531_v35 = vld [vmem:[#allocation153_spill] sm:$0xff] }
 0x1d6   : > { %v4020_v39 = vadd.f32 %v1139_v36, %v1138_v62  ;;  %v1127_v40 = vadd.f32 %v2551_v22, %v1126_v37  ;;  %v5532_v36 = vld [vmem:[#allocation154_spill] sm:$0xff]  ;;  %v5533_v62 = vld [vmem:[#allocation155_spill] sm:$0xff]  ;;  %v5534_v37 = vld [vmem:[#allocation156_spill] sm:$0xff] }
 0x1d8   : > { %2554 = vtanh.f32 %v4020_v39  ;;  %v1131_v44 = vsel %vm1130_vm7, %v2551_v22, %v1127_v40  ;;  %v5519_v22 = vld [vmem:[#allocation140_spill] sm:$0xff]  ;;  %v5535_v40 = vld [vmem:[#allocation157_spill] sm:$0xff] }
 0x1d9   : > { %v1136_v47 = vsel %vm1133_vm8, %v1135_v45, %v1131_v44  ;;  %v5538_v44 = vld [vmem:[#allocation160_spill] sm:$0xff]  ;;  %v5543_v45 = vld [vmem:[#allocation165_spill] sm:$0xff] }
 0x1de   : > { %v2555_v46 = vpop.eup %2554 }
 0x1df   : > { %v1142_v48 = vmul.f32 %v2555_v46, %v1136_v47  ;;  %v5544_v46 = vld [vmem:[#allocation166_spill] sm:$0xff]  ;;  %v5545_v47 = vld [vmem:[#allocation167_spill] sm:$0xff] }
 0x1e1   : > { %1159 = vmatmul.f32.vlgmr.msra.gmra.mxu0 %v1142_v48  ;;  %1179 = vmatmul.f32.vlgmr.msra.gmra.mxu1 %v1142_v48 }
 0x1e2   : > { %1199 = vmatmul.f32.vlgmr.msra.gmra.mxu2 %v1142_v48  ;;  %1219 = vmatmul.f32.vlgmr.msra.gmra.mxu3 %v1142_v48  ;;  %v5546_v48 = vld [vmem:[#allocation168_spill] sm:$0xff] }
 0x1e3   : > { %1374 = vmatpush.msra.mxu0 %v5496_v49  ;;  %1394 = vmatpush.msra.mxu1 %v5497_v7  ;;  %v5547_v49 = vld [vmem:[#allocation169_spill] sm:$0xff]  ;;  %v5548_v7 = vld [vmem:[#allocation170_spill] sm:$0xff] }
 0x1e4   : > { %1414 = vmatpush.msra.mxu2 %v5498_v50  ;;  %1434 = vmatpush.msra.mxu3 %v5499_v51  ;;  %v4091_v50 = vld [vmem:[#allocation12 + $0x1e0] sm:$0xff]  ;;  %v4094_v51 = vld [vmem:[#allocation12 + $0x1e8] sm:$0xff] }
 0x1e5   : > { %1375 = vmatpush.msra.mxu0 %v5500_v52  ;;  %1395 = vmatpush.msra.mxu1 %v5501_v63  ;;  %v4118_v52 = vld [vmem:[#allocation12 + $0x1a8] sm:$0xff]  ;;  %v4121_v63 = vld [vmem:[#allocation12 + $0x1b0] sm:$0xff] }
 0x1e6   : > { %1415 = vmatpush.msra.mxu2 %v5502_v59  ;;  %1435 = vmatpush.msra.mxu3 %v5503_v5  ;;  %v4124_v59 = vld [vmem:[#allocation12 + $0x1b8] sm:$0xff]  ;;  %v4127_v5 = vld [vmem:[#allocation12 + $0x180] sm:$0xff] }
 0x1e7   : > { %1376 = vmatpush.msra.mxu0 %v5504_v58  ;;  %1396 = vmatpush.msra.mxu1 %v5505_v9  ;;  %v4130_v58 = vld [vmem:[#allocation12 + $0x188] sm:$0xff]  ;;  %v4133_v9 = vld [vmem:[#allocation12 + $0x190] sm:$0xff] }
 0x1e8   : > { %1416 = vmatpush.msra.mxu2 %v5506_v10  ;;  %1436 = vmatpush.msra.mxu3 %v5507_v11  ;;  %v4136_v10 = vld [vmem:[#allocation12 + $0x198] sm:$0xff]  ;;  %v4139_v11 = vld [vmem:[#allocation12 + $0x160] sm:$0xff] }
 0x1e9   : > { %1243 = vmatmul.f32.vlgmr.msrb.gmra.mxu0 %v3923_v3  ;;  %1263 = vmatmul.f32.vlgmr.msrb.gmra.mxu1 %v3923_v3 }
 0x1ea   : > { %1283 = vmatmul.f32.vlgmr.msrb.gmra.mxu2 %v3923_v3  ;;  %1303 = vmatmul.f32.vlgmr.msrb.gmra.mxu3 %v3923_v3  ;;  %v5518_v3 = vld [vmem:[#allocation139_spill] sm:$0xff] }
 0x1eb   : > { %1377 = vmatpush.msra.mxu0 %v5508_v12  ;;  %1397 = vmatpush.msra.mxu1 %v5509_v13  ;;  %v4142_v12 = vld [vmem:[#allocation12 + $0x168] sm:$0xff]  ;;  %v4145_v13 = vld [vmem:[#allocation12 + $0x170] sm:$0xff] }
 0x1ec   : > { %1417 = vmatpush.msra.mxu2 %v5510_v14  ;;  %1437 = vmatpush.msra.mxu3 %v5511_v15  ;;  %v4148_v14 = vld [vmem:[#allocation12 + $0x178] sm:$0xff]  ;;  %v4151_v15 = vld [vmem:[#allocation12 + $0x140] sm:$0xff] }
 0x1ed   : > { %1378 = vmatpush.msra.mxu0 %v5512_v16  ;;  %1398 = vmatpush.msra.mxu1 %v5513_v17  ;;  %v4154_v16 = vld [vmem:[#allocation12 + $0x148] sm:$0xff]  ;;  %v4157_v17 = vld [vmem:[#allocation12 + $0x150] sm:$0xff] }
 0x1ee   : > { %1418 = vmatpush.msra.mxu2 %v5514_v18  ;;  %1438 = vmatpush.msra.mxu3 %v5515_v19  ;;  %v4160_v18 = vld [vmem:[#allocation12 + $0x158] sm:$0xff]  ;;  %v4163_v19 = vld [vmem:[#allocation12 + $0x120] sm:$0xff] }
 0x1ef   : > { %1379 = vmatpush.msra.mxu0 %v5516_v20  ;;  %1399 = vmatpush.msra.mxu1 %v5517_v21  ;;  %v4166_v20 = vld [vmem:[#allocation12 + $0x128] sm:$0xff]  ;;  %v4169_v21 = vld [vmem:[#allocation12 + $0x130] sm:$0xff] }
 0x1f0   : > { %1419 = vmatpush.msra.mxu2 %v5518_v3  ;;  %1439 = vmatpush.msra.mxu3 %v5519_v22  ;;  %v4172_v3 = vld [vmem:[#allocation12 + $0x138] sm:$0xff]  ;;  %v4175_v22 = vld [vmem:[#allocation12 + $0x100] sm:$0xff] }
 0x1f1   : > { %1380 = vmatpush.msra.mxu0 %v5520_v1  ;;  %1400 = vmatpush.msra.mxu1 %v5521_v23  ;;  %v4178_v1 = vld [vmem:[#allocation12 + $0x108] sm:$0xff]  ;;  %v4181_v23 = vld [vmem:[#allocation12 + $0x110] sm:$0xff] }
 0x1f2   : > { %1420 = vmatpush.msra.mxu2 %v5522_v24  ;;  %1440 = vmatpush.msra.mxu3 %v5523_v25  ;;  %5549 = vst [vmem:[#allocation24_spill] sm:$0xff] %v4178_v1  ;;  %v4184_v24 = vld [vmem:[#allocation12 + $0x118] sm:$0xff]  ;;  %v4187_v25 = vld [vmem:[#allocation12 + $0xe0] sm:$0xff] }
 0x1f3   : > { %1381 = vmatpush.msra.mxu0 %v5524_v26  ;;  %1401 = vmatpush.msra.mxu1 %v5525_v27  ;;  %5550 = vst [vmem:[#allocation25_spill] sm:$0xff] %v4181_v23  ;;  %v4190_v26 = vld [vmem:[#allocation12 + $0xe8] sm:$0xff]  ;;  %v4193_v27 = vld [vmem:[#allocation12 + $0xf0] sm:$0xff] }
 0x1f4   : > { %1421 = vmatpush.msra.mxu2 %v5526_v28  ;;  %1441 = vmatpush.msra.mxu3 %v5527_v29  ;;  %5551 = vst [vmem:[#allocation26_spill] sm:$0xff] %v4184_v24  ;;  %v4196_v28 = vld [vmem:[#allocation12 + $0xf8] sm:$0xff]  ;;  %v4199_v29 = vld [vmem:[#allocation12 + $0xc0] sm:$0xff] }
 0x1f5   : > { %1382 = vmatpush.msra.mxu0 %v5528_v30  ;;  %1402 = vmatpush.msra.mxu1 %v5529_v31  ;;  %5552 = vst [vmem:[#allocation27_spill] sm:$0xff] %v4187_v25  ;;  %v4202_v30 = vld [vmem:[#allocation12 + $0xc8] sm:$0xff]  ;;  %v4205_v31 = vld [vmem:[#allocation12 + $0xd0] sm:$0xff] }
 0x1f6   : > { %1422 = vmatpush.msra.mxu2 %v5530_v32  ;;  %1442 = vmatpush.msra.mxu3 %v5531_v35  ;;  %5553 = vst [vmem:[#allocation28_spill] sm:$0xff] %v4190_v26  ;;  %v4208_v32 = vld [vmem:[#allocation12 + $0xd8] sm:$0xff]  ;;  %v4211_v35 = vld [vmem:[#allocation12 + $0xa0] sm:$0xff] }
 0x1f7   : > { %1383 = vmatpush.msra.mxu0 %v3744_v56  ;;  %1403 = vmatpush.msra.mxu1 %v3746_v57  ;;  %v5539_v56 = vld [vmem:[#allocation161_spill] sm:$0xff]  ;;  %v5540_v57 = vld [vmem:[#allocation162_spill] sm:$0xff]  ;;  %5554 = vst [vmem:[#allocation29_spill] sm:$0xff] %v4193_v27 }
 0x1f8   : > { %1423 = vmatpush.msra.mxu2 %v3748_v2  ;;  %1443 = vmatpush.msra.mxu3 %v3752_v53  ;;  %v5541_v2 = vld [vmem:[#allocation163_spill] sm:$0xff]  ;;  %v5542_v53 = vld [vmem:[#allocation164_spill] sm:$0xff]  ;;  %5555 = vst [vmem:[#allocation30_spill] sm:$0xff] %v4196_v28 }
 0x1f9   : > { %1384 = vmatpush.msra.mxu0 %v5532_v36  ;;  %1404 = vmatpush.msra.mxu1 %v5533_v62  ;;  %5556 = vst [vmem:[#allocation31_spill] sm:$0xff] %v4199_v29  ;;  %v4214_v36 = vld [vmem:[#allocation12 + $0xa8] sm:$0xff]  ;;  %v4217_v62 = vld [vmem:[#allocation12 + $0xb0] sm:$0xff] }
 0x1fa   : > { %1424 = vmatpush.msra.mxu2 %v5534_v37  ;;  %1444 = vmatpush.msra.mxu3 %v5535_v40  ;;  %5557 = vst [vmem:[#allocation32_spill] sm:$0xff] %v4202_v30  ;;  %v4220_v37 = vld [vmem:[#allocation12 + $0xb8] sm:$0xff]  ;;  %v4223_v40 = vld [vmem:[#allocation12 + $0x80] sm:$0xff] }
 0x1fb   : > { %1385 = vmatpush.msra.mxu0 %v5536_v41  ;;  %1405 = vmatpush.msra.mxu1 %v5537_v43  ;;  %5558 = vst [vmem:[#allocation33_spill] sm:$0xff] %v4205_v31  ;;  %v4226_v41 = vld [vmem:[#allocation12 + $0x88] sm:$0xff]  ;;  %v4229_v43 = vld [vmem:[#allocation12 + $0x90] sm:$0xff] }
 0x1fc   : > { %1425 = vmatpush.msra.mxu2 %v5538_v44  ;;  %1445 = vmatpush.msra.mxu3 %v5539_v56  ;;  %5559 = vst [vmem:[#allocation34_spill] sm:$0xff] %v4208_v32  ;;  %v4232_v44 = vld [vmem:[#allocation12 + $0x98] sm:$0xff]  ;;  %v4235_v56 = vld [vmem:[#allocation12 + $0x60] sm:$0xff] }
 0x1fd   : > { %1386 = vmatpush.msra.mxu0 %v5540_v57  ;;  %1406 = vmatpush.msra.mxu1 %v5541_v2  ;;  %5560 = vst [vmem:[#allocation35_spill] sm:$0xff] %v4211_v35  ;;  %v4238_v57 = vld [vmem:[#allocation12 + $0x68] sm:$0xff]  ;;  %v4241_v2 = vld [vmem:[#allocation12 + $0x70] sm:$0xff] }
 0x1fe   : > { %1426 = vmatpush.msra.mxu2 %v5542_v53  ;;  %1446 = vmatpush.msra.mxu3 %v5543_v45  ;;  %5561 = vst [vmem:[#allocation36_spill] sm:$0xff] %v4214_v36  ;;  %v4244_v53 = vld [vmem:[#allocation12 + $0x78] sm:$0xff]  ;;  %v4247_v45 = vld [vmem:[#allocation12 + $0x40] sm:$0xff] }
 0x1ff   : > { %1387 = vmatpush.msra.mxu0 %v5544_v46  ;;  %1407 = vmatpush.msra.mxu1 %v5545_v47  ;;  %5562 = vst [vmem:[#allocation37_spill] sm:$0xff] %v4217_v62  ;;  %v4250_v46 = vld [vmem:[#allocation12 + $0x48] sm:$0xff]  ;;  %v4253_v47 = vld [vmem:[#allocation12 + $0x50] sm:$0xff] }
 0x200   : > { %1427 = vmatpush.msra.mxu2 %v5546_v48  ;;  %1447 = vmatpush.msra.mxu3 %v5547_v49  ;;  %5563 = vst [vmem:[#allocation38_spill] sm:$0xff] %v4220_v37  ;;  %v4256_v48 = vld [vmem:[#allocation12 + $0x58] sm:$0xff]  ;;  %v4259_v49 = vld [vmem:[#allocation12 + $0x20] sm:$0xff] }
 0x201   : > { %1388 = vmatpush.msra.mxu0 %v5548_v7  ;;  %1408 = vmatpush.msra.mxu1 %v3810_v8  ;;  %v4097_v8 = vld [vmem:[#allocation12 + $0x1f0] sm:$0xff]  ;;  %5564 = vst [vmem:[#allocation39_spill] sm:$0xff] %v4223_v40  ;;  %v4262_v7 = vld [vmem:[#allocation12 + $0x28] sm:$0xff] }
 0x202   : > { %1428 = vmatpush.msra.mxu2 %v3812_v55  ;;  %1448 = vmatpush.msra.mxu3 %v3816_v0  ;;  %v4100_v55 = vld [vmem:[#allocation12 + $0x1f8] sm:$0xff]  ;;  %v4103_v0 = vld [vmem:[#allocation12 + $0x1c0] sm:$0xff]  ;;  %5565 = vst [vmem:[#allocation40_spill] sm:$0xff] %v4226_v41 }
 0x203   : > { %1389 = vmatpush.msra.mxu0 %v3818_v4  ;;  %1409 = vmatpush.msra.mxu1 %v3820_v61  ;;  %v4112_v4 = vld [vmem:[#allocation12 + $0x1d8] sm:$0xff]  ;;  %v4115_v61 = vld [vmem:[#allocation12 + $0x1a0] sm:$0xff]  ;;  %5566 = vst [vmem:[#allocation41_spill] sm:$0xff] %v4229_v43 }
 0x204   : > { %1429 = vmatpush.msra.mxu2 %v3826_v54  ;;  %1449 = vmatpush.msra.mxu3 %v3828_v60  ;;  %v4106_v60 = vld [vmem:[#allocation12 + $0x1c8] sm:$0xff]  ;;  %v4109_v54 = vld [vmem:[#allocation12 + $0x1d0] sm:$0xff]  ;;  %5567 = vst [vmem:[#allocation42_spill] sm:$0xff] %v4232_v44 }
 0x205   : > { %1517 = vmatpush.msrb.mxu0 %v4091_v50  ;;  %1537 = vmatpush.msrb.mxu1 %v4094_v51  ;;  %5568 = vst [vmem:[#allocation43_spill] sm:$0xff] %v4235_v56 }
 0x206   : > { %1557 = vmatpush.msrb.mxu2 %v4097_v8  ;;  %1577 = vmatpush.msrb.mxu3 %v4100_v55  ;;  %5569 = vst [vmem:[#allocation44_spill] sm:$0xff] %v4238_v57 }
 0x207   : > { %1518 = vmatpush.msrb.mxu0 %v4103_v0  ;;  %1538 = vmatpush.msrb.mxu1 %v4106_v60  ;;  %5570 = vst [vmem:[#allocation45_spill] sm:$0xff] %v4241_v2 }
 0x208   : > { %1558 = vmatpush.msrb.mxu2 %v4109_v54  ;;  %1578 = vmatpush.msrb.mxu3 %v4112_v4  ;;  %5571 = vst [vmem:[#allocation46_spill] sm:$0xff] %v4244_v53 }
 0x209   : > { %1519 = vmatpush.msrb.mxu0 %v4115_v61  ;;  %1539 = vmatpush.msrb.mxu1 %v4118_v52  ;;  %5572 = vst [vmem:[#allocation47_spill] sm:$0xff] %v4247_v45 }
 0x20a   : > { %1559 = vmatpush.msrb.mxu2 %v4121_v63  ;;  %1579 = vmatpush.msrb.mxu3 %v4124_v59  ;;  %5573 = vst [vmem:[#allocation48_spill] sm:$0xff] %v4250_v46 }
 0x20b   : > { %1520 = vmatpush.msrb.mxu0 %v4127_v5  ;;  %1540 = vmatpush.msrb.mxu1 %v4130_v58  ;;  %5574 = vst [vmem:[#allocation49_spill] sm:$0xff] %v4253_v47 }
 0x20c   : > { %1560 = vmatpush.msrb.mxu2 %v4133_v9  ;;  %1580 = vmatpush.msrb.mxu3 %v4136_v10  ;;  %5575 = vst [vmem:[#allocation50_spill] sm:$0xff] %v4256_v48 }
 0x20d   : > { %1521 = vmatpush.msrb.mxu0 %v4139_v11  ;;  %1541 = vmatpush.msrb.mxu1 %v4142_v12  ;;  %5576 = vst [vmem:[#allocation51_spill] sm:$0xff] %v4259_v49 }
 0x20e   : > { %1561 = vmatpush.msrb.mxu2 %v4145_v13  ;;  %1581 = vmatpush.msrb.mxu3 %v4148_v14  ;;  %5577 = vst [vmem:[#allocation52_spill] sm:$0xff] %v4262_v7 }
 0x20f   : > { %1522 = vmatpush.msrb.mxu0 %v4151_v15  ;;  %1542 = vmatpush.msrb.mxu1 %v4154_v16 }
 0x210   : > { %1562 = vmatpush.msrb.mxu2 %v4157_v17  ;;  %1582 = vmatpush.msrb.mxu3 %v4160_v18 }
 0x211   : > { %1523 = vmatpush.msrb.mxu0 %v4163_v19  ;;  %1543 = vmatpush.msrb.mxu1 %v4166_v20 }
 0x212   : > { %1563 = vmatpush.msrb.mxu2 %v4169_v21  ;;  %1583 = vmatpush.msrb.mxu3 %v4172_v3 }
 0x213   : > { %1524 = vmatpush.msrb.mxu0 %v4175_v22  ;;  %1544 = vmatpush.msrb.mxu1 %v4178_v1 }
 0x214   : > { %1564 = vmatpush.msrb.mxu2 %v4181_v23  ;;  %1584 = vmatpush.msrb.mxu3 %v4184_v24 }
 0x215   : > { %1525 = vmatpush.msrb.mxu0 %v4187_v25  ;;  %1545 = vmatpush.msrb.mxu1 %v4190_v26 }
 0x216   : > { %1565 = vmatpush.msrb.mxu2 %v4193_v27  ;;  %1585 = vmatpush.msrb.mxu3 %v4196_v28 }
 0x217   : > { %1526 = vmatpush.msrb.mxu0 %v4199_v29  ;;  %1546 = vmatpush.msrb.mxu1 %v4202_v30 }
 0x218   : > { %1566 = vmatpush.msrb.mxu2 %v4205_v31  ;;  %1586 = vmatpush.msrb.mxu3 %v4208_v32 }
 0x219   : > { %1527 = vmatpush.msrb.mxu0 %v4211_v35  ;;  %1547 = vmatpush.msrb.mxu1 %v4214_v36 }
 0x21a   : > { %1567 = vmatpush.msrb.mxu2 %v4217_v62  ;;  %1587 = vmatpush.msrb.mxu3 %v4220_v37 }
 0x21b   : > { %1528 = vmatpush.msrb.mxu0 %v4223_v40  ;;  %1548 = vmatpush.msrb.mxu1 %v4226_v41 }
 0x21c   : > { %1568 = vmatpush.msrb.mxu2 %v4229_v43  ;;  %1588 = vmatpush.msrb.mxu3 %v4232_v44  ;;  %v5585_v44 = vld [vmem:[#allocation105_spill] sm:$0xff] }
 0x21d   : > { %1529 = vmatpush.msrb.mxu0 %v4235_v56  ;;  %1549 = vmatpush.msrb.mxu1 %v4238_v57  ;;  %v5584_v57 = vld [vmem:[#allocation104_spill] sm:$0xff] }
 0x21e   : > { %1569 = vmatpush.msrb.mxu2 %v4241_v2  ;;  %1589 = vmatpush.msrb.mxu3 %v4244_v53 }
 0x21f   : > { %1530 = vmatpush.msrb.mxu0 %v4247_v45  ;;  %1550 = vmatpush.msrb.mxu1 %v4250_v46  ;;  %v4265_v45 = vld [vmem:[#allocation12 + $0x30] sm:$0xff]  ;;  %v4268_v46 = vld [vmem:[#allocation12 + $0x38] sm:$0xff] }
 0x220   : > { %1570 = vmatpush.msrb.mxu2 %v4253_v47  ;;  %1590 = vmatpush.msrb.mxu3 %v4256_v48  ;;  %5578 = vst [vmem:[#allocation53_spill] sm:$0xff] %v4265_v45  ;;  %v4271_v47 = vld [vmem:[#allocation12] sm:$0xff]  ;;  %v4274_v48 = vld [vmem:[#allocation12 + $0x8] sm:$0xff] }
 0x221   : > { %1531 = vmatpush.msrb.mxu0 %v4259_v49  ;;  %1551 = vmatpush.msrb.mxu1 %v4262_v7  ;;  %5579 = vst [vmem:[#allocation54_spill] sm:$0xff] %v4268_v46  ;;  %v4277_v49 = vld [vmem:[#allocation12 + $0x10] sm:$0xff]  ;;  %v4280_v7 = vld [vmem:[#allocation12 + $0x18] sm:$0xff] }
 0x222   : > { %1571 = vmatpush.msrb.mxu2 %v4265_v45  ;;  %1591 = vmatpush.msrb.mxu3 %v4268_v46  ;;  %5580 = vst [vmem:[#allocation55_spill] sm:$0xff] %v4271_v47 }
 0x223   : > { %1532 = vmatpush.msrb.mxu0 %v4271_v47  ;;  %5581 = vst [vmem:[#allocation56_spill] sm:$0xff] %v4274_v48  ;;  %1552 = vmatpush.msrb.mxu1 %v4274_v48 }
 0x224   : > { %5582 = vst [vmem:[#allocation57_spill] sm:$0xff] %v4277_v49  ;;  %1572 = vmatpush.msrb.mxu2 %v4277_v49  ;;  %1592 = vmatpush.msrb.mxu3 %v4280_v7 }
 0x225   : > { %5583 = vst [vmem:[#allocation58_spill] sm:$0xff] %v4280_v7  ;;  %v5586_v7 = vld [vmem:[#allocation107_spill] sm:$0xff] }
 0x25e   : > { %v4283_v45 = vpop.f32.mrf.mxu0  ;;  %v4285_v53 = vpop.f32.mrf.mxu1 }
 0x265   : > { %v4287_v46 = vpop.f32.mrf.mxu3  ;;  %v4291_v49 = vpop.f32.mrf.mxu2 }
 0x266   : > { %v1244_v2 = vpop.f32.mrf.mxu0  ;;  %v1264_v47 = vpop.f32.mrf.mxu1 }
 0x267   : > { %v1307_v56 = vadd.f32 %v1244_v2, %v5584_v57  ;;  %v1308_v48 = vadd.f32 %v1264_v47, %v5585_v44  ;;  %v5587_v47 = vld [vmem:[#allocation106_spill] sm:$0xff] }
 0x269   : > { %v2440_v43 = vmul.f32 -1.442695, %v1307_v56  ;;  %v2441_v41 = vmul.f32 -1.442695, %v1308_v48 }
 0x26b   : > { %2556 = vpow2.f32 %v2440_v43 }
 0x26c   : > { %2558 = vpow2.f32 %v2441_v41 }
 0x26d   : > { %v1304_v40 = vpop.f32.mrf.mxu3  ;;  %v1284_v57 = vpop.f32.mrf.mxu2 }
 0x26e   : > { %v1310_v37 = vadd.f32 %v1304_v40, %v5586_v7  ;;  %v1309_v43 = vadd.f32 %v1284_v57, %v5587_v47 }
 0x270   : > { %v2442_v62 = vmul.f32 -1.442695, %v1310_v37 }
 0x271   : > { %v2557_v36 = vpop.eup %2556 }
 0x272   : > { %v2559_v35 = vpop.eup %2558  ;;  %v1314_v32 = vadd.f32 1.0, %v2557_v36  ;;  %2560 = vpow2.f32 %v2442_v62 }
 0x273   : > { %v1333_v31 = vadd.f32 1.0, %v2559_v35 }
 0x274   : > { %2562 = vrcp.f32 %v1314_v32  ;;  %v1326_v37 = vand.u32 2147483648, %v1314_v32  ;;  %v1324_v35 = vand.u32 2147483647, %v1314_v32  ;;  %vm1320_vm11 = vweird.f32 %v1314_v32 }
 0x275   : > { %2564 = vrcp.f32 %v1333_v31  ;;  %v1345_v7 = vand.u32 2147483648, %v1333_v31  ;;  %v1343_v28 = vand.u32 2147483647, %v1333_v31  ;;  %vm1339_vm12 = vweird.f32 %v1333_v31 }
 0x276   : > { %v1327_v57 = vor.u32 1.1754944e-38, %v1326_v37  ;;  %vm1325_vm15 = vcmp.eq.f32.partialorder %v1324_v35, 8.507059e+37 }
 0x277   : > { %vm1344_vm0 = vcmp.eq.f32.partialorder %v1343_v28, 8.507059e+37 }
 0x278   : > { %v2561_v2 = vpop.eup %2560 }
 0x279   : > { %v1353_v44 = vadd.f32 1.0, %v2561_v2 }
 0x27a   : > { %v2563_v56 = vpop.eup %2562 }
 0x27b   : > { %v2565_v41 = vpop.eup %2564  ;;  %v1316_v48 = vmul.f32 %v2563_v56, %v1314_v32  ;;  %2566 = vrcp.f32 %v1353_v44  ;;  %vm1321_vm9 = vweird.f32 %v2563_v56  ;;  %v1365_v37 = vand.u32 2147483648, %v1353_v44 }
 0x27c   : > { %v1335_v30 = vmul.f32 %v2565_v41, %v1333_v31  ;;  %2568 = vtanh.f32 %v1309_v43  ;;  %vm1340_vm10 = vweird.f32 %v2565_v41  ;;  %vm1322_vm13 = vmor %vm1320_vm11, %vm1321_vm9  ;;  %vm1359_vm2 = vweird.f32 %v1353_v44 }
 0x27d   : > { %v1317_v29 = vsub.f32 1.0, %v1316_v48  ;;  %vm1341_vm14 = vmor %vm1339_vm12, %vm1340_vm10  ;;  %v1346_v48 = vor.u32 1.1754944e-38, %v1345_v7  ;;  %v1366_v35 = vor.u32 1.1754944e-38, %v1365_v37  ;;  %v4359_v37 = vld [vmem:[#allocation7 + $0x170] sm:$0xff] }
 0x27e   : > { %v1336_v40 = vsub.f32 1.0, %v1335_v30  ;;  %5599 = vst [vmem:[#allocation70_spill] sm:$0xff] %v4359_v37 }
 0x27f   : > { %v1318_v36 = vmul.f32 %v2563_v56, %v1317_v29 }
 0x280   : > { %v1337_v62 = vmul.f32 %v2565_v41, %v1336_v40 }
 0x281   : > { %v2567_v27 = vpop.eup %2566  ;;  %v1319_v2 = vadd.f32 %v2563_v56, %v1318_v36 }
 0x282   : > { %v1338_v47 = vadd.f32 %v2565_v41, %v1337_v62  ;;  %v1355_v26 = vmul.f32 %v2567_v27, %v1353_v44  ;;  %v2569_v43 = vpop.eup %2568  ;;  %vm1360_vm1 = vweird.f32 %v2567_v27  ;;  %v4326_v62 = vld [vmem:[#allocation7 + $0x1d8] sm:$0xff] }
 0x283   : > { %v1323_v30 = vsel %vm1322_vm13, %v2563_v56, %v1319_v2  ;;  %v1363_v56 = vand.u32 2147483647, %v1353_v44  ;;  %vm1361_vm3 = vmor %vm1359_vm2, %vm1360_vm1  ;;  %v4323_v44 = vld [vmem:[#allocation7 + $0x1d0] sm:$0xff]  ;;  %5588 = vst [vmem:[#allocation59_spill] sm:$0xff] %v4326_v62  ;;  %v4329_v2 = vld [vmem:[#allocation7 + $0x1a0] sm:$0xff] }
 0x284   : > { %v1328_v25 = vsel %vm1325_vm15, %v1327_v57, %v1323_v30  ;;  %v1342_v29 = vsel %vm1341_vm14, %v2565_v41, %v1338_v47  ;;  %v1356_v24 = vsub.f32 1.0, %v1355_v26  ;;  %5589 = vst [vmem:[#allocation60_spill] sm:$0xff] %v4329_v2  ;;  %v4332_v57 = vld [vmem:[#allocation7 + $0x1a8] sm:$0xff]  ;;  %v4335_v47 = vld [vmem:[#allocation7 + $0x1b0] sm:$0xff]  ;;  %v4341_v30 = vld [vmem:[#allocation7 + $0x180] sm:$0xff] }
 0x285   : > { %v1347_v40 = vsel %vm1344_vm0, %v1346_v48, %v1342_v29  ;;  %v1370_v23 = vmul.f32 %v2569_v43, %v1328_v25  ;;  %vm1364_vm4 = vcmp.eq.f32.partialorder %v1363_v56, 8.507059e+37  ;;  %v4317_v25 = vld [vmem:[#allocation7 + $0x1c0] sm:$0xff]  ;;  %5590 = vst [vmem:[#allocation61_spill] sm:$0xff] %v4332_v57  ;;  %v4338_v48 = vld [vmem:[#allocation7 + $0x1b8] sm:$0xff]  ;;  %v4344_v43 = vld [vmem:[#allocation7 + $0x188] sm:$0xff] }
 0x286   : > { %v1369_v1 = vmul.f32 %v1347_v40, %v3896_v38  ;;  %v1357_v36 = vmul.f32 %v2567_v27, %v1356_v24  ;;  %v4305_v38 = vld [vmem:[#allocation7 + $0x1e0] sm:$0xff]  ;;  %v4314_v24 = vld [vmem:[#allocation7 + $0x1f8] sm:$0xff]  ;;  %5591 = vst [vmem:[#allocation62_spill] sm:$0xff] %v4335_v47  ;;  %v4347_v29 = vld [vmem:[#allocation7 + $0x190] sm:$0xff] }
 0x287   : > { %5592 = vst [vmem:[#allocation63_spill] sm:$0xff] %v4338_v48  ;;  %v4350_v40 = vld [vmem:[#allocation7 + $0x198] sm:$0xff] }
 0x288   : > { %v4296_v32 = vadd.f32 %v1370_v23, %v1369_v1  ;;  %v1358_v31 = vadd.f32 %v2567_v27, %v1357_v36  ;;  %v4308_v1 = vld [vmem:[#allocation7 + $0x1e8] sm:$0xff]  ;;  %v4311_v23 = vld [vmem:[#allocation7 + $0x1f0] sm:$0xff]  ;;  %5593 = vst [vmem:[#allocation64_spill] sm:$0xff] %v4341_v30  ;;  %v4353_v36 = vld [vmem:[#allocation7 + $0x160] sm:$0xff] }
 0x289   : > { %5594 = vst [vmem:[#allocation65_spill] sm:$0xff] %v4344_v43  ;;  %v4362_v56 = vld [vmem:[#allocation7 + $0x178] sm:$0xff] }
 0x28a   : > { %2570 = vtanh.f32 %v4296_v32  ;;  %v1362_v7 = vsel %vm1361_vm3, %v2567_v27, %v1358_v31  ;;  %v4320_v27 = vld [vmem:[#allocation7 + $0x1c8] sm:$0xff]  ;;  %5595 = vst [vmem:[#allocation66_spill] sm:$0xff] %v4347_v29 }
 0x28b   : > { %v1367_v26 = vsel %vm1364_vm4, %v1366_v35, %v1362_v7  ;;  %5596 = vst [vmem:[#allocation67_spill] sm:$0xff] %v4350_v40  ;;  %v4356_v31 = vld [vmem:[#allocation7 + $0x168] sm:$0xff]  ;;  %v4365_v7 = vld [vmem:[#allocation7 + $0x140] sm:$0xff] }
 0x28c   : > { %5597 = vst [vmem:[#allocation68_spill] sm:$0xff] %v4353_v36  ;;  %v4368_v35 = vld [vmem:[#allocation7 + $0x148] sm:$0xff] }
 0x28d   : > { %5598 = vst [vmem:[#allocation69_spill] sm:$0xff] %v4356_v31 }
 0x28e   : > { %5600 = vst [vmem:[#allocation71_spill] sm:$0xff] %v4362_v56 }
 0x28f   : > { %5601 = vst [vmem:[#allocation72_spill] sm:$0xff] %v4365_v7 }
 0x290   : > { %v2571_v28 = vpop.eup %2570  ;;  %5602 = vst [vmem:[#allocation73_spill] sm:$0xff] %v4368_v35 }
 0x291   : > { %v4299_v41 = vmul.f32 %v2571_v28, %v1367_v26  ;;  %v4371_v28 = vld [vmem:[#allocation7 + $0x150] sm:$0xff]  ;;  %v4374_v26 = vld [vmem:[#allocation7 + $0x158] sm:$0xff] }
 0x292   : > { %5603 = vst [vmem:[#allocation74_spill] sm:$0xff] %v4371_v28 }
 0x293   : > { %1390 = vmatmul.f32.vlgmr.msra.gmra.mxu0 %v4299_v41  ;;  %1410 = vmatmul.f32.vlgmr.msra.gmra.mxu1 %v4299_v41  ;;  %5604 = vst [vmem:[#allocation75_spill] sm:$0xff] %v4374_v26 }
 0x294   : > { %1430 = vmatmul.f32.vlgmr.msra.gmra.mxu2 %v4299_v41  ;;  %1450 = vmatmul.f32.vlgmr.msra.gmra.mxu3 %v4299_v41 }
 0x295   : > { %1601 = vmatpush.msra.mxu0 %v4305_v38  ;;  %1621 = vmatpush.msra.mxu1 %v4308_v1 }
 0x296   : > { %1641 = vmatpush.msra.mxu2 %v4311_v23  ;;  %1661 = vmatpush.msra.mxu3 %v4314_v24 }
 0x297   : > { %1602 = vmatpush.msra.mxu0 %v4317_v25  ;;  %1622 = vmatpush.msra.mxu1 %v4320_v27 }
 0x298   : > { %1642 = vmatpush.msra.mxu2 %v4323_v44  ;;  %1662 = vmatpush.msra.mxu3 %v4326_v62 }
 0x299   : > { %1603 = vmatpush.msra.mxu0 %v4329_v2  ;;  %1623 = vmatpush.msra.mxu1 %v4332_v57 }
 0x29a   : > { %1643 = vmatpush.msra.mxu2 %v4335_v47  ;;  %1663 = vmatpush.msra.mxu3 %v4338_v48 }
 0x29b   : > { %1604 = vmatpush.msra.mxu0 %v4341_v30  ;;  %1624 = vmatpush.msra.mxu1 %v4344_v43 }
 0x29c   : > { %1644 = vmatpush.msra.mxu2 %v4347_v29  ;;  %1664 = vmatpush.msra.mxu3 %v4350_v40 }
 0x29d   : > { %1605 = vmatpush.msra.mxu0 %v4353_v36  ;;  %1625 = vmatpush.msra.mxu1 %v4356_v31 }
 0x29e   : > { %1645 = vmatpush.msra.mxu2 %v4359_v37  ;;  %1665 = vmatpush.msra.mxu3 %v4362_v56  ;;  %v4377_v37 = vld [vmem:[#allocation7 + $0x120] sm:$0xff]  ;;  %v4380_v56 = vld [vmem:[#allocation7 + $0x128] sm:$0xff] }
 0x29f   : > { %1606 = vmatpush.msra.mxu0 %v4365_v7  ;;  %1626 = vmatpush.msra.mxu1 %v4368_v35  ;;  %5605 = vst [vmem:[#allocation76_spill] sm:$0xff] %v4377_v37  ;;  %v4383_v7 = vld [vmem:[#allocation7 + $0x130] sm:$0xff]  ;;  %v4386_v35 = vld [vmem:[#allocation7 + $0x138] sm:$0xff] }
 0x2a0   : > { %1646 = vmatpush.msra.mxu2 %v4371_v28  ;;  %1666 = vmatpush.msra.mxu3 %v4374_v26  ;;  %5606 = vst [vmem:[#allocation77_spill] sm:$0xff] %v4380_v56  ;;  %v4389_v28 = vld [vmem:[#allocation7 + $0x100] sm:$0xff]  ;;  %v4392_v26 = vld [vmem:[#allocation7 + $0x108] sm:$0xff] }
 0x2a1   : > { %1607 = vmatpush.msra.mxu0 %v4377_v37  ;;  %1627 = vmatpush.msra.mxu1 %v4380_v56  ;;  %5607 = vst [vmem:[#allocation78_spill] sm:$0xff] %v4383_v7  ;;  %v4395_v37 = vld [vmem:[#allocation7 + $0x110] sm:$0xff]  ;;  %v4398_v56 = vld [vmem:[#allocation7 + $0x118] sm:$0xff] }
 0x2a2   : > { %1647 = vmatpush.msra.mxu2 %v4383_v7  ;;  %5608 = vst [vmem:[#allocation79_spill] sm:$0xff] %v4386_v35  ;;  %1667 = vmatpush.msra.mxu3 %v4386_v35  ;;  %v4401_v7 = vld [vmem:[#allocation7 + $0xe0] sm:$0xff]  ;;  %v4404_v35 = vld [vmem:[#allocation7 + $0xe8] sm:$0xff] }
 0x2a3   : > { %5609 = vst [vmem:[#allocation80_spill] sm:$0xff] %v4389_v28  ;;  %1608 = vmatpush.msra.mxu0 %v4389_v28  ;;  %1628 = vmatpush.msra.mxu1 %v4392_v26  ;;  %v4407_v28 = vld [vmem:[#allocation7 + $0xf0] sm:$0xff] }
 0x2a4   : > { %5610 = vst [vmem:[#allocation81_spill] sm:$0xff] %v4392_v26  ;;  %1648 = vmatpush.msra.mxu2 %v4395_v37  ;;  %1668 = vmatpush.msra.mxu3 %v4398_v56  ;;  %v4410_v26 = vld [vmem:[#allocation7 + $0xf8] sm:$0xff] }
 0x2a5   : > { %5611 = vst [vmem:[#allocation82_spill] sm:$0xff] %v4395_v37  ;;  %1609 = vmatpush.msra.mxu0 %v4401_v7  ;;  %1629 = vmatpush.msra.mxu1 %v4404_v35  ;;  %v4413_v37 = vld [vmem:[#allocation7 + $0xc0] sm:$0xff] }
 0x2a6   : > { %5612 = vst [vmem:[#allocation83_spill] sm:$0xff] %v4398_v56  ;;  %1649 = vmatpush.msra.mxu2 %v4407_v28  ;;  %1669 = vmatpush.msra.mxu3 %v4410_v26  ;;  %v4416_v56 = vld [vmem:[#allocation7 + $0xc8] sm:$0xff] }
 0x2a7   : > { %5613 = vst [vmem:[#allocation84_spill] sm:$0xff] %v4401_v7  ;;  %1610 = vmatpush.msra.mxu0 %v4413_v37  ;;  %1630 = vmatpush.msra.mxu1 %v4416_v56  ;;  %v4419_v7 = vld [vmem:[#allocation7 + $0xd0] sm:$0xff] }
 0x2a8   : > { %5614 = vst [vmem:[#allocation85_spill] sm:$0xff] %v4404_v35  ;;  %1650 = vmatpush.msra.mxu2 %v4419_v7  ;;  %v4422_v35 = vld [vmem:[#allocation7 + $0xd8] sm:$0xff] }
 0x2a9   : > { %5615 = vst [vmem:[#allocation86_spill] sm:$0xff] %v4407_v28  ;;  %1670 = vmatpush.msra.mxu3 %v4422_v35  ;;  %v4425_v28 = vld [vmem:[#allocation7 + $0xa0] sm:$0xff] }
 0x2aa   : > { %5616 = vst [vmem:[#allocation87_spill] sm:$0xff] %v4410_v26  ;;  %1611 = vmatpush.msra.mxu0 %v4425_v28  ;;  %v4428_v26 = vld [vmem:[#allocation7 + $0xa8] sm:$0xff] }
 0x2ab   : > { %5617 = vst [vmem:[#allocation88_spill] sm:$0xff] %v4413_v37  ;;  %1631 = vmatpush.msra.mxu1 %v4428_v26  ;;  %v4431_v37 = vld [vmem:[#allocation7 + $0xb0] sm:$0xff] }
 0x2ac   : > { %5618 = vst [vmem:[#allocation89_spill] sm:$0xff] %v4416_v56  ;;  %1651 = vmatpush.msra.mxu2 %v4431_v37  ;;  %v4434_v56 = vld [vmem:[#allocation7 + $0xb8] sm:$0xff] }
 0x2ad   : > { %5619 = vst [vmem:[#allocation90_spill] sm:$0xff] %v4419_v7  ;;  %1671 = vmatpush.msra.mxu3 %v4434_v56  ;;  %v4437_v7 = vld [vmem:[#allocation7 + $0x80] sm:$0xff] }
 0x2ae   : > { %5620 = vst [vmem:[#allocation91_spill] sm:$0xff] %v4422_v35  ;;  %1612 = vmatpush.msra.mxu0 %v4437_v7  ;;  %v4440_v35 = vld [vmem:[#allocation7 + $0x88] sm:$0xff] }
 0x2af   : > { %5621 = vst [vmem:[#allocation92_spill] sm:$0xff] %v4425_v28  ;;  %1632 = vmatpush.msra.mxu1 %v4440_v35  ;;  %v4443_v28 = vld [vmem:[#allocation7 + $0x90] sm:$0xff] }
 0x2b0   : > { %5622 = vst [vmem:[#allocation93_spill] sm:$0xff] %v4428_v26  ;;  %1652 = vmatpush.msra.mxu2 %v4443_v28  ;;  %v4446_v26 = vld [vmem:[#allocation7 + $0x98] sm:$0xff] }
 0x2b1   : > { %5623 = vst [vmem:[#allocation94_spill] sm:$0xff] %v4431_v37  ;;  %1672 = vmatpush.msra.mxu3 %v4446_v26  ;;  %v4449_v37 = vld [vmem:[#allocation7 + $0x60] sm:$0xff] }
 0x2b2   : > { %5624 = vst [vmem:[#allocation95_spill] sm:$0xff] %v4434_v56  ;;  %1613 = vmatpush.msra.mxu0 %v4449_v37  ;;  %v4452_v56 = vld [vmem:[#allocation7 + $0x68] sm:$0xff] }
 0x2b3   : > { %5625 = vst [vmem:[#allocation96_spill] sm:$0xff] %v4437_v7  ;;  %1633 = vmatpush.msra.mxu1 %v4452_v56  ;;  %v4455_v7 = vld [vmem:[#allocation7 + $0x70] sm:$0xff] }
 0x2b4   : > { %5626 = vst [vmem:[#allocation97_spill] sm:$0xff] %v4440_v35  ;;  %1653 = vmatpush.msra.mxu2 %v4455_v7  ;;  %v4458_v35 = vld [vmem:[#allocation7 + $0x78] sm:$0xff] }
 0x2b5   : > { %5627 = vst [vmem:[#allocation98_spill] sm:$0xff] %v4443_v28  ;;  %1673 = vmatpush.msra.mxu3 %v4458_v35  ;;  %v4461_v28 = vld [vmem:[#allocation7 + $0x40] sm:$0xff] }
 0x2b6   : > { %5628 = vst [vmem:[#allocation99_spill] sm:$0xff] %v4446_v26  ;;  %1614 = vmatpush.msra.mxu0 %v4461_v28  ;;  %v4464_v26 = vld [vmem:[#allocation7 + $0x48] sm:$0xff] }
 0x2b7   : > { %5629 = vst [vmem:[#allocation100_spill] sm:$0xff] %v4449_v37  ;;  %1634 = vmatpush.msra.mxu1 %v4464_v26  ;;  %v4467_v37 = vld [vmem:[#allocation7 + $0x50] sm:$0xff] }
 0x2b8   : > { %5630 = vst [vmem:[#allocation101_spill] sm:$0xff] %v4452_v56  ;;  %1654 = vmatpush.msra.mxu2 %v4467_v37  ;;  %v4470_v56 = vld [vmem:[#allocation7 + $0x58] sm:$0xff] }
 0x2b9   : > { %5631 = vst [vmem:[#allocation102_spill] sm:$0xff] %v4455_v7  ;;  %1674 = vmatpush.msra.mxu3 %v4470_v56  ;;  %v4473_v7 = vld [vmem:[#allocation7 + $0x20] sm:$0xff] }
 0x2ba   : > { %5632 = vst [vmem:[#allocation103_spill] sm:$0xff] %v4458_v35  ;;  %1615 = vmatpush.msra.mxu0 %v4473_v7  ;;  %v4476_v35 = vld [vmem:[#allocation7 + $0x28] sm:$0xff] }
 0x2bb   : > { %5633 = vst [vmem:[#allocation132_spill] sm:$0xff] %v4461_v28  ;;  %1635 = vmatpush.msra.mxu1 %v4476_v35  ;;  %v4479_v28 = vld [vmem:[#allocation7 + $0x30] sm:$0xff] }
 0x2bc   : > { %5634 = vst [vmem:[#allocation148_spill] sm:$0xff] %v4464_v26  ;;  %1655 = vmatpush.msra.mxu2 %v4479_v28  ;;  %v4482_v26 = vld [vmem:[#allocation7 + $0x38] sm:$0xff] }
 0x2bd   : > { %5635 = vst [vmem:[#allocation114_spill] sm:$0xff] %v4467_v37  ;;  %1675 = vmatpush.msra.mxu3 %v4482_v26  ;;  %v4485_v37 = vld [vmem:[#allocation7] sm:$0xff] }
 0x2be   : > { %5636 = vst [vmem:[#allocation115_spill] sm:$0xff] %v4470_v56  ;;  %1616 = vmatpush.msra.mxu0 %v4485_v37  ;;  %v4488_v56 = vld [vmem:[#allocation7 + $0x8] sm:$0xff] }
 0x2bf   : > { %5637 = vst [vmem:[#allocation116_spill] sm:$0xff] %v4473_v7  ;;  %1636 = vmatpush.msra.mxu1 %v4488_v56  ;;  %v4491_v7 = vld [vmem:[#allocation7 + $0x10] sm:$0xff] }
 0x2c0   : > { %5638 = vst [vmem:[#allocation117_spill] sm:$0xff] %v4476_v35  ;;  %1656 = vmatpush.msra.mxu2 %v4491_v7  ;;  %v4494_v35 = vld [vmem:[#allocation7 + $0x18] sm:$0xff] }
 0x2c1   : > { %5639 = vst [vmem:[#allocation118_spill] sm:$0xff] %v4479_v28  ;;  %1676 = vmatpush.msra.mxu3 %v4494_v35  ;;  %v1161_v28 = vadd.f32 %v4283_v45, %v4004_v33 }
 0x2c2   : > { %5640 = vst [vmem:[#allocation119_spill] sm:$0xff] %v4482_v26  ;;  %v1181_v26 = vadd.f32 %v4285_v53, %v4006_v34 }
 0x2c3   : > { %5641 = vst [vmem:[#allocation120_spill] sm:$0xff] %v4485_v37 }
 0x2c4   : > { %5642 = vst [vmem:[#allocation121_spill] sm:$0xff] %v4488_v56 }
 0x2c5   : > { %5643 = vst [vmem:[#allocation122_spill] sm:$0xff] %v4491_v7  ;;  %v1221_v7 = vadd.f32 %v4287_v46, %v4012_v42 }
 0x2c6   : > { %5644 = vst [vmem:[#allocation123_spill] sm:$0xff] %v4494_v35 }
 0x310   : > { %v1391_v31 = vpop.f32.mrf.mxu0  ;;  %v1411_v37 = vpop.f32.mrf.mxu1 }
 0x311   : > { %v1392_v36 = vadd.f32 %v1391_v31, %v1161_v28  ;;  %v1412_v40 = vadd.f32 %v1411_v37, %v1181_v26 }
 0x313   : > { %v2443_v29 = vmul.f32 -1.442695, %v1392_v36  ;;  %v2444_v56 = vmul.f32 -1.442695, %v1412_v40  ;;  %v1201_v40 = vadd.f32 %v4291_v49, %v4016_v6 }
 0x315   : > { %2572 = vpow2.f32 %v2443_v29 }
 0x316   : > { %2574 = vpow2.f32 %v2444_v56 }
 0x317   : > { %v1451_v43 = vpop.f32.mrf.mxu3  ;;  %v1431_v53 = vpop.f32.mrf.mxu2 }
 0x318   : > { %v1452_v30 = vadd.f32 %v1451_v43, %v1221_v7  ;;  %v1432_v37 = vadd.f32 %v1431_v53, %v1201_v40 }
 0x31a   : > { %v2445_v35 = vmul.f32 -1.442695, %v1452_v30 }
 0x31b   : > { %v2573_v48 = vpop.eup %2572 }
 0x31c   : > { %v2575_v47 = vpop.eup %2574  ;;  %v1457_v45 = vadd.f32 1.0, %v2573_v48  ;;  %2576 = vpow2.f32 %v2445_v35 }
 0x31d   : > { %v1476_v33 = vadd.f32 1.0, %v2575_v47 }
 0x31e   : > { %2578 = vrcp.f32 %v1457_v45  ;;  %v1469_v28 = vand.u32 2147483648, %v1457_v45  ;;  %v1467_v35 = vand.u32 2147483647, %v1457_v45  ;;  %vm1463_vm7 = vweird.f32 %v1457_v45 }
 0x31f   : > { %2580 = vrcp.f32 %v1476_v33  ;;  %v1488_v48 = vand.u32 2147483648, %v1476_v33  ;;  %v1486_v42 = vand.u32 2147483647, %v1476_v33  ;;  %vm1482_vm8 = vweird.f32 %v1476_v33 }
 0x320   : > { %v1470_v53 = vor.u32 1.1754944e-38, %v1469_v28  ;;  %vm1468_vm11 = vcmp.eq.f32.partialorder %v1467_v35, 8.507059e+37 }
 0x321   : > { %vm1487_vm12 = vcmp.eq.f32.partialorder %v1486_v42, 8.507059e+37 }
 0x322   : > { %v2577_v31 = vpop.eup %2576 }
 0x323   : > { %v1496_v29 = vadd.f32 1.0, %v2577_v31 }
 0x324   : > { %v2579_v36 = vpop.eup %2578 }
 0x325   : > { %v2581_v46 = vpop.eup %2580  ;;  %v1459_v56 = vmul.f32 %v2579_v36, %v1457_v45  ;;  %2582 = vrcp.f32 %v1496_v29  ;;  %vm1464_vm5 = vweird.f32 %v2579_v36  ;;  %v1508_v28 = vand.u32 2147483648, %v1496_v29 }
 0x326   : > { %v1478_v43 = vmul.f32 %v2581_v46, %v1476_v33  ;;  %2584 = vtanh.f32 %v1432_v37  ;;  %vm1483_vm6 = vweird.f32 %v2581_v46  ;;  %vm1465_vm9 = vmor %vm1463_vm7, %vm1464_vm5  ;;  %vm1502_vm14 = vweird.f32 %v1496_v29 }
 0x327   : > { %v1460_v30 = vsub.f32 1.0, %v1459_v56  ;;  %vm1484_vm10 = vmor %vm1482_vm8, %vm1483_vm6  ;;  %v1489_v56 = vor.u32 1.1754944e-38, %v1488_v48  ;;  %v1509_v35 = vor.u32 1.1754944e-38, %v1508_v28  ;;  %v4570_v28 = vld [vmem:[#allocation10 + $0x178] sm:$0xff] }
 0x328   : > { %v1479_v7 = vsub.f32 1.0, %v1478_v43 }
 0x329   : > { %v1461_v47 = vmul.f32 %v2579_v36, %v1460_v30 }
 0x32a   : > { %v1480_v26 = vmul.f32 %v2581_v46, %v1479_v7 }
 0x32b   : > { %v2583_v34 = vpop.eup %2582  ;;  %v1462_v49 = vadd.f32 %v2579_v36, %v1461_v47 }
 0x32c   : > { %v1481_v31 = vadd.f32 %v2581_v46, %v1480_v26  ;;  %v1498_v40 = vmul.f32 %v2583_v34, %v1496_v29  ;;  %v2585_v37 = vpop.eup %2584  ;;  %vm1503_vm13 = vweird.f32 %v2583_v34 }
 0x32d   : > { %v1466_v43 = vsel %vm1465_vm9, %v2579_v36, %v1462_v49  ;;  %v1506_v36 = vand.u32 2147483647, %v1496_v29  ;;  %vm1504_vm15 = vmor %vm1502_vm14, %vm1503_vm13  ;;  %v4527_v29 = vld [vmem:[#allocation10 + $0x1d0] sm:$0xff]  ;;  %v4530_v49 = vld [vmem:[#allocation10 + $0x1d8] sm:$0xff] }
 0x32e   : > { %v1471_v6 = vsel %vm1468_vm11, %v1470_v53, %v1466_v43  ;;  %v1485_v30 = vsel %vm1484_vm10, %v2581_v46, %v1481_v31  ;;  %v1499_v57 = vsub.f32 1.0, %v1498_v40  ;;  %v4533_v53 = vld [vmem:[#allocation10 + $0x1a0] sm:$0xff]  ;;  %v4536_v31 = vld [vmem:[#allocation10 + $0x1a8] sm:$0xff]  ;;  %v4539_v40 = vld [vmem:[#allocation10 + $0x1b0] sm:$0xff] }
 0x32f   : > { %v1490_v7 = vsel %vm1487_vm12, %v1489_v56, %v1485_v30  ;;  %v1513_v2 = vmul.f32 %v2585_v37, %v1471_v6  ;;  %vm1507_vm0 = vcmp.eq.f32.partialorder %v1506_v36, 8.507059e+37  ;;  %v4509_v6 = vld [vmem:[#allocation10 + $0x1e0] sm:$0xff]  ;;  %v4542_v56 = vld [vmem:[#allocation10 + $0x1b8] sm:$0xff]  ;;  %v4552_v37 = vld [vmem:[#allocation10 + $0x188] sm:$0xff] }
 0x330   : > { %v1512_v62 = vmul.f32 %v1490_v7, %v4020_v39  ;;  %v1500_v47 = vmul.f32 %v2583_v34, %v1499_v57  ;;  %v4512_v39 = vld [vmem:[#allocation10 + $0x1e8] sm:$0xff]  ;;  %v4549_v43 = vld [vmem:[#allocation10 + $0x180] sm:$0xff]  ;;  %v4555_v30 = vld [vmem:[#allocation10 + $0x190] sm:$0xff] }
 0x331   : > { %v4524_v57 = vld [vmem:[#allocation10 + $0x1c8] sm:$0xff]  ;;  %v4558_v7 = vld [vmem:[#allocation10 + $0x198] sm:$0xff]  ;;  %v4573_v36 = vld [vmem:[#allocation10 + $0x140] sm:$0xff] }
 0x332   : > { %v4506_v45 = vadd.f32 %v1513_v2, %v1512_v62  ;;  %v1501_v33 = vadd.f32 %v2583_v34, %v1500_v47  ;;  %v4515_v62 = vld [vmem:[#allocation10 + $0x1f0] sm:$0xff]  ;;  %v4521_v2 = vld [vmem:[#allocation10 + $0x1c0] sm:$0xff]  ;;  %5645 = vst [vmem:[#allocation124_spill] sm:$0xff] %v4573_v36 }
 0x333   : > { %v4561_v47 = vld [vmem:[#allocation10 + $0x160] sm:$0xff] }
 0x334   : > { %2586 = vtanh.f32 %v4506_v45  ;;  %v1505_v48 = vsel %vm1504_vm15, %v2583_v34, %v1501_v33  ;;  %v4518_v34 = vld [vmem:[#allocation10 + $0x1f8] sm:$0xff]  ;;  %v4567_v33 = vld [vmem:[#allocation10 + $0x170] sm:$0xff] }
 0x335   : > { %v1510_v46 = vsel %vm1507_vm0, %v1509_v35, %v1505_v48  ;;  %v4576_v48 = vld [vmem:[#allocation10 + $0x148] sm:$0xff]  ;;  %v4579_v35 = vld [vmem:[#allocation10 + $0x150] sm:$0xff] }
 0x336   : > { %5646 = vst [vmem:[#allocation125_spill] sm:$0xff] %v4576_v48 }
 0x337   : > { %5647 = vst [vmem:[#allocation128_spill] sm:$0xff] %v4579_v35 }
 0x33a   : > { %v2587_v42 = vpop.eup %2586 }
 0x33b   : > { %v1516_v26 = vmul.f32 %v2587_v42, %v1510_v46  ;;  %v4582_v42 = vld [vmem:[#allocation10 + $0x158] sm:$0xff]  ;;  %v4585_v46 = vld [vmem:[#allocation10 + $0x120] sm:$0xff] }
 0x33c   : > { %5648 = vst [vmem:[#allocation129_spill] sm:$0xff] %v4582_v42 }
 0x33d   : > { %1533 = vmatmul.f32.vlgmr.msrb.gmra.mxu0 %v1516_v26  ;;  %1553 = vmatmul.f32.vlgmr.msrb.gmra.mxu1 %v1516_v26  ;;  %5649 = vst [vmem:[#allocation130_spill] sm:$0xff] %v4585_v46 }
 0x33e   : > { %1573 = vmatmul.f32.vlgmr.msrb.gmra.mxu2 %v1516_v26  ;;  %1593 = vmatmul.f32.vlgmr.msrb.gmra.mxu3 %v1516_v26  ;;  %v4588_v26 = vld [vmem:[#allocation10 + $0x128] sm:$0xff] }
 0x33f   : > { %1748 = vmatpush.msrb.mxu0 %v4509_v6  ;;  %1768 = vmatpush.msrb.mxu1 %v4512_v39  ;;  %5650 = vst [vmem:[#allocation131_spill] sm:$0xff] %v4588_v26 }
 0x340   : > { %1788 = vmatpush.msrb.mxu2 %v4515_v62  ;;  %1808 = vmatpush.msrb.mxu3 %v4518_v34 }
 0x341   : > { %1749 = vmatpush.msrb.mxu0 %v4521_v2  ;;  %1769 = vmatpush.msrb.mxu1 %v4524_v57 }
 0x342   : > { %1789 = vmatpush.msrb.mxu2 %v4527_v29  ;;  %1809 = vmatpush.msrb.mxu3 %v4530_v49 }
 0x343   : > { %1750 = vmatpush.msrb.mxu0 %v4533_v53  ;;  %1770 = vmatpush.msrb.mxu1 %v4536_v31 }
 0x344   : > { %1790 = vmatpush.msrb.mxu2 %v4539_v40  ;;  %1810 = vmatpush.msrb.mxu3 %v4542_v56 }
 0x345   : > { %1617 = vmatmul.f32.vlgmr.msra.gmra.mxu0 %v4299_v41  ;;  %1637 = vmatmul.f32.vlgmr.msra.gmra.mxu1 %v4299_v41 }
 0x346   : > { %1657 = vmatmul.f32.vlgmr.msra.gmra.mxu2 %v4299_v41  ;;  %1677 = vmatmul.f32.vlgmr.msra.gmra.mxu3 %v4299_v41  ;;  %v4564_v41 = vld [vmem:[#allocation10 + $0x168] sm:$0xff] }
 0x347   : > { %1751 = vmatpush.msrb.mxu0 %v4549_v43  ;;  %1771 = vmatpush.msrb.mxu1 %v4552_v37 }
 0x348   : > { %1791 = vmatpush.msrb.mxu2 %v4555_v30  ;;  %1811 = vmatpush.msrb.mxu3 %v4558_v7 }
 0x349   : > { %1752 = vmatpush.msrb.mxu0 %v4561_v47  ;;  %1772 = vmatpush.msrb.mxu1 %v4564_v41 }
 0x34a   : > { %1792 = vmatpush.msrb.mxu2 %v4567_v33  ;;  %1812 = vmatpush.msrb.mxu3 %v4570_v28 }
 0x34b   : > { %1753 = vmatpush.msrb.mxu0 %v4573_v36  ;;  %1773 = vmatpush.msrb.mxu1 %v4576_v48  ;;  %v4591_v36 = vld [vmem:[#allocation10 + $0x130] sm:$0xff]  ;;  %v4594_v48 = vld [vmem:[#allocation10 + $0x138] sm:$0xff] }
 0x34c   : > { %1793 = vmatpush.msrb.mxu2 %v4579_v35  ;;  %1813 = vmatpush.msrb.mxu3 %v4582_v42  ;;  %5651 = vst [vmem:[#allocation133_spill] sm:$0xff] %v4591_v36  ;;  %v4597_v35 = vld [vmem:[#allocation10 + $0x100] sm:$0xff]  ;;  %v4600_v42 = vld [vmem:[#allocation10 + $0x108] sm:$0xff] }
 0x34d   : > { %1754 = vmatpush.msrb.mxu0 %v4585_v46  ;;  %1774 = vmatpush.msrb.mxu1 %v4588_v26  ;;  %5652 = vst [vmem:[#allocation134_spill] sm:$0xff] %v4594_v48  ;;  %v4603_v46 = vld [vmem:[#allocation10 + $0x110] sm:$0xff]  ;;  %v4606_v26 = vld [vmem:[#allocation10 + $0x118] sm:$0xff] }
 0x34e   : > { %1794 = vmatpush.msrb.mxu2 %v4591_v36  ;;  %1814 = vmatpush.msrb.mxu3 %v4594_v48  ;;  %5653 = vst [vmem:[#allocation135_spill] sm:$0xff] %v4597_v35  ;;  %v4609_v36 = vld [vmem:[#allocation10 + $0xe0] sm:$0xff]  ;;  %v4612_v48 = vld [vmem:[#allocation10 + $0xe8] sm:$0xff] }
 0x34f   : > { %1755 = vmatpush.msrb.mxu0 %v4597_v35  ;;  %5654 = vst [vmem:[#allocation136_spill] sm:$0xff] %v4600_v42  ;;  %1775 = vmatpush.msrb.mxu1 %v4600_v42  ;;  %v4615_v35 = vld [vmem:[#allocation10 + $0xf0] sm:$0xff]  ;;  %v4618_v42 = vld [vmem:[#allocation10 + $0xf8] sm:$0xff] }
 0x350   : > { %5655 = vst [vmem:[#allocation137_spill] sm:$0xff] %v4603_v46  ;;  %1795 = vmatpush.msrb.mxu2 %v4603_v46  ;;  %1815 = vmatpush.msrb.mxu3 %v4606_v26  ;;  %v4621_v46 = vld [vmem:[#allocation10 + $0xc0] sm:$0xff] }
 0x351   : > { %5656 = vst [vmem:[#allocation138_spill] sm:$0xff] %v4606_v26  ;;  %1756 = vmatpush.msrb.mxu0 %v4609_v36  ;;  %1776 = vmatpush.msrb.mxu1 %v4612_v48  ;;  %v4624_v26 = vld [vmem:[#allocation10 + $0xc8] sm:$0xff] }
 0x352   : > { %5657 = vst [vmem:[#allocation139_spill] sm:$0xff] %v4609_v36  ;;  %1796 = vmatpush.msrb.mxu2 %v4615_v35  ;;  %1816 = vmatpush.msrb.mxu3 %v4618_v42  ;;  %v4627_v36 = vld [vmem:[#allocation10 + $0xd0] sm:$0xff] }
 0x353   : > { %5658 = vst [vmem:[#allocation140_spill] sm:$0xff] %v4612_v48  ;;  %1757 = vmatpush.msrb.mxu0 %v4621_v46  ;;  %1777 = vmatpush.msrb.mxu1 %v4624_v26  ;;  %v4630_v48 = vld [vmem:[#allocation10 + $0xd8] sm:$0xff] }
 0x354   : > { %5659 = vst [vmem:[#allocation141_spill] sm:$0xff] %v4615_v35  ;;  %1797 = vmatpush.msrb.mxu2 %v4627_v36  ;;  %1817 = vmatpush.msrb.mxu3 %v4630_v48  ;;  %v4633_v35 = vld [vmem:[#allocation10 + $0xa0] sm:$0xff] }
 0x355   : > { %5660 = vst [vmem:[#allocation142_spill] sm:$0xff] %v4618_v42  ;;  %1758 = vmatpush.msrb.mxu0 %v4633_v35  ;;  %v4636_v42 = vld [vmem:[#allocation10 + $0xa8] sm:$0xff] }
 0x356   : > { %5661 = vst [vmem:[#allocation143_spill] sm:$0xff] %v4621_v46  ;;  %1778 = vmatpush.msrb.mxu1 %v4636_v42  ;;  %v4639_v46 = vld [vmem:[#allocation10 + $0xb0] sm:$0xff] }
 0x357   : > { %5662 = vst [vmem:[#allocation144_spill] sm:$0xff] %v4624_v26  ;;  %1798 = vmatpush.msrb.mxu2 %v4639_v46  ;;  %v4642_v26 = vld [vmem:[#allocation10 + $0xb8] sm:$0xff] }
 0x358   : > { %5663 = vst [vmem:[#allocation145_spill] sm:$0xff] %v4627_v36  ;;  %1818 = vmatpush.msrb.mxu3 %v4642_v26  ;;  %v4645_v36 = vld [vmem:[#allocation10 + $0x80] sm:$0xff] }
 0x359   : > { %5664 = vst [vmem:[#allocation146_spill] sm:$0xff] %v4630_v48  ;;  %1759 = vmatpush.msrb.mxu0 %v4645_v36  ;;  %v4648_v48 = vld [vmem:[#allocation10 + $0x88] sm:$0xff] }
 0x35a   : > { %5665 = vst [vmem:[#allocation147_spill] sm:$0xff] %v4633_v35  ;;  %1779 = vmatpush.msrb.mxu1 %v4648_v48  ;;  %v4651_v35 = vld [vmem:[#allocation10 + $0x90] sm:$0xff] }
 0x35b   : > { %5666 = vst [vmem:[#allocation149_spill] sm:$0xff] %v4636_v42  ;;  %1799 = vmatpush.msrb.mxu2 %v4651_v35  ;;  %v4654_v42 = vld [vmem:[#allocation10 + $0x98] sm:$0xff] }
 0x35c   : > { %5667 = vst [vmem:[#allocation150_spill] sm:$0xff] %v4639_v46  ;;  %1819 = vmatpush.msrb.mxu3 %v4654_v42  ;;  %v4657_v46 = vld [vmem:[#allocation10 + $0x60] sm:$0xff] }
 0x35d   : > { %5668 = vst [vmem:[#allocation151_spill] sm:$0xff] %v4642_v26  ;;  %1760 = vmatpush.msrb.mxu0 %v4657_v46  ;;  %v4660_v26 = vld [vmem:[#allocation10 + $0x68] sm:$0xff] }
 0x35e   : > { %5669 = vst [vmem:[#allocation152_spill] sm:$0xff] %v4645_v36  ;;  %1780 = vmatpush.msrb.mxu1 %v4660_v26  ;;  %v4663_v36 = vld [vmem:[#allocation10 + $0x70] sm:$0xff] }
 0x35f   : > { %5670 = vst [vmem:[#allocation153_spill] sm:$0xff] %v4648_v48  ;;  %1800 = vmatpush.msrb.mxu2 %v4663_v36  ;;  %v4666_v48 = vld [vmem:[#allocation10 + $0x78] sm:$0xff] }
 0x360   : > { %5671 = vst [vmem:[#allocation154_spill] sm:$0xff] %v4651_v35  ;;  %1820 = vmatpush.msrb.mxu3 %v4666_v48  ;;  %v4669_v35 = vld [vmem:[#allocation10 + $0x40] sm:$0xff] }
 0x361   : > { %5672 = vst [vmem:[#allocation155_spill] sm:$0xff] %v4654_v42  ;;  %1761 = vmatpush.msrb.mxu0 %v4669_v35  ;;  %v4672_v42 = vld [vmem:[#allocation10 + $0x48] sm:$0xff] }
 0x362   : > { %5673 = vst [vmem:[#allocation156_spill] sm:$0xff] %v4657_v46  ;;  %1781 = vmatpush.msrb.mxu1 %v4672_v42  ;;  %v4675_v46 = vld [vmem:[#allocation10 + $0x50] sm:$0xff] }
 0x363   : > { %5674 = vst [vmem:[#allocation157_spill] sm:$0xff] %v4660_v26  ;;  %1801 = vmatpush.msrb.mxu2 %v4675_v46  ;;  %v4678_v26 = vld [vmem:[#allocation10 + $0x58] sm:$0xff] }
 0x364   : > { %5675 = vst [vmem:[#allocation158_spill] sm:$0xff] %v4663_v36  ;;  %1821 = vmatpush.msrb.mxu3 %v4678_v26  ;;  %v4681_v36 = vld [vmem:[#allocation10 + $0x20] sm:$0xff] }
 0x365   : > { %5676 = vst [vmem:[#allocation159_spill] sm:$0xff] %v4666_v48  ;;  %1762 = vmatpush.msrb.mxu0 %v4681_v36  ;;  %v4684_v48 = vld [vmem:[#allocation10 + $0x28] sm:$0xff] }
 0x366   : > { %5677 = vst [vmem:[#allocation160_spill] sm:$0xff] %v4669_v35  ;;  %1782 = vmatpush.msrb.mxu1 %v4684_v48  ;;  %v4687_v35 = vld [vmem:[#allocation10 + $0x30] sm:$0xff] }
 0x367   : > { %5678 = vst [vmem:[#allocation161_spill] sm:$0xff] %v4672_v42  ;;  %1802 = vmatpush.msrb.mxu2 %v4687_v35  ;;  %v4690_v42 = vld [vmem:[#allocation10 + $0x38] sm:$0xff] }
 0x368   : > { %5679 = vst [vmem:[#allocation162_spill] sm:$0xff] %v4675_v46  ;;  %1822 = vmatpush.msrb.mxu3 %v4690_v42  ;;  %v4693_v46 = vld [vmem:[#allocation10] sm:$0xff] }
 0x369   : > { %5680 = vst [vmem:[#allocation163_spill] sm:$0xff] %v4678_v26  ;;  %1763 = vmatpush.msrb.mxu0 %v4693_v46  ;;  %v4696_v26 = vld [vmem:[#allocation10 + $0x8] sm:$0xff] }
 0x36a   : > { %5681 = vst [vmem:[#allocation164_spill] sm:$0xff] %v4681_v36  ;;  %1783 = vmatpush.msrb.mxu1 %v4696_v26  ;;  %v4699_v36 = vld [vmem:[#allocation10 + $0x10] sm:$0xff] }
 0x36b   : > { %5682 = vst [vmem:[#allocation165_spill] sm:$0xff] %v4684_v48  ;;  %1803 = vmatpush.msrb.mxu2 %v4699_v36  ;;  %v4702_v48 = vld [vmem:[#allocation10 + $0x18] sm:$0xff]  ;;  %1891 = vmatpush.msra.mxu0 %v4091_v50  ;;  %v5683_v50 = vld [vmem:[#allocation24_spill] sm:$0xff] }
 0x36c   : > { %1823 = vmatpush.msrb.mxu3 %v4702_v48  ;;  %1911 = vmatpush.msra.mxu1 %v4094_v51  ;;  %v5684_v51 = vld [vmem:[#allocation25_spill] sm:$0xff] }
 0x36d   : > { %1931 = vmatpush.msra.mxu2 %v4097_v8  ;;  %1892 = vmatpush.msra.mxu0 %v4103_v0  ;;  %v5685_v8 = vld [vmem:[#allocation26_spill] sm:$0xff]  ;;  %v5687_v0 = vld [vmem:[#allocation28_spill] sm:$0xff] }
 0x36e   : > { %1951 = vmatpush.msra.mxu3 %v4100_v55  ;;  %1912 = vmatpush.msra.mxu1 %v4106_v60  ;;  %v5686_v55 = vld [vmem:[#allocation27_spill] sm:$0xff]  ;;  %v5688_v60 = vld [vmem:[#allocation29_spill] sm:$0xff] }
 0x36f   : > { %1932 = vmatpush.msra.mxu2 %v4109_v54  ;;  %1893 = vmatpush.msra.mxu0 %v4115_v61  ;;  %v5689_v54 = vld [vmem:[#allocation30_spill] sm:$0xff]  ;;  %v5691_v61 = vld [vmem:[#allocation32_spill] sm:$0xff] }
 0x370   : > { %1952 = vmatpush.msra.mxu3 %v4112_v4  ;;  %1913 = vmatpush.msra.mxu1 %v4118_v52  ;;  %v5690_v4 = vld [vmem:[#allocation31_spill] sm:$0xff]  ;;  %v5692_v52 = vld [vmem:[#allocation33_spill] sm:$0xff] }
 0x371   : > { %1933 = vmatpush.msra.mxu2 %v4121_v63  ;;  %1894 = vmatpush.msra.mxu0 %v4127_v5  ;;  %v5693_v63 = vld [vmem:[#allocation34_spill] sm:$0xff]  ;;  %v5695_v5 = vld [vmem:[#allocation36_spill] sm:$0xff] }
 0x372   : > { %1953 = vmatpush.msra.mxu3 %v4124_v59  ;;  %1914 = vmatpush.msra.mxu1 %v4130_v58  ;;  %v5694_v59 = vld [vmem:[#allocation35_spill] sm:$0xff]  ;;  %v5696_v58 = vld [vmem:[#allocation37_spill] sm:$0xff] }
 0x373   : > { %1934 = vmatpush.msra.mxu2 %v4133_v9  ;;  %1895 = vmatpush.msra.mxu0 %v4139_v11  ;;  %v5697_v9 = vld [vmem:[#allocation38_spill] sm:$0xff]  ;;  %v5699_v11 = vld [vmem:[#allocation40_spill] sm:$0xff] }
 0x374   : > { %1954 = vmatpush.msra.mxu3 %v4136_v10  ;;  %1915 = vmatpush.msra.mxu1 %v4142_v12  ;;  %v5698_v10 = vld [vmem:[#allocation39_spill] sm:$0xff]  ;;  %v5700_v12 = vld [vmem:[#allocation41_spill] sm:$0xff] }
 0x375   : > { %1935 = vmatpush.msra.mxu2 %v4145_v13  ;;  %1896 = vmatpush.msra.mxu0 %v4151_v15  ;;  %v5701_v13 = vld [vmem:[#allocation42_spill] sm:$0xff]  ;;  %v5703_v15 = vld [vmem:[#allocation44_spill] sm:$0xff] }
 0x376   : > { %1955 = vmatpush.msra.mxu3 %v4148_v14  ;;  %1916 = vmatpush.msra.mxu1 %v4154_v16  ;;  %v5702_v14 = vld [vmem:[#allocation43_spill] sm:$0xff]  ;;  %v5704_v16 = vld [vmem:[#allocation45_spill] sm:$0xff] }
 0x377   : > { %1936 = vmatpush.msra.mxu2 %v4157_v17  ;;  %1897 = vmatpush.msra.mxu0 %v4163_v19  ;;  %v5705_v17 = vld [vmem:[#allocation46_spill] sm:$0xff]  ;;  %v5707_v19 = vld [vmem:[#allocation48_spill] sm:$0xff] }
 0x378   : > { %1956 = vmatpush.msra.mxu3 %v4160_v18  ;;  %1917 = vmatpush.msra.mxu1 %v4166_v20  ;;  %v5706_v18 = vld [vmem:[#allocation47_spill] sm:$0xff]  ;;  %v5708_v20 = vld [vmem:[#allocation49_spill] sm:$0xff] }
 0x379   : > { %1937 = vmatpush.msra.mxu2 %v4169_v21  ;;  %1898 = vmatpush.msra.mxu0 %v4175_v22  ;;  %v5709_v21 = vld [vmem:[#allocation50_spill] sm:$0xff]  ;;  %v5711_v22 = vld [vmem:[#allocation52_spill] sm:$0xff] }
 0x37a   : > { %1957 = vmatpush.msra.mxu3 %v4172_v3  ;;  %1918 = vmatpush.msra.mxu1 %v5683_v50  ;;  %v5710_v3 = vld [vmem:[#allocation51_spill] sm:$0xff]  ;;  %v5712_v50 = vld [vmem:[#allocation53_spill] sm:$0xff] }
 0x37b   : > { %1938 = vmatpush.msra.mxu2 %v5684_v51  ;;  %1899 = vmatpush.msra.mxu0 %v5686_v55  ;;  %v5713_v51 = vld [vmem:[#allocation54_spill] sm:$0xff]  ;;  %v5715_v55 = vld [vmem:[#allocation56_spill] sm:$0xff] }
 0x37c   : > { %1958 = vmatpush.msra.mxu3 %v5685_v8  ;;  %1919 = vmatpush.msra.mxu1 %v5687_v0  ;;  %v5714_v8 = vld [vmem:[#allocation55_spill] sm:$0xff]  ;;  %v5716_v0 = vld [vmem:[#allocation57_spill] sm:$0xff] }
 0x37d   : > { %1939 = vmatpush.msra.mxu2 %v5688_v60  ;;  %1900 = vmatpush.msra.mxu0 %v5690_v4  ;;  %v5717_v60 = vld [vmem:[#allocation58_spill] sm:$0xff] }
 0x37e   : > { %1959 = vmatpush.msra.mxu3 %v5689_v54  ;;  %1920 = vmatpush.msra.mxu1 %v5691_v61 }
 0x37f   : > { %1940 = vmatpush.msra.mxu2 %v5692_v52  ;;  %1901 = vmatpush.msra.mxu0 %v5694_v59  ;;  %v5718_v59 = vld [vmem:[#allocation108_spill] sm:$0xff] }
 0x380   : > { %1960 = vmatpush.msra.mxu3 %v5693_v63  ;;  %1921 = vmatpush.msra.mxu1 %v5695_v5 }
 0x381   : > { %1941 = vmatpush.msra.mxu2 %v5696_v58  ;;  %1902 = vmatpush.msra.mxu0 %v5698_v10  ;;  %v5719_v58 = vld [vmem:[#allocation109_spill] sm:$0xff] }
 0x382   : > { %1961 = vmatpush.msra.mxu3 %v5697_v9  ;;  %1922 = vmatpush.msra.mxu1 %v5699_v11 }
 0x383   : > { %1942 = vmatpush.msra.mxu2 %v5700_v12  ;;  %1903 = vmatpush.msra.mxu0 %v5702_v14  ;;  %v5720_v14 = vld [vmem:[#allocation111_spill] sm:$0xff] }
 0x384   : > { %1962 = vmatpush.msra.mxu3 %v5701_v13  ;;  %1923 = vmatpush.msra.mxu1 %v5703_v15 }
 0x385   : > { %1943 = vmatpush.msra.mxu2 %v5704_v16  ;;  %1904 = vmatpush.msra.mxu0 %v5706_v18 }
 0x386   : > { %1963 = vmatpush.msra.mxu3 %v5705_v17  ;;  %1924 = vmatpush.msra.mxu1 %v5707_v19 }
 0x387   : > { %1944 = vmatpush.msra.mxu2 %v5708_v20  ;;  %1905 = vmatpush.msra.mxu0 %v5710_v3 }
 0x388   : > { %1964 = vmatpush.msra.mxu3 %v5709_v21  ;;  %1925 = vmatpush.msra.mxu1 %v5711_v22 }
 0x389   : > { %1945 = vmatpush.msra.mxu2 %v5712_v50  ;;  %1906 = vmatpush.msra.mxu0 %v5714_v8 }
 0x38a   : > { %1965 = vmatpush.msra.mxu3 %v5713_v51  ;;  %1926 = vmatpush.msra.mxu1 %v5715_v55  ;;  %v5721_v51 = vld [vmem:[#allocation110_spill] sm:$0xff] }
 0x38b   : > { %1946 = vmatpush.msra.mxu2 %v5716_v0 }
 0x38c   : > { %1966 = vmatpush.msra.mxu3 %v5717_v60 }
 0x3ba   : > { %v4769_v54 = vpop.f32.mrf.mxu0  ;;  %v4771_v4 = vpop.f32.mrf.mxu1 }
 0x3c1   : > { %v4773_v61 = vpop.f32.mrf.mxu3  ;;  %v4777_v12 = vpop.f32.mrf.mxu2 }
 0x3c2   : > { %v1618_v52 = vpop.f32.mrf.mxu0  ;;  %v1638_v63 = vpop.f32.mrf.mxu1 }
 0x3c3   : > { %v1681_v5 = vadd.f32 %v1618_v52, %v5718_v59  ;;  %v1682_v9 = vadd.f32 %v1638_v63, %v5719_v58 }
 0x3c5   : > { %v2446_v10 = vmul.f32 -1.442695, %v1681_v5  ;;  %v2447_v11 = vmul.f32 -1.442695, %v1682_v9 }
 0x3c7   : > { %2588 = vpow2.f32 %v2446_v10 }
 0x3c8   : > { %2590 = vpow2.f32 %v2447_v11 }
 0x3c9   : > { %v1678_v13 = vpop.f32.mrf.mxu3  ;;  %v1658_v21 = vpop.f32.mrf.mxu2 }
 0x3ca   : > { %v1684_v15 = vadd.f32 %v1678_v13, %v5720_v14  ;;  %v1683_v8 = vadd.f32 %v1658_v21, %v5721_v51 }
 0x3cc   : > { %v2448_v16 = vmul.f32 -1.442695, %v1684_v15 }
 0x3cd   : > { %v2589_v17 = vpop.eup %2588 }
 0x3ce   : > { %v2591_v18 = vpop.eup %2590  ;;  %v1688_v19 = vadd.f32 1.0, %v2589_v17  ;;  %2592 = vpow2.f32 %v2448_v16 }
 0x3cf   : > { %v1707_v20 = vadd.f32 1.0, %v2591_v18 }
 0x3d0   : > { %2594 = vrcp.f32 %v1688_v19  ;;  %v1700_v59 = vand.u32 2147483648, %v1688_v19  ;;  %v1698_v9 = vand.u32 2147483647, %v1688_v19  ;;  %vm1694_vm3 = vweird.f32 %v1688_v19 }
 0x3d1   : > { %2596 = vrcp.f32 %v1707_v20  ;;  %v1719_v5 = vand.u32 2147483648, %v1707_v20  ;;  %v1717_v11 = vand.u32 2147483647, %v1707_v20  ;;  %vm1713_vm4 = vweird.f32 %v1707_v20 }
 0x3d2   : > { %v1701_v15 = vor.u32 1.1754944e-38, %v1700_v59  ;;  %vm1699_vm7 = vcmp.eq.f32.partialorder %v1698_v9, 8.507059e+37 }
 0x3d3   : > { %v1720_v18 = vor.u32 1.1754944e-38, %v1719_v5  ;;  %vm1718_vm8 = vcmp.eq.f32.partialorder %v1717_v11, 8.507059e+37 }
 0x3d4   : > { %v2593_v3 = vpop.eup %2592 }
 0x3d5   : > { %v1727_v22 = vadd.f32 1.0, %v2593_v3 }
 0x3d6   : > { %v2595_v50 = vpop.eup %2594 }
 0x3d7   : > { %v2597_v55 = vpop.eup %2596  ;;  %v1690_v0 = vmul.f32 %v2595_v50, %v1688_v19  ;;  %2598 = vrcp.f32 %v1727_v22  ;;  %vm1695_vm1 = vweird.f32 %v2595_v50  ;;  %v1739_v59 = vand.u32 2147483648, %v1727_v22 }
 0x3d8   : > { %v1709_v60 = vmul.f32 %v2597_v55, %v1707_v20  ;;  %2600 = vtanh.f32 %v1683_v8  ;;  %vm1714_vm2 = vweird.f32 %v2597_v55  ;;  %vm1696_vm5 = vmor %vm1694_vm3, %vm1695_vm1  ;;  %vm1733_vm10 = vweird.f32 %v1727_v22 }
 0x3d9   : > { %v1691_v52 = vsub.f32 1.0, %v1690_v0  ;;  %vm1715_vm6 = vmor %vm1713_vm4, %vm1714_vm2  ;;  %v1740_v9 = vor.u32 1.1754944e-38, %v1739_v59  ;;  %v5747_v59 = vld [vmem:[#allocation84_spill] sm:$0xff] }
 0x3da   : > { %v1710_v63 = vsub.f32 1.0, %v1709_v60 }
 0x3db   : > { %v1692_v58 = vmul.f32 %v2595_v50, %v1691_v52 }
 0x3dc   : > { %v1711_v10 = vmul.f32 %v2597_v55, %v1710_v63 }
 0x3dd   : > { %v2599_v13 = vpop.eup %2598  ;;  %v1693_v14 = vadd.f32 %v2595_v50, %v1692_v58 }
 0x3de   : > { %v1712_v16 = vadd.f32 %v2597_v55, %v1711_v10  ;;  %v1729_v17 = vmul.f32 %v2599_v13, %v1727_v22  ;;  %v2601_v3 = vpop.eup %2600  ;;  %vm1734_vm9 = vweird.f32 %v2599_v13 }
 0x3df   : > { %v1697_v21 = vsel %vm1696_vm5, %v2595_v50, %v1693_v14  ;;  %v1737_v50 = vand.u32 2147483647, %v1727_v22  ;;  %vm1735_vm11 = vmor %vm1733_vm10, %vm1734_vm9  ;;  %v5723_v22 = vld [vmem:[#allocation60_spill] sm:$0xff]  ;;  %v5725_v14 = vld [vmem:[#allocation62_spill] sm:$0xff] }
 0x3e0   : > { %v1702_v51 = vsel %vm1699_vm7, %v1701_v15, %v1697_v21  ;;  %v1716_v8 = vsel %vm1715_vm6, %v2597_v55, %v1712_v16  ;;  %v1730_v0 = vsub.f32 1.0, %v1729_v17  ;;  %v5733_v15 = vld [vmem:[#allocation70_spill] sm:$0xff]  ;;  %v5734_v16 = vld [vmem:[#allocation71_spill] sm:$0xff]  ;;  %v5735_v17 = vld [vmem:[#allocation72_spill] sm:$0xff] }
 0x3e1   : > { %v1721_v60 = vsel %vm1718_vm8, %v1720_v18, %v1716_v8  ;;  %v1744_v52 = vmul.f32 %v2601_v3, %v1702_v51  ;;  %vm1738_vm12 = vcmp.eq.f32.partialorder %v1737_v50, 8.507059e+37  ;;  %v5736_v18 = vld [vmem:[#allocation73_spill] sm:$0xff]  ;;  %v5737_v21 = vld [vmem:[#allocation74_spill] sm:$0xff]  ;;  %v5738_v3 = vld [vmem:[#allocation75_spill] sm:$0xff] }
 0x3e2   : > { %v1743_v63 = vmul.f32 %v1721_v60, %v4296_v32  ;;  %v1731_v58 = vmul.f32 %v2599_v13, %v1730_v0  ;;  %v5722_v32 = vld [vmem:[#allocation59_spill] sm:$0xff]  ;;  %v5739_v51 = vld [vmem:[#allocation76_spill] sm:$0xff]  ;;  %v5740_v8 = vld [vmem:[#allocation77_spill] sm:$0xff] }
 0x3e3   : > { %v5741_v0 = vld [vmem:[#allocation78_spill] sm:$0xff]  ;;  %v5742_v60 = vld [vmem:[#allocation79_spill] sm:$0xff]  ;;  %v5748_v50 = vld [vmem:[#allocation85_spill] sm:$0xff] }
 0x3e4   : > { %v4782_v19 = vadd.f32 %v1744_v52, %v1743_v63  ;;  %v1732_v20 = vadd.f32 %v2599_v13, %v1731_v58  ;;  %v5743_v52 = vld [vmem:[#allocation80_spill] sm:$0xff]  ;;  %v5744_v63 = vld [vmem:[#allocation81_spill] sm:$0xff]  ;;  %v5745_v58 = vld [vmem:[#allocation82_spill] sm:$0xff] }
 0x3e6   : > { %2602 = vtanh.f32 %v4782_v19  ;;  %v1736_v5 = vsel %vm1735_vm11, %v2599_v13, %v1732_v20  ;;  %v5724_v13 = vld [vmem:[#allocation61_spill] sm:$0xff]  ;;  %v5746_v20 = vld [vmem:[#allocation83_spill] sm:$0xff] }
 0x3e7   : > { %v1741_v10 = vsel %vm1738_vm12, %v1740_v9, %v1736_v5  ;;  %v5749_v5 = vld [vmem:[#allocation86_spill] sm:$0xff]  ;;  %v5750_v9 = vld [vmem:[#allocation87_spill] sm:$0xff] }
 0x3ec   : > { %v2603_v55 = vpop.eup %2602 }
 0x3ed   : > { %v4785_v11 = vmul.f32 %v2603_v55, %v1741_v10  ;;  %v5751_v55 = vld [vmem:[#allocation88_spill] sm:$0xff]  ;;  %v5752_v10 = vld [vmem:[#allocation89_spill] sm:$0xff] }
 0x3ef   : > { %1764 = vmatmul.f32.vlgmr.msrb.gmra.mxu0 %v4785_v11  ;;  %1784 = vmatmul.f32.vlgmr.msrb.gmra.mxu1 %v4785_v11 }
 0x3f0   : > { %1804 = vmatmul.f32.vlgmr.msrb.gmra.mxu2 %v4785_v11  ;;  %1824 = vmatmul.f32.vlgmr.msrb.gmra.mxu3 %v4785_v11 }
 0x3f1   : > { %1975 = vmatpush.msrb.mxu0 %v4305_v38  ;;  %1995 = vmatpush.msrb.mxu1 %v4308_v1  ;;  %v5726_v38 = vld [vmem:[#allocation63_spill] sm:$0xff]  ;;  %v5727_v1 = vld [vmem:[#allocation64_spill] sm:$0xff] }
 0x3f2   : > { %2015 = vmatpush.msrb.mxu2 %v4311_v23  ;;  %2035 = vmatpush.msrb.mxu3 %v4314_v24  ;;  %v5728_v23 = vld [vmem:[#allocation65_spill] sm:$0xff]  ;;  %v5729_v24 = vld [vmem:[#allocation66_spill] sm:$0xff] }
 0x3f3   : > { %1976 = vmatpush.msrb.mxu0 %v4317_v25  ;;  %1996 = vmatpush.msrb.mxu1 %v4320_v27  ;;  %v5730_v25 = vld [vmem:[#allocation67_spill] sm:$0xff]  ;;  %v5731_v27 = vld [vmem:[#allocation68_spill] sm:$0xff] }
 0x3f4   : > { %2016 = vmatpush.msrb.mxu2 %v4323_v44  ;;  %2036 = vmatpush.msrb.mxu3 %v5722_v32  ;;  %v5732_v44 = vld [vmem:[#allocation69_spill] sm:$0xff]  ;;  %v5753_v32 = vld [vmem:[#allocation90_spill] sm:$0xff] }
 0x3f5   : > { %1977 = vmatpush.msrb.mxu0 %v5723_v22  ;;  %1997 = vmatpush.msrb.mxu1 %v5724_v13  ;;  %v5754_v22 = vld [vmem:[#allocation91_spill] sm:$0xff]  ;;  %v5755_v13 = vld [vmem:[#allocation92_spill] sm:$0xff] }
 0x3f6   : > { %2017 = vmatpush.msrb.mxu2 %v5725_v14  ;;  %2037 = vmatpush.msrb.mxu3 %v5726_v38  ;;  %v5756_v14 = vld [vmem:[#allocation93_spill] sm:$0xff]  ;;  %v5757_v38 = vld [vmem:[#allocation94_spill] sm:$0xff] }
 0x3f7   : > { %1978 = vmatpush.msrb.mxu0 %v5727_v1  ;;  %1998 = vmatpush.msrb.mxu1 %v5728_v23  ;;  %v5758_v1 = vld [vmem:[#allocation95_spill] sm:$0xff]  ;;  %v5759_v23 = vld [vmem:[#allocation96_spill] sm:$0xff] }
 0x3f8   : > { %2018 = vmatpush.msrb.mxu2 %v5729_v24  ;;  %2038 = vmatpush.msrb.mxu3 %v5730_v25  ;;  %v5760_v24 = vld [vmem:[#allocation97_spill] sm:$0xff]  ;;  %v5761_v25 = vld [vmem:[#allocation98_spill] sm:$0xff] }
 0x3f9   : > { %1979 = vmatpush.msrb.mxu0 %v5731_v27  ;;  %1999 = vmatpush.msrb.mxu1 %v5732_v44  ;;  %v5762_v27 = vld [vmem:[#allocation99_spill] sm:$0xff]  ;;  %v5763_v44 = vld [vmem:[#allocation100_spill] sm:$0xff] }
 0x3fa   : > { %2019 = vmatpush.msrb.mxu2 %v5733_v15  ;;  %2039 = vmatpush.msrb.mxu3 %v5734_v16  ;;  %v5764_v15 = vld [vmem:[#allocation101_spill] sm:$0xff]  ;;  %v5765_v16 = vld [vmem:[#allocation102_spill] sm:$0xff] }
 0x3fb   : > { %1980 = vmatpush.msrb.mxu0 %v5735_v17  ;;  %2000 = vmatpush.msrb.mxu1 %v5736_v18  ;;  %v5766_v17 = vld [vmem:[#allocation103_spill] sm:$0xff]  ;;  %v5767_v18 = vld [vmem:[#allocation132_spill] sm:$0xff] }
 0x3fc   : > { %2020 = vmatpush.msrb.mxu2 %v5737_v21  ;;  %2040 = vmatpush.msrb.mxu3 %v5738_v3  ;;  %v5768_v21 = vld [vmem:[#allocation148_spill] sm:$0xff]  ;;  %v5769_v3 = vld [vmem:[#allocation114_spill] sm:$0xff] }
 0x3fd   : > { %1981 = vmatpush.msrb.mxu0 %v5739_v51  ;;  %2001 = vmatpush.msrb.mxu1 %v5740_v8  ;;  %v5770_v51 = vld [vmem:[#allocation115_spill] sm:$0xff]  ;;  %v5771_v8 = vld [vmem:[#allocation116_spill] sm:$0xff] }
 0x3fe   : > { %2021 = vmatpush.msrb.mxu2 %v5741_v0  ;;  %2041 = vmatpush.msrb.mxu3 %v5742_v60  ;;  %v5772_v0 = vld [vmem:[#allocation117_spill] sm:$0xff]  ;;  %v5773_v60 = vld [vmem:[#allocation118_spill] sm:$0xff] }
 0x3ff   : > { %1982 = vmatpush.msrb.mxu0 %v5743_v52  ;;  %2002 = vmatpush.msrb.mxu1 %v5744_v63  ;;  %v5774_v52 = vld [vmem:[#allocation119_spill] sm:$0xff]  ;;  %v5775_v63 = vld [vmem:[#allocation120_spill] sm:$0xff] }
 0x400   : > { %2022 = vmatpush.msrb.mxu2 %v5745_v58  ;;  %2042 = vmatpush.msrb.mxu3 %v5746_v20  ;;  %v5776_v58 = vld [vmem:[#allocation121_spill] sm:$0xff]  ;;  %v5777_v20 = vld [vmem:[#allocation122_spill] sm:$0xff] }
 0x401   : > { %1983 = vmatpush.msrb.mxu0 %v5747_v59  ;;  %2003 = vmatpush.msrb.mxu1 %v5748_v50  ;;  %v5778_v59 = vld [vmem:[#allocation123_spill] sm:$0xff]  ;;  %v5779_v50 = vld [vmem:[#allocation20_spill] sm:$0xff] }
 0x402   : > { %2023 = vmatpush.msrb.mxu2 %v5749_v5  ;;  %2043 = vmatpush.msrb.mxu3 %v5750_v9  ;;  %v1535_v5 = vadd.f32 %v4769_v54, %v5779_v50  ;;  %v5780_v9 = vld [vmem:[#allocation21_spill] sm:$0xff] }
 0x403   : > { %1984 = vmatpush.msrb.mxu0 %v5751_v55  ;;  %2004 = vmatpush.msrb.mxu1 %v5752_v10  ;;  %v1555_v55 = vadd.f32 %v4771_v4, %v5780_v9 }
 0x404   : > { %2024 = vmatpush.msrb.mxu2 %v5753_v32  ;;  %2044 = vmatpush.msrb.mxu3 %v5754_v22 }
 0x405   : > { %1985 = vmatpush.msrb.mxu0 %v5755_v13  ;;  %2005 = vmatpush.msrb.mxu1 %v5756_v14 }
 0x406   : > { %2025 = vmatpush.msrb.mxu2 %v5757_v38  ;;  %2045 = vmatpush.msrb.mxu3 %v5758_v1  ;;  %v5781_v1 = vld [vmem:[#allocation22_spill] sm:$0xff] }
 0x407   : > { %1986 = vmatpush.msrb.mxu0 %v5759_v23  ;;  %2006 = vmatpush.msrb.mxu1 %v5760_v24  ;;  %v1595_v23 = vadd.f32 %v4773_v61, %v5781_v1 }
 0x408   : > { %2026 = vmatpush.msrb.mxu2 %v5761_v25  ;;  %2046 = vmatpush.msrb.mxu3 %v5762_v27 }
 0x409   : > { %1987 = vmatpush.msrb.mxu0 %v5763_v44  ;;  %2007 = vmatpush.msrb.mxu1 %v5764_v15 }
 0x40a   : > { %2027 = vmatpush.msrb.mxu2 %v5765_v16  ;;  %2047 = vmatpush.msrb.mxu3 %v5766_v17 }
 0x40b   : > { %1988 = vmatpush.msrb.mxu0 %v5767_v18  ;;  %2008 = vmatpush.msrb.mxu1 %v5768_v21  ;;  %v5782_v18 = vld [vmem:[#allocation23_spill] sm:$0xff] }
 0x40c   : > { %2028 = vmatpush.msrb.mxu2 %v5769_v3  ;;  %2048 = vmatpush.msrb.mxu3 %v5770_v51  ;;  %v1575_v21 = vadd.f32 %v4777_v12, %v5782_v18 }
 0x40d   : > { %1989 = vmatpush.msrb.mxu0 %v5771_v8  ;;  %2009 = vmatpush.msrb.mxu1 %v5772_v0 }
 0x40e   : > { %2029 = vmatpush.msrb.mxu2 %v5773_v60  ;;  %2049 = vmatpush.msrb.mxu3 %v5774_v52 }
 0x40f   : > { %1990 = vmatpush.msrb.mxu0 %v5775_v63  ;;  %2010 = vmatpush.msrb.mxu1 %v5776_v58 }
 0x410   : > { %2030 = vmatpush.msrb.mxu2 %v5777_v20  ;;  %2050 = vmatpush.msrb.mxu3 %v5778_v59 }
 0x46c   : > { %v1765_v10 = vpop.f32.mrf.mxu0  ;;  %v1785_v32 = vpop.f32.mrf.mxu1 }
 0x46d   : > { %v1766_v22 = vadd.f32 %v1765_v10, %v1535_v5  ;;  %v1786_v13 = vadd.f32 %v1785_v32, %v1555_v55 }
 0x46f   : > { %v2449_v14 = vmul.f32 -1.442695, %v1766_v22  ;;  %v2450_v38 = vmul.f32 -1.442695, %v1786_v13 }
 0x471   : > { %2604 = vpow2.f32 %v2449_v14 }
 0x472   : > { %2606 = vpow2.f32 %v2450_v38 }
 0x473   : > { %v1825_v24 = vpop.f32.mrf.mxu3  ;;  %v1805_v4 = vpop.f32.mrf.mxu2 }
 0x474   : > { %v1826_v25 = vadd.f32 %v1825_v24, %v1595_v23  ;;  %v1806_v8 = vadd.f32 %v1805_v4, %v1575_v21 }
 0x476   : > { %v2451_v27 = vmul.f32 -1.442695, %v1826_v25 }
 0x477   : > { %v2605_v44 = vpop.eup %2604 }
 0x478   : > { %v2607_v15 = vpop.eup %2606  ;;  %v1831_v54 = vadd.f32 1.0, %v2605_v44  ;;  %2608 = vpow2.f32 %v2451_v27 }
 0x479   : > { %v1850_v16 = vadd.f32 1.0, %v2607_v15 }
 0x47a   : > { %2610 = vrcp.f32 %v1831_v54  ;;  %v1843_v58 = vand.u32 2147483648, %v1831_v54  ;;  %v1841_v5 = vand.u32 2147483647, %v1831_v54  ;;  %vm1837_vm15 = vweird.f32 %v1831_v54 }
 0x47b   : > { %2612 = vrcp.f32 %v1850_v16  ;;  %v1862_v20 = vand.u32 2147483648, %v1850_v16  ;;  %v1860_v10 = vand.u32 2147483647, %v1850_v16  ;;  %vm1856_vm0 = vweird.f32 %v1850_v16 }
 0x47c   : > { %v1844_v22 = vor.u32 1.1754944e-38, %v1843_v58  ;;  %vm1842_vm3 = vcmp.eq.f32.partialorder %v1841_v5, 8.507059e+37  ;;  %v5806_v58 = vld [vmem:[#allocation151_spill] sm:$0xff]  ;;  %v5809_v5 = vld [vmem:[#allocation154_spill] sm:$0xff] }
 0x47d   : > { %v1863_v38 = vor.u32 1.1754944e-38, %v1862_v20  ;;  %vm1861_vm4 = vcmp.eq.f32.partialorder %v1860_v10, 8.507059e+37  ;;  %v5807_v20 = vld [vmem:[#allocation152_spill] sm:$0xff] }
 0x47e   : > { %v2609_v17 = vpop.eup %2608  ;;  %v5811_v10 = vld [vmem:[#allocation156_spill] sm:$0xff] }
 0x47f   : > { %v1870_v3 = vadd.f32 1.0, %v2609_v17 }
 0x480   : > { %v2611_v51 = vpop.eup %2610 }
 0x481   : > { %v2613_v61 = vpop.eup %2612  ;;  %v1833_v0 = vmul.f32 %v2611_v51, %v1831_v54  ;;  %2614 = vrcp.f32 %v1870_v3  ;;  %vm1838_vm13 = vweird.f32 %v2611_v51  ;;  %vm1876_vm6 = vweird.f32 %v1870_v3 }
 0x482   : > { %v1852_v60 = vmul.f32 %v2613_v61, %v1850_v16  ;;  %2616 = vtanh.f32 %v1806_v8  ;;  %vm1857_vm14 = vweird.f32 %v2613_v61  ;;  %vm1839_vm1 = vmor %vm1837_vm15, %vm1838_vm13  ;;  %v1882_v8 = vand.u32 2147483648, %v1870_v3 }
 0x483   : > { %v1834_v52 = vsub.f32 1.0, %v1833_v0  ;;  %vm1858_vm2 = vmor %vm1856_vm0, %vm1857_vm14 }
 0x484   : > { %v1853_v63 = vsub.f32 1.0, %v1852_v60  ;;  %v1883_v60 = vor.u32 1.1754944e-38, %v1882_v8 }
 0x485   : > { %v1835_v59 = vmul.f32 %v2611_v51, %v1834_v52 }
 0x486   : > { %v1854_v55 = vmul.f32 %v2613_v61, %v1853_v63 }
 0x487   : > { %v2615_v32 = vpop.eup %2614  ;;  %v1836_v12 = vadd.f32 %v2611_v51, %v1835_v59  ;;  %v5808_v59 = vld [vmem:[#allocation153_spill] sm:$0xff] }
 0x488   : > { %v1855_v13 = vadd.f32 %v2613_v61, %v1854_v55  ;;  %v1872_v14 = vmul.f32 %v2615_v32, %v1870_v3  ;;  %v2617_v24 = vpop.eup %2616  ;;  %vm1877_vm5 = vweird.f32 %v2615_v32  ;;  %v5810_v55 = vld [vmem:[#allocation155_spill] sm:$0xff] }
 0x489   : > { %v1840_v23 = vsel %vm1839_vm1, %v2611_v51, %v1836_v12  ;;  %v1880_v51 = vand.u32 2147483647, %v1870_v3  ;;  %vm1878_vm7 = vmor %vm1876_vm6, %vm1877_vm5  ;;  %v5805_v3 = vld [vmem:[#allocation150_spill] sm:$0xff] }
 0x48a   : > { %v1845_v25 = vsel %vm1842_vm3, %v1844_v22, %v1840_v23  ;;  %v1859_v27 = vsel %vm1858_vm2, %v2613_v61, %v1855_v13  ;;  %v1873_v44 = vsub.f32 1.0, %v1872_v14  ;;  %v5813_v12 = vld [vmem:[#allocation158_spill] sm:$0xff]  ;;  %v5814_v22 = vld [vmem:[#allocation159_spill] sm:$0xff]  ;;  %v5815_v13 = vld [vmem:[#allocation160_spill] sm:$0xff] }
 0x48b   : > { %v1864_v15 = vsel %vm1861_vm4, %v1863_v38, %v1859_v27  ;;  %v1887_v4 = vmul.f32 %v2617_v24, %v1845_v25  ;;  %vm1881_vm8 = vcmp.eq.f32.partialorder %v1880_v51, 8.507059e+37  ;;  %v5816_v14 = vld [vmem:[#allocation161_spill] sm:$0xff]  ;;  %v5817_v38 = vld [vmem:[#allocation162_spill] sm:$0xff]  ;;  %v5818_v23 = vld [vmem:[#allocation163_spill] sm:$0xff] }
 0x48c   : > { %v1886_v17 = vmul.f32 %v1864_v15, %v4506_v45  ;;  %v1874_v21 = vmul.f32 %v2615_v32, %v1873_v44  ;;  %v5783_v45 = vld [vmem:[#allocation124_spill] sm:$0xff]  ;;  %v5820_v25 = vld [vmem:[#allocation165_spill] sm:$0xff] }
 0x48d   : > { %v5819_v24 = vld [vmem:[#allocation164_spill] sm:$0xff] }
 0x48e   : > { %v4864_v54 = vadd.f32 %v1887_v4, %v1886_v17  ;;  %v1875_v16 = vadd.f32 %v2615_v32, %v1874_v21  ;;  %v5821_v21 = vld [vmem:[#allocation112_spill] sm:$0xff] }
 0x490   : > { %2618 = vtanh.f32 %v4864_v54  ;;  %v1879_v0 = vsel %vm1878_vm7, %v2615_v32, %v1875_v16  ;;  %v5812_v32 = vld [vmem:[#allocation157_spill] sm:$0xff] }
 0x491   : > { %v1884_v52 = vsel %vm1881_vm8, %v1883_v60, %v1879_v0  ;;  %v5822_v16 = vld [vmem:[#allocation113_spill] sm:$0xff] }
 0x496   : > { %v2619_v61 = vpop.eup %2618 }
 0x497   : > { %v1890_v63 = vmul.f32 %v2619_v61, %v1884_v52 }
 0x499   : > { %1907 = vmatmul.f32.vlgmr.msra.gmra.mxu0 %v1890_v63  ;;  %1927 = vmatmul.f32.vlgmr.msra.gmra.mxu1 %v1890_v63 }
 0x49a   : > { %1947 = vmatmul.f32.vlgmr.msra.gmra.mxu2 %v1890_v63  ;;  %1967 = vmatmul.f32.vlgmr.msra.gmra.mxu3 %v1890_v63 }
 0x49b   : > { %2122 = vmatpush.msra.mxu0 %v4509_v6  ;;  %2142 = vmatpush.msra.mxu1 %v4512_v39  ;;  %v5784_v6 = vld [vmem:[#allocation125_spill] sm:$0xff]  ;;  %v5785_v39 = vld [vmem:[#allocation128_spill] sm:$0xff] }
 0x49c   : > { %2162 = vmatpush.msra.mxu2 %v4515_v62  ;;  %2182 = vmatpush.msra.mxu3 %v4518_v34  ;;  %v5786_v62 = vld [vmem:[#allocation129_spill] sm:$0xff]  ;;  %v5787_v34 = vld [vmem:[#allocation130_spill] sm:$0xff] }
 0x49d   : > { %2123 = vmatpush.msra.mxu0 %v4521_v2  ;;  %2143 = vmatpush.msra.mxu1 %v4524_v57  ;;  %v5788_v2 = vld [vmem:[#allocation131_spill] sm:$0xff]  ;;  %v5789_v57 = vld [vmem:[#allocation133_spill] sm:$0xff] }
 0x49e   : > { %2163 = vmatpush.msra.mxu2 %v4527_v29  ;;  %2183 = vmatpush.msra.mxu3 %v4530_v49  ;;  %v5790_v29 = vld [vmem:[#allocation134_spill] sm:$0xff]  ;;  %v5791_v49 = vld [vmem:[#allocation135_spill] sm:$0xff] }
 0x49f   : > { %2124 = vmatpush.msra.mxu0 %v4533_v53  ;;  %2144 = vmatpush.msra.mxu1 %v4536_v31  ;;  %v5792_v53 = vld [vmem:[#allocation136_spill] sm:$0xff]  ;;  %v5793_v31 = vld [vmem:[#allocation137_spill] sm:$0xff] }
 0x4a0   : > { %2164 = vmatpush.msra.mxu2 %v4539_v40  ;;  %2184 = vmatpush.msra.mxu3 %v4542_v56  ;;  %v5794_v40 = vld [vmem:[#allocation138_spill] sm:$0xff]  ;;  %v5795_v56 = vld [vmem:[#allocation139_spill] sm:$0xff] }
 0x4a1   : > { %1991 = vmatmul.f32.vlgmr.msrb.gmra.mxu0 %v4785_v11  ;;  %2011 = vmatmul.f32.vlgmr.msrb.gmra.mxu1 %v4785_v11 }
 0x4a2   : > { %2031 = vmatmul.f32.vlgmr.msrb.gmra.mxu2 %v4785_v11  ;;  %2051 = vmatmul.f32.vlgmr.msrb.gmra.mxu3 %v4785_v11  ;;  %v5804_v11 = vld [vmem:[#allocation149_spill] sm:$0xff] }
 0x4a3   : > { %2125 = vmatpush.msra.mxu0 %v4549_v43  ;;  %2145 = vmatpush.msra.mxu1 %v4552_v37  ;;  %v5796_v43 = vld [vmem:[#allocation140_spill] sm:$0xff]  ;;  %v5797_v37 = vld [vmem:[#allocation141_spill] sm:$0xff] }
 0x4a4   : > { %2165 = vmatpush.msra.mxu2 %v4555_v30  ;;  %2185 = vmatpush.msra.mxu3 %v4558_v7  ;;  %v5798_v30 = vld [vmem:[#allocation142_spill] sm:$0xff]  ;;  %v5799_v7 = vld [vmem:[#allocation143_spill] sm:$0xff] }
 0x4a5   : > { %2126 = vmatpush.msra.mxu0 %v4561_v47  ;;  %2146 = vmatpush.msra.mxu1 %v4564_v41  ;;  %v5800_v47 = vld [vmem:[#allocation144_spill] sm:$0xff]  ;;  %v5801_v41 = vld [vmem:[#allocation145_spill] sm:$0xff] }
 0x4a6   : > { %2166 = vmatpush.msra.mxu2 %v4567_v33  ;;  %2186 = vmatpush.msra.mxu3 %v4570_v28  ;;  %v5802_v33 = vld [vmem:[#allocation146_spill] sm:$0xff]  ;;  %v5803_v28 = vld [vmem:[#allocation147_spill] sm:$0xff] }
 0x4a7   : > { %2127 = vmatpush.msra.mxu0 %v5783_v45  ;;  %2147 = vmatpush.msra.mxu1 %v5784_v6 }
 0x4a8   : > { %2167 = vmatpush.msra.mxu2 %v5785_v39  ;;  %2187 = vmatpush.msra.mxu3 %v5786_v62 }
 0x4a9   : > { %2128 = vmatpush.msra.mxu0 %v5787_v34  ;;  %2148 = vmatpush.msra.mxu1 %v5788_v2  ;;  %v5824_v34 = vld [vmem:[#allocation126_spill] sm:$0xff] }
 0x4aa   : > { %2168 = vmatpush.msra.mxu2 %v5789_v57  ;;  %2188 = vmatpush.msra.mxu3 %v5790_v29 }
 0x4ab   : > { %2129 = vmatpush.msra.mxu0 %v5791_v49  ;;  %2149 = vmatpush.msra.mxu1 %v5792_v53 }
 0x4ac   : > { %2169 = vmatpush.msra.mxu2 %v5793_v31  ;;  %2189 = vmatpush.msra.mxu3 %v5794_v40 }
 0x4ad   : > { %2130 = vmatpush.msra.mxu0 %v5795_v56  ;;  %2150 = vmatpush.msra.mxu1 %v5796_v43 }
 0x4ae   : > { %2170 = vmatpush.msra.mxu2 %v5797_v37  ;;  %2190 = vmatpush.msra.mxu3 %v5798_v30 }
 0x4af   : > { %2131 = vmatpush.msra.mxu0 %v5799_v7  ;;  %2151 = vmatpush.msra.mxu1 %v5800_v47 }
 0x4b0   : > { %2171 = vmatpush.msra.mxu2 %v5801_v41  ;;  %2191 = vmatpush.msra.mxu3 %v5802_v33 }
 0x4b1   : > { %2132 = vmatpush.msra.mxu0 %v5803_v28  ;;  %2152 = vmatpush.msra.mxu1 %v5804_v11 }
 0x4b2   : > { %2172 = vmatpush.msra.mxu2 %v5805_v3  ;;  %2192 = vmatpush.msra.mxu3 %v5806_v58 }
 0x4b3   : > { %2133 = vmatpush.msra.mxu0 %v5807_v20  ;;  %2153 = vmatpush.msra.mxu1 %v5808_v59 }
 0x4b4   : > { %2173 = vmatpush.msra.mxu2 %v5809_v5  ;;  %2193 = vmatpush.msra.mxu3 %v5810_v55 }
 0x4b5   : > { %2134 = vmatpush.msra.mxu0 %v5811_v10  ;;  %2154 = vmatpush.msra.mxu1 %v5812_v32 }
 0x4b6   : > { %2174 = vmatpush.msra.mxu2 %v5813_v12  ;;  %2194 = vmatpush.msra.mxu3 %v5814_v22 }
 0x4b7   : > { %2135 = vmatpush.msra.mxu0 %v5815_v13  ;;  %2155 = vmatpush.msra.mxu1 %v5816_v14 }
 0x4b8   : > { %2175 = vmatpush.msra.mxu2 %v5817_v38  ;;  %2195 = vmatpush.msra.mxu3 %v5818_v23 }
 0x4b9   : > { %2136 = vmatpush.msra.mxu0 %v5819_v24  ;;  %2156 = vmatpush.msra.mxu1 %v5820_v25 }
 0x4ba   : > { %2176 = vmatpush.msra.mxu2 %v4687_v35  ;;  %2196 = vmatpush.msra.mxu3 %v4690_v42 }
 0x4bb   : > { %2137 = vmatpush.msra.mxu0 %v4693_v46  ;;  %2157 = vmatpush.msra.mxu1 %v4696_v26 }
 0x4bc   : > { %2177 = vmatpush.msra.mxu2 %v4699_v36  ;;  %2197 = vmatpush.msra.mxu3 %v4702_v48  ;;  %v5823_v48 = vld [vmem:[#allocation127_spill] sm:$0xff] }
 0x516   : > { %v4935_v27 = vpop.f32.mrf.mxu0  ;;  %v4937_v44 = vpop.f32.mrf.mxu1 }
 0x51d   : > { %v4939_v15 = vpop.f32.mrf.mxu3  ;;  %v4943_v26 = vpop.f32.mrf.mxu2 }
 0x51e   : > { %v1992_v4 = vpop.f32.mrf.mxu0  ;;  %v2012_v17 = vpop.f32.mrf.mxu1 }
 0x51f   : > { %v2055_v35 = vadd.f32 %v1992_v4, %v5821_v21  ;;  %v2056_v42 = vadd.f32 %v2012_v17, %v5822_v16 }
 0x521   : > { %v2452_v8 = vmul.f32 -1.442695, %v2055_v35  ;;  %v2453_v46 = vmul.f32 -1.442695, %v2056_v42  ;;  %v1929_v35 = vadd.f32 %v4937_v44, %v5780_v9 }
 0x523   : > { %2620 = vpow2.f32 %v2452_v8 }
 0x524   : > { %2622 = vpow2.f32 %v2453_v46 }
 0x525   : > { %v2052_v36 = vpop.f32.mrf.mxu3  ;;  %v2032_v45 = vpop.f32.mrf.mxu2 }
 0x526   : > { %v2058_v51 = vadd.f32 %v2052_v36, %v5823_v48  ;;  %v2057_v2 = vadd.f32 %v2032_v45, %v5824_v34  ;;  %v1949_v45 = vadd.f32 %v4943_v26, %v5782_v18 }
 0x528   : > { %v2454_v0 = vmul.f32 -1.442695, %v2058_v51  ;;  %v1969_v51 = vadd.f32 %v4939_v15, %v5781_v1 }
 0x529   : > { %v2621_v60 = vpop.eup %2620 }
 0x52a   : > { %v2623_v61 = vpop.eup %2622  ;;  %v2062_v52 = vadd.f32 1.0, %v2621_v60  ;;  %2624 = vpow2.f32 %v2454_v0 }
 0x52b   : > { %v2081_v63 = vadd.f32 1.0, %v2623_v61 }
 0x52c   : > { %2626 = vrcp.f32 %v2062_v52  ;;  %v2074_v40 = vand.u32 2147483648, %v2062_v52  ;;  %v2072_v37 = vand.u32 2147483647, %v2062_v52  ;;  %vm2068_vm11 = vweird.f32 %v2062_v52 }
 0x52d   : > { %2628 = vrcp.f32 %v2081_v63  ;;  %v2093_v56 = vand.u32 2147483648, %v2081_v63  ;;  %v2091_v7 = vand.u32 2147483647, %v2081_v63  ;;  %vm2087_vm12 = vweird.f32 %v2081_v63 }
 0x52e   : > { %v2075_v33 = vor.u32 1.1754944e-38, %v2074_v40  ;;  %vm2073_vm15 = vcmp.eq.f32.partialorder %v2072_v37, 8.507059e+37 }
 0x52f   : > { %v2094_v3 = vor.u32 1.1754944e-38, %v2093_v56  ;;  %vm2092_vm0 = vcmp.eq.f32.partialorder %v2091_v7, 8.507059e+37 }
 0x530   : > { %v2625_v6 = vpop.eup %2624 }
 0x531   : > { %v2101_v39 = vadd.f32 1.0, %v2625_v6 }
 0x532   : > { %v2627_v62 = vpop.eup %2626 }
 0x533   : > { %v2629_v57 = vpop.eup %2628  ;;  %v2064_v29 = vmul.f32 %v2627_v62, %v2062_v52  ;;  %2630 = vrcp.f32 %v2101_v39  ;;  %vm2069_vm9 = vweird.f32 %v2627_v62  ;;  %v2113_v38 = vand.u32 2147483648, %v2101_v39 }
 0x534   : > { %v2083_v49 = vmul.f32 %v2629_v57, %v2081_v63  ;;  %2632 = vtanh.f32 %v2057_v2  ;;  %vm2088_vm10 = vweird.f32 %v2629_v57  ;;  %vm2070_vm13 = vmor %vm2068_vm11, %vm2069_vm9  ;;  %vm2107_vm2 = vweird.f32 %v2101_v39 }
 0x535   : > { %v2065_v53 = vsub.f32 1.0, %v2064_v29  ;;  %vm2089_vm14 = vmor %vm2087_vm12, %vm2088_vm10  ;;  %v2111_v23 = vand.u32 2147483647, %v2101_v39  ;;  %v2114_v25 = vor.u32 1.1754944e-38, %v2113_v38 }
 0x536   : > { %v2084_v31 = vsub.f32 1.0, %v2083_v49 }
 0x537   : > { %v2066_v43 = vmul.f32 %v2627_v62, %v2065_v53  ;;  %vm2112_vm4 = vcmp.eq.f32.partialorder %v2111_v23, 8.507059e+37 }
 0x538   : > { %v2085_v30 = vmul.f32 %v2629_v57, %v2084_v31 }
 0x539   : > { %v2631_v47 = vpop.eup %2630  ;;  %v2067_v41 = vadd.f32 %v2627_v62, %v2066_v43 }
 0x53a   : > { %v2086_v28 = vadd.f32 %v2629_v57, %v2085_v30  ;;  %v2103_v11 = vmul.f32 %v2631_v47, %v2101_v39  ;;  %v2633_v20 = vpop.eup %2632  ;;  %vm2108_vm1 = vweird.f32 %v2631_v47 }
 0x53b   : > { %v2071_v58 = vsel %vm2070_vm13, %v2627_v62, %v2067_v41  ;;  %vm2109_vm3 = vmor %vm2107_vm2, %vm2108_vm1 }
 0x53c   : > { %v2076_v59 = vsel %vm2073_vm15, %v2075_v33, %v2071_v58  ;;  %v2090_v5 = vsel %vm2089_vm14, %v2629_v57, %v2086_v28  ;;  %v2104_v55 = vsub.f32 1.0, %v2103_v11 }
 0x53d   : > { %v2095_v10 = vsel %vm2092_vm0, %v2094_v3, %v2090_v5  ;;  %v2118_v32 = vmul.f32 %v2633_v20, %v2076_v59 }
 0x53e   : > { %v2117_v12 = vmul.f32 %v2095_v10, %v4782_v19  ;;  %v2105_v22 = vmul.f32 %v2631_v47, %v2104_v55  ;;  %v1909_v19 = vadd.f32 %v4935_v27, %v5779_v50 }
 0x540   : > { %v2119_v13 = vadd.f32 %v2118_v32, %v2117_v12  ;;  %v2106_v14 = vadd.f32 %v2631_v47, %v2105_v22 }
 0x542   : > { %2634 = vtanh.f32 %v2119_v13  ;;  %2266 = vst [vmem:[#allocation3] sm:$0xff] %v2119_v13  ;;  %v2110_v24 = vsel %vm2109_vm3, %v2631_v47, %v2106_v14 }
 0x543   : > { %v2115_v17 = vsel %vm2112_vm4, %v2114_v25, %v2110_v24 }
 0x548   : > { %v2635_v4 = vpop.eup %2634 }
 0x549   : > { %v2121_v21 = vmul.f32 %v2635_v4, %v2115_v17 }
 0x54b   : > { %2138 = vmatmul.f32.vlgmr.msra.gmra.mxu0 %v2121_v21  ;;  %2265 = vst [vmem:[#allocation2] sm:$0xff] %v2121_v21  ;;  %2158 = vmatmul.f32.vlgmr.msra.gmra.mxu1 %v2121_v21 }
 0x54c   : > { %2178 = vmatmul.f32.vlgmr.msra.gmra.mxu2 %v2121_v21  ;;  %2198 = vmatmul.f32.vlgmr.msra.gmra.mxu3 %v2121_v21 }
 0x5c8   : > { %v2139_v16 = vpop.f32.mrf.mxu0  ;;  %v2159_v42 = vpop.f32.mrf.mxu1 }
 0x5c9   : > { %v2140_v8 = vadd.f32 %v2139_v16, %v1909_v19  ;;  %v2160_v46 = vadd.f32 %v2159_v42, %v1929_v35 }
 0x5cb   : > { %v2455_v36 = vmul.f32 -1.442695, %v2140_v8  ;;  %v2456_v48 = vmul.f32 -1.442695, %v2160_v46 }
 0x5cd   : > { %2636 = vpow2.f32 %v2455_v36 }
 0x5ce   : > { %2638 = vpow2.f32 %v2456_v48 }
 0x5cf   : > { %v2199_v0 = vpop.f32.mrf.mxu3  ;;  %v2179_v9 = vpop.f32.mrf.mxu2 }
 0x5d0   : > { %v2200_v60 = vadd.f32 %v2199_v0, %v1969_v51  ;;  %v2180_v62 = vadd.f32 %v2179_v9, %v1949_v45 }
 0x5d2   : > { %v2457_v61 = vmul.f32 -1.442695, %v2200_v60 }
 0x5d3   : > { %v2637_v52 = vpop.eup %2636 }
 0x5d4   : > { %v2639_v63 = vpop.eup %2638  ;;  %v2205_v50 = vadd.f32 1.0, %v2637_v52  ;;  %2640 = vpow2.f32 %v2457_v61 }
 0x5d5   : > { %v2224_v27 = vadd.f32 1.0, %v2639_v63 }
 0x5d6   : > { %2642 = vrcp.f32 %v2205_v50  ;;  %v2217_v29 = vand.u32 2147483648, %v2205_v50  ;;  %v2215_v31 = vand.u32 2147483647, %v2205_v50  ;;  %vm2211_vm7 = vweird.f32 %v2205_v50 }
 0x5d7   : > { %2644 = vrcp.f32 %v2224_v27  ;;  %v2236_v49 = vand.u32 2147483648, %v2224_v27  ;;  %v2234_v56 = vand.u32 2147483647, %v2224_v27  ;;  %vm2230_vm8 = vweird.f32 %v2224_v27 }
 0x5d8   : > { %v2218_v26 = vor.u32 1.1754944e-38, %v2217_v29  ;;  %vm2216_vm11 = vcmp.eq.f32.partialorder %v2215_v31, 8.507059e+37 }
 0x5d9   : > { %v2237_v7 = vor.u32 1.1754944e-38, %v2236_v49  ;;  %vm2235_vm12 = vcmp.eq.f32.partialorder %v2234_v56, 8.507059e+37 }
 0x5da   : > { %v2641_v44 = vpop.eup %2640 }
 0x5db   : > { %v2244_v6 = vadd.f32 1.0, %v2641_v44 }
 0x5dc   : > { %v2643_v39 = vpop.eup %2642 }
 0x5dd   : > { %v2645_v1 = vpop.eup %2644  ;;  %v2207_v15 = vmul.f32 %v2643_v39, %v2205_v50  ;;  %2646 = vrcp.f32 %v2244_v6  ;;  %vm2212_vm5 = vweird.f32 %v2643_v39  ;;  %v2256_v10 = vand.u32 2147483648, %v2244_v6 }
 0x5de   : > { %v2226_v34 = vmul.f32 %v2645_v1, %v2224_v27  ;;  %2648 = vtanh.f32 %v2180_v62  ;;  %vm2231_vm6 = vweird.f32 %v2645_v1  ;;  %vm2213_vm9 = vmor %vm2211_vm7, %vm2212_vm5  ;;  %vm2250_vm14 = vweird.f32 %v2244_v6 }
 0x5df   : > { %v2208_v2 = vsub.f32 1.0, %v2207_v15  ;;  %vm2232_vm10 = vmor %vm2230_vm8, %vm2231_vm6  ;;  %v2254_v32 = vand.u32 2147483647, %v2244_v6  ;;  %v2257_v22 = vor.u32 1.1754944e-38, %v2256_v10 }
 0x5e0   : > { %v2227_v57 = vsub.f32 1.0, %v2226_v34 }
 0x5e1   : > { %v2209_v53 = vmul.f32 %v2643_v39, %v2208_v2  ;;  %vm2255_vm0 = vcmp.eq.f32.partialorder %v2254_v32, 8.507059e+37 }
 0x5e2   : > { %v2228_v40 = vmul.f32 %v2645_v1, %v2227_v57 }
 0x5e3   : > { %v2647_v43 = vpop.eup %2646  ;;  %v2210_v18 = vadd.f32 %v2643_v39, %v2209_v53 }
 0x5e4   : > { %v2229_v37 = vadd.f32 %v2645_v1, %v2228_v40  ;;  %v2246_v30 = vmul.f32 %v2647_v43, %v2244_v6  ;;  %v2649_v41 = vpop.eup %2648  ;;  %vm2251_vm13 = vweird.f32 %v2647_v43 }
 0x5e5   : > { %v2214_v47 = vsel %vm2213_vm9, %v2643_v39, %v2210_v18  ;;  %vm2252_vm15 = vmor %vm2250_vm14, %vm2251_vm13 }
 0x5e6   : > { %v2219_v33 = vsel %vm2216_vm11, %v2218_v26, %v2214_v47  ;;  %v2233_v28 = vsel %vm2232_vm10, %v2645_v1, %v2229_v37  ;;  %v2247_v11 = vsub.f32 1.0, %v2246_v30 }
 0x5e7   : > { %v2238_v3 = vsel %vm2235_vm12, %v2237_v7, %v2233_v28  ;;  %v2261_v58 = vmul.f32 %v2649_v41, %v2219_v33 }
 0x5e8   : > { %v2260_v20 = vmul.f32 %v2238_v3, %v4864_v54  ;;  %v2248_v59 = vmul.f32 %v2647_v43, %v2247_v11 }
 0x5ea   : > { %v2262_v5 = vadd.f32 %v2261_v58, %v2260_v20  ;;  %v2249_v55 = vadd.f32 %v2647_v43, %v2248_v59 }
 0x5ec   : > { %2650 = vtanh.f32 %v2262_v5  ;;  %2268 = vst [vmem:[#allocation5] sm:$0xff] %v2262_v5  ;;  %v2253_v12 = vsel %vm2252_vm15, %v2647_v43, %v2249_v55 }
 0x5ed   : > { %v2258_v14 = vsel %vm2255_vm0, %v2257_v22, %v2253_v12 }
 0x5f1   : > { %2272 = sbr.rel (%p2458_p8) target bundleno = 1687 (0x697), region = 80 }
 0x5f2   : > { %v2651_v13 = vpop.eup %2650 }
 0x5f3   : > { %v2264_v38 = vmul.f32 %v2651_v13, %v2258_v14 }
 0x5f5   : > { %2267 = vst [vmem:[#allocation4] sm:$0xff] %v2264_v38 }
 0x5f6   : > { %v2288_v54 = vld [vmem:[#allocation13 + $0x78] sm:$0xff]  ;;  %v2287_v23 = vld [vmem:[#allocation13 + $0x70] sm:$0xff]  ;;  %v2286_v24 = vld [vmem:[#allocation13 + $0x68] sm:$0xff] }
 0x5f7   : > { %2293 = vmatpush.msra.mxu0 %v2288_v54  ;;  %v2285_v25 = vld [vmem:[#allocation13 + $0x60] sm:$0xff]  ;;  %v2284_v4 = vld [vmem:[#allocation13 + $0x58] sm:$0xff]  ;;  %v2283_v17 = vld [vmem:[#allocation13 + $0x50] sm:$0xff] }
 0x5f8   : > { %v2282_v21 = vld [vmem:[#allocation13 + $0x48] sm:$0xff]  ;;  %v2281_v19 = vld [vmem:[#allocation13 + $0x40] sm:$0xff]  ;;  %v2280_v35 = vld [vmem:[#allocation13 + $0x38] sm:$0xff] }
 0x5f9   : > { %2294 = vmatpush.msra.mxu0 %v2287_v23  ;;  %v2279_v16 = vld [vmem:[#allocation13 + $0x30] sm:$0xff]  ;;  %v2278_v42 = vld [vmem:[#allocation13 + $0x28] sm:$0xff]  ;;  %v2277_v8 = vld [vmem:[#allocation13 + $0x20] sm:$0xff] }
 0x5fa   : > { %v2276_v46 = vld [vmem:[#allocation13 + $0x18] sm:$0xff]  ;;  %v2275_v36 = vld [vmem:[#allocation13 + $0x10] sm:$0xff]  ;;  %v2274_v48 = vld [vmem:[#allocation13 + $0x8] sm:$0xff] }
 0x5fb   : > { %2295 = vmatpush.msra.mxu0 %v2286_v24  ;;  %v2273_v51 = vld [vmem:[#allocation13] sm:$0xff] }
 0x5fc   : > { %v2844_v0 = vld [vmem:[%s4976_s8] ss:$0 sm:$0xff] }
 0x5fd   : > { %2296 = vmatpush.msra.mxu0 %v2285_v25 }
 0x5ff   : > { %2297 = vmatpush.msra.mxu0 %v2284_v4 }
 0x601   : > { %2298 = vmatpush.msra.mxu0 %v2283_v17 }
 0x603   : > { %2299 = vmatpush.msra.mxu0 %v2282_v21 }
 0x605   : > { %2300 = vmatpush.msra.mxu0 %v2281_v19 }
 0x607   : > { %2301 = vmatpush.msra.mxu0 %v2280_v35 }
 0x609   : > { %2302 = vmatpush.msra.mxu0 %v2279_v16 }
 0x60b   : > { %2303 = vmatpush.msra.mxu0 %v2278_v42 }
 0x60d   : > { %2304 = vmatpush.msra.mxu0 %v2277_v8 }
 0x60f   : > { %2305 = vmatpush.msra.mxu0 %v2276_v46 }
 0x611   : > { %2306 = vmatpush.msra.mxu0 %v2275_v36 }
 0x613   : > { %2307 = vmatpush.msra.mxu0 %v2274_v48 }
 0x615   : > { %2308 = vmatpush.msra.mxu0 %v2273_v51 }
 0x616   : > { %2309 = vmatmul.f32.vlgmr.msra.gmra.mxu0 %v2264_v38 }
 0x693   : > { %v2310_v60 = vpop.f32.mrf.mxu0 }
 0x694   : > { %v2311_v61 = vadd.f32 %v2844_v0, %v2310_v60 }
 0x696   : > { %2313 = vst [vmem:[#allocation15] sm:$0xff] %v2311_v61 }
 0x697 PF: > { %p2504_p9 = scmp.eq.s32.totalorder %s3083_s10, 1  ;;  %s3026_s26 = smov [#allocation15]  }
 0x698   : > { %s2320_s27 = sshll.u32 %s3026_s26, 4  ;;  %s2322_s11 = sshll.u32 %s4977_s9, 4  ;;  %s2321_s27 = int_to_ptr.vmem [resolvable:$true] %s2320_s27  ;;  %s2323_s11 = int_to_ptr.hbm [resolvable:$true] %s2322_s11 }
 0x699   : > { %2480 = dma.vmem_to_hbm [thread:$0]  (%p2504_p9), %s2321_s27, 128, %s2323_s11, [#allocation9]  }
 0x69a   : > { %3010 = dma.done.wait (%p2504_p9), [#allocation9], 128  }
 0x69b   : > { %3012 = vsyncadd (%p2504_p9), [#allocation9], 4294967168 }
 0x69c PF: > { %s23_s30 = sadd.s32 1, %s3015_s30  }
 0x69d   : > { %p20_p10 = scmp.ge.s32.totalorder %s23_s30, 4  }
 0x69f   :  { %22 = sbr.rel (!%p20_p10) target bundleno = 4 (0x4), region = 108 }
 0x6a4   :  { %2336 = vsyncpa [#allocation8], 1 }
 0x6a5   :  { %2338 = vsyncpa [#allocation8 + $0x1], 1 }
 0x6a6   :  { %2339 = vsyncpa [#allocation11], 1 }
 0x6a7   :  { %2340 = vsyncpa [#allocation14], 1 }
 0x6a8   :  { %2341 = vsyncpa [#allocation9], 1 }
 0x6a9   :  { %2343 = vsyncpa [#allocation9 + $0x1], 1 }

</bundles_post_ra>
